<compile_context>
chip_gen: v7x
topology: tpu7x:2x2x1
jax: 0.10.0
libtpu: 0.0.40
codegen_flags: <defaults>
</compile_context>

<pallas_src>
import jax
import jax.numpy as jnp
from jax import lax
from jax.experimental import pallas as pl
from jax.experimental.pallas import tpu as pltpu

EPS = 1e-5
SQRT_2_OVER_PI = 0.7978845608028654


def _gelu_tanh(x):
    # tanh-approx GELU (goes to the EUP slot instead of a VALU erf polynomial).
    # TODO(synk): use exact erf GELU if strict parity with nn.GELU() is needed.
    return 0.5 * x * (1.0 + jnp.tanh(SQRT_2_OVER_PI * (x + 0.044715 * (x * x * x))))


def _instance_norm_seq(x):
    # InstanceNorm1d (affine=False, eps=1e-5): normalize each channel over the
    # sequence axis (axis=1 of (B, L, C)), independently per batch element.
    mu = jnp.mean(x, axis=1, keepdims=True)
    var = jnp.mean((x - mu) ** 2, axis=1, keepdims=True)
    return (x - mu) * lax.rsqrt(var + EPS)


def _pad(x, m):
    return ((x + m - 1) // m) * m


def _fused_kernel(text_ref, image_ref, mask_ref, maskb_ref,
                  wvis_ref, wq_ref, wkv_ref, ww_ref, wmm_ref, slab_ref,
                  out_ref):
    layer = pl.program_id(1)

    bc, L, W = out_ref.shape
    HW, Dv = image_ref.shape[1], image_ref.shape[2]

    # Inter-layer carry lives directly in out_ref (its block index is constant
    # along the layer axis, so it stays resident in VMEM and is written back
    # to HBM exactly once per batch block).
    @pl.when(layer == 0)
    def _():
        out_ref[...] = text_ref[...]

    text = out_ref[...]                           # (bc, L, W) f32 carry
    mask = mask_ref[...]                          # (bc, L, 1) f32
    maskb = maskb_ref[...]                        # (bc, L, 1) f32 = 10000*(mask-1)
    text_bf = text.astype(jnp.bfloat16)

    # Packed per-layer bias / LN vectors (one (8, maxN) slab per layer).
    bvis = slab_ref[0:1, :Dv]
    bq = slab_ref[1:2, :W]
    bkv = slab_ref[2:3, :2 * W]
    bw = slab_ref[3:4, :W]
    bmm = slab_ref[4:5, :W]
    gamma = slab_ref[5:6, :W]
    beta = slab_ref[6:7, :W]

    # --- vis_project: Conv1d(Dv->Dv, k=1) + GELU (+Dropout=identity), batch-folded ---
    img2 = image_ref[...].reshape(bc * HW, Dv)                      # bf16
    vis2 = jnp.dot(img2, wvis_ref[...], preferred_element_type=jnp.float32) + bvis
    vis_bf = _gelu_tanh(vis2).astype(jnp.bfloat16)                  # (bc*HW, Dv)

    # --- SpatialImageLanguageAttention (num_heads = 1) ---
    # f_query: Conv1d(W->W) + InstanceNorm1d over seq, then masked.
    q2 = jnp.dot(text_bf.reshape(bc * L, W), wq_ref[...],
                 preferred_element_type=jnp.float32) + bq
    q = _instance_norm_seq(q2.reshape(bc, L, W)) * mask             # (bc, L, W)

    # Fused f_key / f_value projection on the visual features (batch-folded).
    kv = jnp.dot(vis_bf, wkv_ref[...], preferred_element_type=jnp.float32) + bkv
    kv = kv.reshape(bc, HW, 2 * W).astype(jnp.bfloat16)
    k = kv[:, :, :W]                                                # (bc, HW, W)
    v = kv[:, :, W:]                                                # (bc, HW, W)

    # scores (bc, L, HW); mask bias broadcasts over HW; softmax over the
    # language axis (torch softmax dim=-1 of (B, h, HW, L)) -> axis=1 here.
    # TODO(synk): 'blw,bhw->blh' is an NT contraction (implicit per-layer k
    # transpose on the XLU); if profiling shows XLU saturation, move the visual
    # path to channel-first layout so k is produced pre-transposed.
    s = jnp.einsum('blw,bhw->blh', q.astype(jnp.bfloat16), k,
                   preferred_element_type=jnp.float32) * (float(W) ** -0.5)
    s = s + maskb
    s = jnp.exp(s - jnp.max(s, axis=1, keepdims=True))
    s = s * pl.reciprocal(jnp.sum(s, axis=1, keepdims=True), approx=True)

    # TODO(synk): for very large HW (v7x, 64 MiB VMEM) tile this attention
    # block over HW with an exact accumulator (softmax is over L).
    attn = jnp.einsum('blh,bhw->blw', s.astype(jnp.bfloat16), v,
                      preferred_element_type=jnp.float32)           # (bc, L, W)

    # W: Conv1d(W->W) + InstanceNorm1d over seq.
    lang2 = jnp.dot(attn.astype(jnp.bfloat16).reshape(bc * L, W), ww_ref[...],
                    preferred_element_type=jnp.float32) + bw
    lang = _instance_norm_seq(lang2.reshape(bc, L, W))              # (bc, L, W)

    # --- mm = input_text * lang ; project_mm: Conv1d + GELU (+Dropout identity) ---
    mm = (text * lang).astype(jnp.bfloat16).reshape(bc * L, W)
    mm2 = _gelu_tanh(jnp.dot(mm, wmm_ref[...],
                             preferred_element_type=jnp.float32) + bmm)

    # --- ln_1: LayerNorm over width (fp32, eps=1e-5, affine) ---
    mu = jnp.mean(mm2, axis=-1, keepdims=True)
    var = jnp.mean((mm2 - mu) ** 2, axis=-1, keepdims=True)
    y = ((mm2 - mu) * lax.rsqrt(var + EPS) * gamma + beta).reshape(bc, L, W)

    out_ref[...] = y                              # carry to next layer / final writeback


def _pack_params(params, W, Dv):
    """Stack per-layer params along a leading layer axis.

    Conv1d weights come in PyTorch (out, in) layout -> pre-transpose to (in, out)
    and cast to bf16.  f_key/f_value are fused into one (Dv, 2W) weight.  The
    eight 1xN bias / LN vectors are packed into a single (8, maxN) f32 slab per
    layer (one DMA stream instead of eight)."""
    max_n = max(Dv, 2 * W)
    wvis, wq, wkv, ww, wmm, slabs = [], [], [], [], [], []
    for p in params:
        (w_vis, b_vis, w_q, b_q, w_k, b_k, w_v, b_v,
         w_w, b_w, w_mm, b_mm, g, bta) = p
        wvis.append(jnp.transpose(w_vis).astype(jnp.bfloat16))                 # (Dv, Dv)
        wq.append(jnp.transpose(w_q).astype(jnp.bfloat16))                     # (W, W)
        wkv.append(jnp.concatenate([jnp.transpose(w_k), jnp.transpose(w_v)],
                                   axis=1).astype(jnp.bfloat16))               # (Dv, 2W)
        ww.append(jnp.transpose(w_w).astype(jnp.bfloat16))                     # (W, W)
        wmm.append(jnp.transpose(w_mm).astype(jnp.bfloat16))                   # (W, W)

        slab = jnp.zeros((8, max_n), jnp.float32)
        slab = slab.at[0, :Dv].set(jnp.reshape(b_vis, (-1,)).astype(jnp.float32))
        slab = slab.at[1, :W].set(jnp.reshape(b_q, (-1,)).astype(jnp.float32))
        slab = slab.at[2, :2 * W].set(jnp.concatenate(
            [jnp.reshape(b_k, (-1,)), jnp.reshape(b_v, (-1,))]).astype(jnp.float32))
        slab = slab.at[3, :W].set(jnp.reshape(b_w, (-1,)).astype(jnp.float32))
        slab = slab.at[4, :W].set(jnp.reshape(b_mm, (-1,)).astype(jnp.float32))
        slab = slab.at[5, :W].set(jnp.reshape(g, (-1,)).astype(jnp.float32))
        slab = slab.at[6, :W].set(jnp.reshape(bta, (-1,)).astype(jnp.float32))
        slabs.append(slab)

    return (jnp.stack(wvis), jnp.stack(wq), jnp.stack(wkv),
            jnp.stack(ww), jnp.stack(wmm), jnp.stack(slabs))


def _num_tensorcores():
    """TensorCores addressable by one pallas_call via 'parallel' grid axes."""
    try:
        dev = jax.devices()[0]
        if dev.platform != "tpu":
            return 1
        n = getattr(dev, "num_cores", None)
        if isinstance(n, int) and n > 0:
            return n
        kind = str(getattr(dev, "device_kind", "")).lower()
        # v7x (2 TCs/chip) and v4/v5p megacore expose 2 TensorCores per device;
        # v5e / v6e have a single TensorCore.
        if any(tag in kind for tag in ("v7", "v4", "v5p")):
            return 2
        return 1
    except Exception:
        return 1


def _vmem_capacity_bytes():
    try:
        return int(pltpu.get_tpu_info().vmem_capacity_bytes)
    except Exception:
        return 64 * 1024 * 1024   # conservative: v7x per-TC capacity


def text_transformer_forward(text_lbw, image, text_mask, params):
    """text_lbw: (L, B, W) seq-first (PyTorch convention); image: (B, HW, Dv);
    text_mask: (B, L, 1).  Returns (L, B, W)."""
    L, B, W = text_lbw.shape
    HW, Dv = image.shape[1], image.shape[2]
    n_layers = len(params)
    max_n = max(Dv, 2 * W)

    wvis, wq, wkv, ww, wmm, slab = _pack_params(params, W, Dv)

    # Internal kernel layout is (B, L, W) (channels on the lane dim).
    text_blw = jnp.transpose(text_lbw, (1, 0, 2)).astype(jnp.float32)
    image_bf = image.astype(jnp.bfloat16)             # bf16 matmul operand only
    mask = text_mask.astype(jnp.float32)
    mask_bias = 10000.0 * (mask - 1.0)                 # hoisted: layer-invariant

    n_tc = _num_tensorcores()
    cap = max(_vmem_capacity_bytes(), 32 * 1024 * 1024)

    # ---- VMEM footprint estimates (padded to (8,128) tiles) ----
    def _intermediate_bytes(bc):
        return (bc * _pad(HW, 8) * _pad(Dv, 128) * 4            # vis (f32)
                + bc * _pad(HW, 8) * _pad(2 * W, 128) * 4        # kv (f32)
                + 2 * bc * _pad(L, 8) * _pad(HW, 128) * 4        # scores / exp
                + 6 * bc * _pad(L, 8) * _pad(W, 128) * 4)        # q/attn/lang/mm/y

    def _act_bytes(bc):
        return (2 * bc * _pad(L, 8) * _pad(W, 128) * 4           # text + out blocks
                + bc * _pad(HW, 8) * _pad(Dv, 128) * 2           # image block (bf16)
                + 2 * bc * _pad(L, 8) * 128 * 4                  # mask + mask_bias
                + _intermediate_bytes(bc))

    # ---- generation-aware batch split ----
    nb = n_tc if (n_tc > 1 and B % n_tc == 0) else 1
    # If one batch block would use more than ~60% of VMEM (matters on v7x's
    # 64 MiB/TC), split the batch further rather than shrinking matmul dims.
    while (B // nb) > 1 and _act_bytes(B // nb) > 0.6 * cap:
        nb2 = nb + 1
        while nb2 < B and B % nb2 != 0:
            nb2 += 1
        nb = min(nb2, B)
    bc = B // nb

    # ---- generation-aware VMEM limit ----
    w_layer_bytes = ((_pad(Dv, 8) * _pad(Dv, 128)
                      + 3 * _pad(W, 8) * _pad(W, 128)
                      + _pad(Dv, 8) * _pad(2 * W, 128)) * 2      # bf16 weights
                     + 8 * _pad(max_n, 128) * 4)                 # f32 bias slab
    weight_depth = 3 if (cap >= 96 * 1024 * 1024 and n_layers >= 3) else 2
    need = 2 * _act_bytes(bc) + weight_depth * w_layer_bytes + (8 << 20)
    vmem_limit = int(min(int(0.9 * cap), max(need, 48 << 20)))
    vmem_limit = max(vmem_limit, 16 << 20)

    def _call(use_buffered):
        sgl, wgt = {}, {}
        if use_buffered:
            # Layer-invariant blocks: single buffer; streamed weights: deeper pipeline.
            sgl = dict(pipeline_mode=pl.Buffered(1))
            wgt = dict(pipeline_mode=pl.Buffered(weight_depth))

        in_specs = [
            pl.BlockSpec((bc, L, W), lambda bb, l: (bb, 0, 0), **sgl),     # text
            pl.BlockSpec((bc, HW, Dv), lambda bb, l: (bb, 0, 0), **sgl),   # image
            pl.BlockSpec((bc, L, 1), lambda bb, l: (bb, 0, 0), **sgl),     # mask
            pl.BlockSpec((bc, L, 1), lambda bb, l: (bb, 0, 0), **sgl),     # mask bias
            pl.BlockSpec((None, Dv, Dv), lambda bb, l: (l, 0, 0), **wgt),      # wvis
            pl.BlockSpec((None, W, W), lambda bb, l: (l, 0, 0), **wgt),        # wq
            pl.BlockSpec((None, Dv, 2 * W), lambda bb, l: (l, 0, 0), **wgt),   # wkv
            pl.BlockSpec((None, W, W), lambda bb, l: (l, 0, 0), **wgt),        # ww
            pl.BlockSpec((None, W, W), lambda bb, l: (l, 0, 0), **wgt),        # wmm
            pl.BlockSpec((None, 8, max_n), lambda bb, l: (l, 0, 0), **wgt),    # bias slab
        ]
        out_spec = pl.BlockSpec((bc, L, W), lambda bb, l: (bb, 0, 0), **sgl)

        grid_spec = pltpu.PrefetchScalarGridSpec(
            num_scalar_prefetch=0,
            grid=(nb, n_layers),
            in_specs=in_specs,
            out_specs=out_spec,
        )
        return pl.pallas_call(
            _fused_kernel,
            out_shape=jax.ShapeDtypeStruct((B, L, W), jnp.float32),
            grid_spec=grid_spec,
            compiler_params=pltpu.CompilerParams(
                dimension_semantics=("parallel", "arbitrary"),
                vmem_limit_bytes=vmem_limit,
            ),
        )(text_blw, image_bf, mask, mask_bias, wvis, wq, wkv, ww, wmm, slab)

    try:
        out_blw = jax.block_until_ready(_call(True))
    except Exception:
        # Defensive fallback for jax versions without BlockSpec pipeline_mode /
        # pl.Buffered support: identical kernel, default double-buffering.
        out_blw = jax.block_until_ready(_call(False))

    return jnp.transpose(out_blw, (1, 0, 2))          # back to seq-first (L, B, W)


def init_params(key, layer_num, width, vis_dim):
    """Deterministic synthetic parameters matching the module's shapes
    (Conv1d kernel_size=1 weights stored as (out, in); biases as (1, out))."""
    params = []
    for _ in range(layer_num):
        key, *ks = jax.random.split(key, 7)
        w = lambda k, shape: jax.random.normal(k, shape, jnp.float32) * 0.02
        layer = (
            w(ks[0], (vis_dim, vis_dim)), jnp.zeros((1, vis_dim), jnp.float32),   # vis_project
            w(ks[1], (width, width)), jnp.zeros((1, width), jnp.float32),         # f_query
            w(ks[2], (width, vis_dim)), jnp.zeros((1, width), jnp.float32),       # f_key
            w(ks[3], (width, vis_dim)), jnp.zeros((1, width), jnp.float32),       # f_value
            w(ks[4], (width, width)), jnp.zeros((1, width), jnp.float32),         # W (out proj)
            w(ks[5], (width, width)), jnp.zeros((1, width), jnp.float32),         # project_mm
            jnp.ones((1, width), jnp.float32), jnp.zeros((1, width), jnp.float32),  # ln_1
        )
        params.append(layer)
    return params


if __name__ == "__main__":
    # Lane-aligned small shapes (W, Dv multiples of 128; L, HW multiples of 8):
    # avoids masked partial-lane stores and relayout copies in the batch folds.
    B, L, W, HW, Dv, LAYERS = 2, 16, 128, 64, 128, 2   # heads = 1

    key = jax.random.PRNGKey(0)
    k1, k2, k3, k4 = jax.random.split(key, 4)
    text = jax.random.normal(k1, (L, B, W), jnp.float32)          # (seq, batch, width)
    image = jax.random.normal(k2, (B, HW, Dv), jnp.float32)       # (batch, HW, vis_dim)
    text_mask = (jax.random.uniform(k3, (B, L, 1)) > 0.3).astype(jnp.float32)
    params = init_params(k4, LAYERS, W, Dv)

    out = text_transformer_forward(text, image, text_mask, params)
    out = jax.block_until_ready(out)
    assert out.shape == (L, B, W)
    assert bool(jnp.all(jnp.isfinite(out)))
    print("KERNEL_OK")
</pallas_src>

<mosaic_0001>
module attributes {stable_mosaic.version = 11 : i64} {
  func.func @_fused_kernel(%arg0: i32, %arg1: i32, %arg2: memref<2x16x128xf32, #tpu.memory_space<vmem>>, %arg3: memref<2x64x128xbf16, #tpu.memory_space<vmem>>, %arg4: memref<2x16x1xf32, #tpu.memory_space<vmem>>, %arg5: memref<2x16x1xf32, #tpu.memory_space<vmem>>, %arg6: memref<1x128x128xbf16, #tpu.memory_space<vmem>>, %arg7: memref<1x128x128xbf16, #tpu.memory_space<vmem>>, %arg8: memref<1x128x256xbf16, #tpu.memory_space<vmem>>, %arg9: memref<1x128x128xbf16, #tpu.memory_space<vmem>>, %arg10: memref<1x128x128xbf16, #tpu.memory_space<vmem>>, %arg11: memref<1x8x256xf32, #tpu.memory_space<vmem>>, %arg12: memref<2x16x128xf32, #tpu.memory_space<vmem>>) attributes {dimension_semantics = [#tpu.dimension_semantics<parallel>, #tpu.dimension_semantics<arbitrary>], iteration_bounds = array<i64: 1, 2>, scalar_prefetch = 0 : i64, scratch_operands = 0 : i64, tpu.core_type = #tpu.core_type<tc>, window_params = [{pipeline_mode = #tpu.pipeline_mode<synchronous>, transform_indices = @transform_0, window_bounds = array<i64: 2, 16, 128>}, {pipeline_mode = #tpu.pipeline_mode<synchronous>, transform_indices = @transform_1, window_bounds = array<i64: 2, 64, 128>}, {pipeline_mode = #tpu.pipeline_mode<synchronous>, transform_indices = @transform_2, window_bounds = array<i64: 2, 16, 1>}, {pipeline_mode = #tpu.pipeline_mode<synchronous>, transform_indices = @transform_3, window_bounds = array<i64: 2, 16, 1>}, {pipeline_mode = #tpu.pipeline_mode<double_buffered>, transform_indices = @transform_4, window_bounds = array<i64: 1, 128, 128>}, {pipeline_mode = #tpu.pipeline_mode<double_buffered>, transform_indices = @transform_5, window_bounds = array<i64: 1, 128, 128>}, {pipeline_mode = #tpu.pipeline_mode<double_buffered>, transform_indices = @transform_6, window_bounds = array<i64: 1, 128, 256>}, {pipeline_mode = #tpu.pipeline_mode<double_buffered>, transform_indices = @transform_7, window_bounds = array<i64: 1, 128, 128>}, {pipeline_mode = #tpu.pipeline_mode<double_buffered>, transform_indices = @transform_8, window_bounds = array<i64: 1, 128, 128>}, {pipeline_mode = #tpu.pipeline_mode<double_buffered>, transform_indices = @transform_9, window_bounds = array<i64: 1, 8, 256>}, {pipeline_mode = #tpu.pipeline_mode<synchronous>, transform_indices = @transform_10, window_bounds = array<i64: 2, 16, 128>}]} {
    %c0_i32 = arith.constant 0 : i32
    %0 = arith.cmpi eq, %arg1, %c0_i32 : i32
    %1 = arith.extui %0 : i1 to i32
    %c0_i32_0 = arith.constant 0 : i32
    %2 = arith.cmpi ne, %1, %c0_i32_0 : i32
    scf.if %2 {
      %c0_77 = arith.constant 0 : index
      %c0_78 = arith.constant 0 : index
      %c0_79 = arith.constant 0 : index
      %167 = vector.load %arg2[%c0_77, %c0_78, %c0_79] : memref<2x16x128xf32, #tpu.memory_space<vmem>>, vector<2x16x128xf32>
      %c0_80 = arith.constant 0 : index
      %c0_81 = arith.constant 0 : index
      %c0_82 = arith.constant 0 : index
      %168 = vector.load %arg12[%c0_80, %c0_81, %c0_82] : memref<2x16x128xf32, #tpu.memory_space<vmem>>, vector<2x16x128xf32>
      tpu.vector_store %arg12[%c0_80, %c0_81, %c0_82], %167 {strides = array<i32>} : memref<2x16x128xf32, #tpu.memory_space<vmem>>, vector<2x16x128xf32>,
    } else {
    }
    %c0 = arith.constant 0 : index
    %c0_1 = arith.constant 0 : index
    %c0_2 = arith.constant 0 : index
    %3 = vector.load %arg12[%c0, %c0_1, %c0_2] : memref<2x16x128xf32, #tpu.memory_space<vmem>>, vector<2x16x128xf32>
    %c0_3 = arith.constant 0 : index
    %c0_4 = arith.constant 0 : index
    %c0_5 = arith.constant 0 : index
    %4 = vector.load %arg4[%c0_3, %c0_4, %c0_5] : memref<2x16x1xf32, #tpu.memory_space<vmem>>, vector<2x16x1xf32>
    %c0_6 = arith.constant 0 : index
    %c0_7 = arith.constant 0 : index
    %c0_8 = arith.constant 0 : index
    %5 = vector.load %arg5[%c0_6, %c0_7, %c0_8] : memref<2x16x1xf32, #tpu.memory_space<vmem>>, vector<2x16x1xf32>
    %6 = arith.truncf %3 : vector<2x16x128xf32> to vector<2x16x128xbf16>
    %c0_9 = arith.constant 0 : index
    %c0_10 = arith.constant 0 : index
    %c0_11 = arith.constant 0 : index
    %7 = vector.load %arg11[%c0_9, %c0_10, %c0_11] : memref<1x8x256xf32, #tpu.memory_space<vmem>>, vector<1x1x128xf32>
    %8 = vector.shape_cast %7 : vector<1x1x128xf32> to vector<1x128xf32>
    %c0_12 = arith.constant 0 : index
    %c1 = arith.constant 1 : index
    %c0_13 = arith.constant 0 : index
    %9 = vector.load %arg11[%c0_12, %c1, %c0_13] : memref<1x8x256xf32, #tpu.memory_space<vmem>>, vector<1x1x128xf32>
    %10 = vector.shape_cast %9 : vector<1x1x128xf32> to vector<1x128xf32>
    %c0_14 = arith.constant 0 : index
    %c2 = arith.constant 2 : index
    %c0_15 = arith.constant 0 : index
    %11 = vector.load %arg11[%c0_14, %c2, %c0_15] : memref<1x8x256xf32, #tpu.memory_space<vmem>>, vector<1x1x256xf32>
    %12 = vector.shape_cast %11 : vector<1x1x256xf32> to vector<1x256xf32>
    %c0_16 = arith.constant 0 : index
    %c3 = arith.constant 3 : index
    %c0_17 = arith.constant 0 : index
    %13 = vector.load %arg11[%c0_16, %c3, %c0_17] : memref<1x8x256xf32, #tpu.memory_space<vmem>>, vector<1x1x128xf32>
    %14 = vector.shape_cast %13 : vector<1x1x128xf32> to vector<1x128xf32>
    %c0_18 = arith.constant 0 : index
    %c4 = arith.constant 4 : index
    %c0_19 = arith.constant 0 : index
    %15 = vector.load %arg11[%c0_18, %c4, %c0_19] : memref<1x8x256xf32, #tpu.memory_space<vmem>>, vector<1x1x128xf32>
    %16 = vector.shape_cast %15 : vector<1x1x128xf32> to vector<1x128xf32>
    %c0_20 = arith.constant 0 : index
    %c5 = arith.constant 5 : index
    %c0_21 = arith.constant 0 : index
    %17 = vector.load %arg11[%c0_20, %c5, %c0_21] : memref<1x8x256xf32, #tpu.memory_space<vmem>>, vector<1x1x128xf32>
    %18 = vector.shape_cast %17 : vector<1x1x128xf32> to vector<1x128xf32>
    %c0_22 = arith.constant 0 : index
    %c6 = arith.constant 6 : index
    %c0_23 = arith.constant 0 : index
    %19 = vector.load %arg11[%c0_22, %c6, %c0_23] : memref<1x8x256xf32, #tpu.memory_space<vmem>>, vector<1x1x128xf32>
    %20 = vector.shape_cast %19 : vector<1x1x128xf32> to vector<1x128xf32>
    %c0_24 = arith.constant 0 : index
    %c0_25 = arith.constant 0 : index
    %c0_26 = arith.constant 0 : index
    %21 = vector.load %arg3[%c0_24, %c0_25, %c0_26] : memref<2x64x128xbf16, #tpu.memory_space<vmem>>, vector<2x64x128xbf16>
    %22 = vector.shape_cast %21 : vector<2x64x128xbf16> to vector<128x128xbf16>
    %c0_27 = arith.constant 0 : index
    %c0_28 = arith.constant 0 : index
    %c0_29 = arith.constant 0 : index
    %23 = vector.load %arg6[%c0_27, %c0_28, %c0_29] : memref<1x128x128xbf16, #tpu.memory_space<vmem>>, vector<1x128x128xbf16>
    %24 = vector.shape_cast %23 : vector<1x128x128xbf16> to vector<128x128xbf16>
    %cst = arith.constant dense<0.000000e+00> : vector<128x128xf32>
    %25 = tpu.matmul %22, %24, %cst {dimension_numbers = #tpu.dot_dimension_numbers<[1], [0], [0], [1], [0, 0, 1, 1], [], []>} : vector<128x128xbf16>, vector<128x128xbf16>, vector<128x128xf32> -> vector<128x128xf32>
    %26 = vector.broadcast %8 : vector<1x128xf32> to vector<128x128xf32>
    %27 = arith.addf %25, %26 : vector<128x128xf32>
    %cst_30 = arith.constant 5.000000e-01 : f32
    %28 = vector.broadcast %cst_30 : f32 to vector<128x128xf32>
    %29 = arith.mulf %28, %27 : vector<128x128xf32>
    %30 = arith.mulf %27, %27 : vector<128x128xf32>
    %31 = arith.mulf %30, %27 : vector<128x128xf32>
    %cst_31 = arith.constant 4.471500e-02 : f32
    %32 = vector.broadcast %cst_31 : f32 to vector<128x128xf32>
    %33 = arith.mulf %32, %31 : vector<128x128xf32>
    %34 = arith.addf %27, %33 : vector<128x128xf32>
    %cst_32 = arith.constant 0.797884583 : f32
    %35 = vector.broadcast %cst_32 : f32 to vector<128x128xf32>
    %36 = arith.mulf %35, %34 : vector<128x128xf32>
    %37 = math.tanh %36 : vector<128x128xf32>
    %cst_33 = arith.constant 1.000000e+00 : f32
    %38 = vector.broadcast %cst_33 : f32 to vector<128x128xf32>
    %39 = arith.addf %38, %37 : vector<128x128xf32>
    %40 = arith.mulf %29, %39 : vector<128x128xf32>
    %41 = arith.truncf %40 : vector<128x128xf32> to vector<128x128xbf16>
    %42 = vector.shape_cast %6 : vector<2x16x128xbf16> to vector<32x128xbf16>
    %c0_34 = arith.constant 0 : index
    %c0_35 = arith.constant 0 : index
    %c0_36 = arith.constant 0 : index
    %43 = vector.load %arg7[%c0_34, %c0_35, %c0_36] : memref<1x128x128xbf16, #tpu.memory_space<vmem>>, vector<1x128x128xbf16>
    %44 = vector.shape_cast %43 : vector<1x128x128xbf16> to vector<128x128xbf16>
    %cst_37 = arith.constant dense<0.000000e+00> : vector<32x128xf32>
    %45 = tpu.matmul %42, %44, %cst_37 {dimension_numbers = #tpu.dot_dimension_numbers<[1], [0], [0], [1], [0, 0, 1, 1], [], []>} : vector<32x128xbf16>, vector<128x128xbf16>, vector<32x128xf32> -> vector<32x128xf32>
    %46 = vector.broadcast %10 : vector<1x128xf32> to vector<32x128xf32>
    %47 = arith.addf %45, %46 : vector<32x128xf32>
    %48 = vector.shape_cast %47 : vector<32x128xf32> to vector<2x16x128xf32>
    %cst_38 = arith.constant dense<0.000000e+00> : vector<2x128xf32>
    %49 = vector.multi_reduction <add>, %48, %cst_38 [1] : vector<2x16x128xf32> to vector<2x128xf32>
    %50 = vector.shape_cast %49 : vector<2x128xf32> to vector<2x1x128xf32>
    %cst_39 = arith.constant 1.600000e+01 : f32
    %51 = vector.broadcast %cst_39 : f32 to vector<2x1x128xf32>
    %52 = arith.divf %50, %51 : vector<2x1x128xf32>
    %53 = vector.broadcast %52 : vector<2x1x128xf32> to vector<2x16x128xf32>
    %54 = arith.subf %48, %53 : vector<2x16x128xf32>
    %55 = arith.mulf %54, %54 : vector<2x16x128xf32>
    %cst_40 = arith.constant dense<0.000000e+00> : vector<2x128xf32>
    %56 = vector.multi_reduction <add>, %55, %cst_40 [1] : vector<2x16x128xf32> to vector<2x128xf32>
    %57 = vector.shape_cast %56 : vector<2x128xf32> to vector<2x1x128xf32>
    %cst_41 = arith.constant 1.600000e+01 : f32
    %58 = vector.broadcast %cst_41 : f32 to vector<2x1x128xf32>
    %59 = arith.divf %57, %58 : vector<2x1x128xf32>
    %60 = vector.broadcast %52 : vector<2x1x128xf32> to vector<2x16x128xf32>
    %61 = arith.subf %48, %60 : vector<2x16x128xf32>
    %cst_42 = arith.constant 9.99999974E-6 : f32
    %62 = vector.broadcast %cst_42 : f32 to vector<2x1x128xf32>
    %63 = arith.addf %59, %62 : vector<2x1x128xf32>
    %64 = math.rsqrt %63 : vector<2x1x128xf32>
    %65 = vector.broadcast %64 : vector<2x1x128xf32> to vector<2x16x128xf32>
    %66 = arith.mulf %61, %65 : vector<2x16x128xf32>
    %67 = vector.broadcast %4 : vector<2x16x1xf32> to vector<2x16x128xf32>
    %68 = arith.mulf %66, %67 : vector<2x16x128xf32>
    %c0_43 = arith.constant 0 : index
    %c0_44 = arith.constant 0 : index
    %c0_45 = arith.constant 0 : index
    %69 = vector.load %arg8[%c0_43, %c0_44, %c0_45] : memref<1x128x256xbf16, #tpu.memory_space<vmem>>, vector<1x128x256xbf16>
    %70 = vector.shape_cast %69 : vector<1x128x256xbf16> to vector<128x256xbf16>
    %cst_46 = arith.constant dense<0.000000e+00> : vector<128x256xf32>
    %71 = tpu.matmul %41, %70, %cst_46 {dimension_numbers = #tpu.dot_dimension_numbers<[1], [0], [0], [1], [0, 0, 1, 1], [], []>} : vector<128x128xbf16>, vector<128x256xbf16>, vector<128x256xf32> -> vector<128x256xf32>
    %72 = vector.broadcast %12 : vector<1x256xf32> to vector<128x256xf32>
    %73 = arith.addf %71, %72 : vector<128x256xf32>
    %74 = vector.shape_cast %73 : vector<128x256xf32> to vector<2x64x256xf32>
    %75 = arith.truncf %74 : vector<2x64x256xf32> to vector<2x64x256xbf16>
    %76 = vector.extract_strided_slice %75 {offsets = [0, 0, 0], sizes = [2, 64, 128], strides = [1, 1, 1]} : vector<2x64x256xbf16> to vector<2x64x128xbf16>
    %77 = vector.extract_strided_slice %75 {offsets = [0, 0, 128], sizes = [2, 64, 128], strides = [1, 1, 1]} : vector<2x64x256xbf16> to vector<2x64x128xbf16>
    %78 = arith.truncf %68 : vector<2x16x128xf32> to vector<2x16x128xbf16>
    "tpu.trace_start"() <{level = 10 : i32, message = "blw,bhw->blh"}> : () -> ()
    %cst_47 = arith.constant dense<0.000000e+00> : vector<2x16x64xf32>
    %79 = tpu.matmul %78, %76, %cst_47 {dimension_numbers = #tpu.dot_dimension_numbers<[2], [2], [1], [1], [0, 0, 0, 1, 1, 1], [0], [0]>} : vector<2x16x128xbf16>, vector<2x64x128xbf16>, vector<2x16x64xf32> -> vector<2x16x64xf32>
    "tpu.trace_stop"() : () -> ()
    %cst_48 = arith.constant 0.0883883461 : f32
    %80 = vector.broadcast %cst_48 : f32 to vector<2x16x64xf32>
    %81 = arith.mulf %79, %80 : vector<2x16x64xf32>
    %82 = vector.broadcast %5 : vector<2x16x1xf32> to vector<2x16x64xf32>
    %83 = arith.addf %81, %82 : vector<2x16x64xf32>
    %cst_49 = arith.constant dense<0xFF800000> : vector<2x64xf32>
    %84 = vector.multi_reduction <maximumf>, %83, %cst_49 [1] : vector<2x16x64xf32> to vector<2x64xf32>
    %85 = vector.shape_cast %84 : vector<2x64xf32> to vector<2x1x64xf32>
    %86 = vector.broadcast %85 : vector<2x1x64xf32> to vector<2x16x64xf32>
    %87 = arith.subf %83, %86 : vector<2x16x64xf32>
    %88 = math.exp %87 : vector<2x16x64xf32>
    %cst_50 = arith.constant dense<0.000000e+00> : vector<2x64xf32>
    %89 = vector.multi_reduction <add>, %88, %cst_50 [1] : vector<2x16x64xf32> to vector<2x64xf32>
    %90 = vector.shape_cast %89 : vector<2x64xf32> to vector<2x1x64xf32>
    %91 = tpu.reciprocal %90 {approx = true} : vector<2x1x64xf32> -> vector<2x1x64xf32>
    %92 = vector.broadcast %91 : vector<2x1x64xf32> to vector<2x16x64xf32>
    %93 = arith.mulf %88, %92 : vector<2x16x64xf32>
    %94 = arith.truncf %93 : vector<2x16x64xf32> to vector<2x16x64xbf16>
    "tpu.trace_start"() <{level = 10 : i32, message = "blh,bhw->blw"}> : () -> ()
    %cst_51 = arith.constant dense<0.000000e+00> : vector<2x16x128xf32>
    %95 = tpu.matmul %94, %77, %cst_51 {dimension_numbers = #tpu.dot_dimension_numbers<[2], [1], [1], [2], [0, 0, 0, 1, 1, 2], [0], [0]>} : vector<2x16x64xbf16>, vector<2x64x128xbf16>, vector<2x16x128xf32> -> vector<2x16x128xf32>
    "tpu.trace_stop"() : () -> ()
    %96 = arith.truncf %95 : vector<2x16x128xf32> to vector<2x16x128xbf16>
    %97 = vector.shape_cast %96 : vector<2x16x128xbf16> to vector<32x128xbf16>
    %c0_52 = arith.constant 0 : index
    %c0_53 = arith.constant 0 : index
    %c0_54 = arith.constant 0 : index
    %98 = vector.load %arg9[%c0_52, %c0_53, %c0_54] : memref<1x128x128xbf16, #tpu.memory_space<vmem>>, vector<1x128x128xbf16>
    %99 = vector.shape_cast %98 : vector<1x128x128xbf16> to vector<128x128xbf16>
    %cst_55 = arith.constant dense<0.000000e+00> : vector<32x128xf32>
    %100 = tpu.matmul %97, %99, %cst_55 {dimension_numbers = #tpu.dot_dimension_numbers<[1], [0], [0], [1], [0, 0, 1, 1], [], []>} : vector<32x128xbf16>, vector<128x128xbf16>, vector<32x128xf32> -> vector<32x128xf32>
    %101 = vector.broadcast %14 : vector<1x128xf32> to vector<32x128xf32>
    %102 = arith.addf %100, %101 : vector<32x128xf32>
    %103 = vector.shape_cast %102 : vector<32x128xf32> to vector<2x16x128xf32>
    %cst_56 = arith.constant dense<0.000000e+00> : vector<2x128xf32>
    %104 = vector.multi_reduction <add>, %103, %cst_56 [1] : vector<2x16x128xf32> to vector<2x128xf32>
    %105 = vector.shape_cast %104 : vector<2x128xf32> to vector<2x1x128xf32>
    %cst_57 = arith.constant 1.600000e+01 : f32
    %106 = vector.broadcast %cst_57 : f32 to vector<2x1x128xf32>
    %107 = arith.divf %105, %106 : vector<2x1x128xf32>
    %108 = vector.broadcast %107 : vector<2x1x128xf32> to vector<2x16x128xf32>
    %109 = arith.subf %103, %108 : vector<2x16x128xf32>
    %110 = arith.mulf %109, %109 : vector<2x16x128xf32>
    %cst_58 = arith.constant dense<0.000000e+00> : vector<2x128xf32>
    %111 = vector.multi_reduction <add>, %110, %cst_58 [1] : vector<2x16x128xf32> to vector<2x128xf32>
    %112 = vector.shape_cast %111 : vector<2x128xf32> to vector<2x1x128xf32>
    %cst_59 = arith.constant 1.600000e+01 : f32
    %113 = vector.broadcast %cst_59 : f32 to vector<2x1x128xf32>
    %114 = arith.divf %112, %113 : vector<2x1x128xf32>
    %115 = vector.broadcast %107 : vector<2x1x128xf32> to vector<2x16x128xf32>
    %116 = arith.subf %103, %115 : vector<2x16x128xf32>
    %cst_60 = arith.constant 9.99999974E-6 : f32
    %117 = vector.broadcast %cst_60 : f32 to vector<2x1x128xf32>
    %118 = arith.addf %114, %117 : vector<2x1x128xf32>
    %119 = math.rsqrt %118 : vector<2x1x128xf32>
    %120 = vector.broadcast %119 : vector<2x1x128xf32> to vector<2x16x128xf32>
    %121 = arith.mulf %116, %120 : vector<2x16x128xf32>
    %122 = arith.mulf %3, %121 : vector<2x16x128xf32>
    %123 = arith.truncf %122 : vector<2x16x128xf32> to vector<2x16x128xbf16>
    %124 = vector.shape_cast %123 : vector<2x16x128xbf16> to vector<32x128xbf16>
    %c0_61 = arith.constant 0 : index
    %c0_62 = arith.constant 0 : index
    %c0_63 = arith.constant 0 : index
    %125 = vector.load %arg10[%c0_61, %c0_62, %c0_63] : memref<1x128x128xbf16, #tpu.memory_space<vmem>>, vector<1x128x128xbf16>
    %126 = vector.shape_cast %125 : vector<1x128x128xbf16> to vector<128x128xbf16>
    %cst_64 = arith.constant dense<0.000000e+00> : vector<32x128xf32>
    %127 = tpu.matmul %124, %126, %cst_64 {dimension_numbers = #tpu.dot_dimension_numbers<[1], [0], [0], [1], [0, 0, 1, 1], [], []>} : vector<32x128xbf16>, vector<128x128xbf16>, vector<32x128xf32> -> vector<32x128xf32>
    %128 = vector.broadcast %16 : vector<1x128xf32> to vector<32x128xf32>
    %129 = arith.addf %127, %128 : vector<32x128xf32>
    %cst_65 = arith.constant 5.000000e-01 : f32
    %130 = vector.broadcast %cst_65 : f32 to vector<32x128xf32>
    %131 = arith.mulf %130, %129 : vector<32x128xf32>
    %132 = arith.mulf %129, %129 : vector<32x128xf32>
    %133 = arith.mulf %132, %129 : vector<32x128xf32>
    %cst_66 = arith.constant 4.471500e-02 : f32
    %134 = vector.broadcast %cst_66 : f32 to vector<32x128xf32>
    %135 = arith.mulf %134, %133 : vector<32x128xf32>
    %136 = arith.addf %129, %135 : vector<32x128xf32>
    %cst_67 = arith.constant 0.797884583 : f32
    %137 = vector.broadcast %cst_67 : f32 to vector<32x128xf32>
    %138 = arith.mulf %137, %136 : vector<32x128xf32>
    %139 = math.tanh %138 : vector<32x128xf32>
    %cst_68 = arith.constant 1.000000e+00 : f32
    %140 = vector.broadcast %cst_68 : f32 to vector<32x128xf32>
    %141 = arith.addf %140, %139 : vector<32x128xf32>
    %142 = arith.mulf %131, %141 : vector<32x128xf32>
    %cst_69 = arith.constant dense<0.000000e+00> : vector<32xf32>
    %143 = vector.multi_reduction <add>, %142, %cst_69 [1] : vector<32x128xf32> to vector<32xf32>
    %144 = vector.shape_cast %143 : vector<32xf32> to vector<32x1xf32>
    %cst_70 = arith.constant 1.280000e+02 : f32
    %145 = vector.broadcast %cst_70 : f32 to vector<32x1xf32>
    %146 = arith.divf %144, %145 : vector<32x1xf32>
    %147 = vector.broadcast %146 : vector<32x1xf32> to vector<32x128xf32>
    %148 = arith.subf %142, %147 : vector<32x128xf32>
    %149 = arith.mulf %148, %148 : vector<32x128xf32>
    %cst_71 = arith.constant dense<0.000000e+00> : vector<32xf32>
    %150 = vector.multi_reduction <add>, %149, %cst_71 [1] : vector<32x128xf32> to vector<32xf32>
    %151 = vector.shape_cast %150 : vector<32xf32> to vector<32x1xf32>
    %cst_72 = arith.constant 1.280000e+02 : f32
    %152 = vector.broadcast %cst_72 : f32 to vector<32x1xf32>
    %153 = arith.divf %151, %152 : vector<32x1xf32>
    %154 = vector.broadcast %146 : vector<32x1xf32> to vector<32x128xf32>
    %155 = arith.subf %142, %154 : vector<32x128xf32>
    %cst_73 = arith.constant 9.99999974E-6 : f32
    %156 = vector.broadcast %cst_73 : f32 to vector<32x1xf32>
    %157 = arith.addf %153, %156 : vector<32x1xf32>
    %158 = math.rsqrt %157 : vector<32x1xf32>
    %159 = vector.broadcast %158 : vector<32x1xf32> to vector<32x128xf32>
    %160 = arith.mulf %155, %159 : vector<32x128xf32>
    %161 = vector.broadcast %18 : vector<1x128xf32> to vector<32x128xf32>
    %162 = arith.mulf %160, %161 : vector<32x128xf32>
    %163 = vector.broadcast %20 : vector<1x128xf32> to vector<32x128xf32>
    %164 = arith.addf %162, %163 : vector<32x128xf32>
    %165 = vector.shape_cast %164 : vector<32x128xf32> to vector<2x16x128xf32>
    %c0_74 = arith.constant 0 : index
    %c0_75 = arith.constant 0 : index
    %c0_76 = arith.constant 0 : index
    %166 = vector.load %arg12[%c0_74, %c0_75, %c0_76] : memref<2x16x128xf32, #tpu.memory_space<vmem>>, vector<2x16x128xf32>
    tpu.vector_store %arg12[%c0_74, %c0_75, %c0_76], %165 {strides = array<i32>} : memref<2x16x128xf32, #tpu.memory_space<vmem>>, vector<2x16x128xf32>,
    return
  }
  func.func @transform_0(%arg0: i32, %arg1: i32) -> (i32, i32, i32) {
    %c0_i32 = arith.constant 0 : i32
    %c0_i32_0 = arith.constant 0 : i32
    %c0_i32_1 = arith.constant 0 : i32
    return %arg0, %c0_i32, %c0_i32_0 : i32, i32, i32
  }
  func.func @transform_1(%arg0: i32, %arg1: i32) -> (i32, i32, i32) {
    %c0_i32 = arith.constant 0 : i32
    %c0_i32_0 = arith.constant 0 : i32
    %c0_i32_1 = arith.constant 0 : i32
    return %arg0, %c0_i32, %c0_i32_0 : i32, i32, i32
  }
  func.func @transform_2(%arg0: i32, %arg1: i32) -> (i32, i32, i32) {
    %c0_i32 = arith.constant 0 : i32
    %c0_i32_0 = arith.constant 0 : i32
    %c0_i32_1 = arith.constant 0 : i32
    return %arg0, %c0_i32, %c0_i32_0 : i32, i32, i32
  }
  func.func @transform_3(%arg0: i32, %arg1: i32) -> (i32, i32, i32) {
    %c0_i32 = arith.constant 0 : i32
    %c0_i32_0 = arith.constant 0 : i32
    %c0_i32_1 = arith.constant 0 : i32
    return %arg0, %c0_i32, %c0_i32_0 : i32, i32, i32
  }
  func.func @transform_4(%arg0: i32, %arg1: i32) -> (i32, i32, i32) {
    %c0_i32 = arith.constant 0 : i32
    %c0_i32_0 = arith.constant 0 : i32
    %c0_i32_1 = arith.constant 0 : i32
    return %arg1, %c0_i32, %c0_i32_0 : i32, i32, i32
  }
  func.func @transform_5(%arg0: i32, %arg1: i32) -> (i32, i32, i32) {
    %c0_i32 = arith.constant 0 : i32
    %c0_i32_0 = arith.constant 0 : i32
    %c0_i32_1 = arith.constant 0 : i32
    return %arg1, %c0_i32, %c0_i32_0 : i32, i32, i32
  }
  func.func @transform_6(%arg0: i32, %arg1: i32) -> (i32, i32, i32) {
    %c0_i32 = arith.constant 0 : i32
    %c0_i32_0 = arith.constant 0 : i32
    %c0_i32_1 = arith.constant 0 : i32
    return %arg1, %c0_i32, %c0_i32_0 : i32, i32, i32
  }
  func.func @transform_7(%arg0: i32, %arg1: i32) -> (i32, i32, i32) {
    %c0_i32 = arith.constant 0 : i32
    %c0_i32_0 = arith.constant 0 : i32
    %c0_i32_1 = arith.constant 0 : i32
    return %arg1, %c0_i32, %c0_i32_0 : i32, i32, i32
  }
  func.func @transform_8(%arg0: i32, %arg1: i32) -> (i32, i32, i32) {
    %c0_i32 = arith.constant 0 : i32
    %c0_i32_0 = arith.constant 0 : i32
    %c0_i32_1 = arith.constant 0 : i32
    return %arg1, %c0_i32, %c0_i32_0 : i32, i32, i32
  }
  func.func @transform_9(%arg0: i32, %arg1: i32) -> (i32, i32, i32) {
    %c0_i32 = arith.constant 0 : i32
    %c0_i32_0 = arith.constant 0 : i32
    %c0_i32_1 = arith.constant 0 : i32
    return %arg1, %c0_i32, %c0_i32_0 : i32, i32, i32
  }
  func.func @transform_10(%arg0: i32, %arg1: i32) -> (i32, i32, i32) {
    %c0_i32 = arith.constant 0 : i32
    %c0_i32_0 = arith.constant 0 : i32
    %c0_i32_1 = arith.constant 0 : i32
    return %arg0, %c0_i32, %c0_i32_0 : i32, i32, i32
  }
}

module attributes {stable_mosaic.version = 11 : i64} {
  func.func @_fused_kernel(%arg0: i32, %arg1: i32, %arg2: memref<2x16x128xf32, #tpu.memory_space<vmem>>, %arg3: memref<2x64x128xbf16, #tpu.memory_space<vmem>>, %arg4: memref<2x16x1xf32, #tpu.memory_space<vmem>>, %arg5: memref<2x16x1xf32, #tpu.memory_space<vmem>>, %arg6: memref<1x128x128xbf16, #tpu.memory_space<vmem>>, %arg7: memref<1x128x128xbf16, #tpu.memory_space<vmem>>, %arg8: memref<1x128x256xbf16, #tpu.memory_space<vmem>>, %arg9: memref<1x128x128xbf16, #tpu.memory_space<vmem>>, %arg10: memref<1x128x128xbf16, #tpu.memory_space<vmem>>, %arg11: memref<1x8x256xf32, #tpu.memory_space<vmem>>, %arg12: memref<2x16x128xf32, #tpu.memory_space<vmem>>) attributes {dimension_semantics = [#tpu.dimension_semantics<parallel>, #tpu.dimension_semantics<arbitrary>], iteration_bounds = array<i64: 1, 2>, scalar_prefetch = 0 : i64, scratch_operands = 0 : i64, tpu.core_type = #tpu.core_type<tc>, window_params = [{transform_indices = @transform_0, window_bounds = array<i64: 2, 16, 128>}, {transform_indices = @transform_1, window_bounds = array<i64: 2, 64, 128>}, {transform_indices = @transform_2, window_bounds = array<i64: 2, 16, 1>}, {transform_indices = @transform_3, window_bounds = array<i64: 2, 16, 1>}, {transform_indices = @transform_4, window_bounds = array<i64: 1, 128, 128>}, {transform_indices = @transform_5, window_bounds = array<i64: 1, 128, 128>}, {transform_indices = @transform_6, window_bounds = array<i64: 1, 128, 256>}, {transform_indices = @transform_7, window_bounds = array<i64: 1, 128, 128>}, {transform_indices = @transform_8, window_bounds = array<i64: 1, 128, 128>}, {transform_indices = @transform_9, window_bounds = array<i64: 1, 8, 256>}, {transform_indices = @transform_10, window_bounds = array<i64: 2, 16, 128>}]} {
    %c0_i32 = arith.constant 0 : i32
    %0 = arith.cmpi eq, %arg1, %c0_i32 : i32
    %1 = arith.extui %0 : i1 to i32
    %c0_i32_0 = arith.constant 0 : i32
    %2 = arith.cmpi ne, %1, %c0_i32_0 : i32
    scf.if %2 {
      %c0_77 = arith.constant 0 : index
      %c0_78 = arith.constant 0 : index
      %c0_79 = arith.constant 0 : index
      %167 = vector.load %arg2[%c0_77, %c0_78, %c0_79] : memref<2x16x128xf32, #tpu.memory_space<vmem>>, vector<2x16x128xf32>
      %c0_80 = arith.constant 0 : index
      %c0_81 = arith.constant 0 : index
      %c0_82 = arith.constant 0 : index
      %168 = vector.load %arg12[%c0_80, %c0_81, %c0_82] : memref<2x16x128xf32, #tpu.memory_space<vmem>>, vector<2x16x128xf32>
      tpu.vector_store %arg12[%c0_80, %c0_81, %c0_82], %167 {strides = array<i32>} : memref<2x16x128xf32, #tpu.memory_space<vmem>>, vector<2x16x128xf32>,
    } else {
    }
    %c0 = arith.constant 0 : index
    %c0_1 = arith.constant 0 : index
    %c0_2 = arith.constant 0 : index
    %3 = vector.load %arg12[%c0, %c0_1, %c0_2] : memref<2x16x128xf32, #tpu.memory_space<vmem>>, vector<2x16x128xf32>
    %c0_3 = arith.constant 0 : index
    %c0_4 = arith.constant 0 : index
    %c0_5 = arith.constant 0 : index
    %4 = vector.load %arg4[%c0_3, %c0_4, %c0_5] : memref<2x16x1xf32, #tpu.memory_space<vmem>>, vector<2x16x1xf32>
    %c0_6 = arith.constant 0 : index
    %c0_7 = arith.constant 0 : index
    %c0_8 = arith.constant 0 : index
    %5 = vector.load %arg5[%c0_6, %c0_7, %c0_8] : memref<2x16x1xf32, #tpu.memory_space<vmem>>, vector<2x16x1xf32>
    %6 = arith.truncf %3 : vector<2x16x128xf32> to vector<2x16x128xbf16>
    %c0_9 = arith.constant 0 : index
    %c0_10 = arith.constant 0 : index
    %c0_11 = arith.constant 0 : index
    %7 = vector.load %arg11[%c0_9, %c0_10, %c0_11] : memref<1x8x256xf32, #tpu.memory_space<vmem>>, vector<1x1x128xf32>
    %8 = vector.shape_cast %7 : vector<1x1x128xf32> to vector<1x128xf32>
    %c0_12 = arith.constant 0 : index
    %c1 = arith.constant 1 : index
    %c0_13 = arith.constant 0 : index
    %9 = vector.load %arg11[%c0_12, %c1, %c0_13] : memref<1x8x256xf32, #tpu.memory_space<vmem>>, vector<1x1x128xf32>
    %10 = vector.shape_cast %9 : vector<1x1x128xf32> to vector<1x128xf32>
    %c0_14 = arith.constant 0 : index
    %c2 = arith.constant 2 : index
    %c0_15 = arith.constant 0 : index
    %11 = vector.load %arg11[%c0_14, %c2, %c0_15] : memref<1x8x256xf32, #tpu.memory_space<vmem>>, vector<1x1x256xf32>
    %12 = vector.shape_cast %11 : vector<1x1x256xf32> to vector<1x256xf32>
    %c0_16 = arith.constant 0 : index
    %c3 = arith.constant 3 : index
    %c0_17 = arith.constant 0 : index
    %13 = vector.load %arg11[%c0_16, %c3, %c0_17] : memref<1x8x256xf32, #tpu.memory_space<vmem>>, vector<1x1x128xf32>
    %14 = vector.shape_cast %13 : vector<1x1x128xf32> to vector<1x128xf32>
    %c0_18 = arith.constant 0 : index
    %c4 = arith.constant 4 : index
    %c0_19 = arith.constant 0 : index
    %15 = vector.load %arg11[%c0_18, %c4, %c0_19] : memref<1x8x256xf32, #tpu.memory_space<vmem>>, vector<1x1x128xf32>
    %16 = vector.shape_cast %15 : vector<1x1x128xf32> to vector<1x128xf32>
    %c0_20 = arith.constant 0 : index
    %c5 = arith.constant 5 : index
    %c0_21 = arith.constant 0 : index
    %17 = vector.load %arg11[%c0_20, %c5, %c0_21] : memref<1x8x256xf32, #tpu.memory_space<vmem>>, vector<1x1x128xf32>
    %18 = vector.shape_cast %17 : vector<1x1x128xf32> to vector<1x128xf32>
    %c0_22 = arith.constant 0 : index
    %c6 = arith.constant 6 : index
    %c0_23 = arith.constant 0 : index
    %19 = vector.load %arg11[%c0_22, %c6, %c0_23] : memref<1x8x256xf32, #tpu.memory_space<vmem>>, vector<1x1x128xf32>
    %20 = vector.shape_cast %19 : vector<1x1x128xf32> to vector<1x128xf32>
    %c0_24 = arith.constant 0 : index
    %c0_25 = arith.constant 0 : index
    %c0_26 = arith.constant 0 : index
    %21 = vector.load %arg3[%c0_24, %c0_25, %c0_26] : memref<2x64x128xbf16, #tpu.memory_space<vmem>>, vector<2x64x128xbf16>
    %22 = vector.shape_cast %21 : vector<2x64x128xbf16> to vector<128x128xbf16>
    %c0_27 = arith.constant 0 : index
    %c0_28 = arith.constant 0 : index
    %c0_29 = arith.constant 0 : index
    %23 = vector.load %arg6[%c0_27, %c0_28, %c0_29] : memref<1x128x128xbf16, #tpu.memory_space<vmem>>, vector<1x128x128xbf16>
    %24 = vector.shape_cast %23 : vector<1x128x128xbf16> to vector<128x128xbf16>
    %cst = arith.constant dense<0.000000e+00> : vector<128x128xf32>
    %25 = tpu.matmul %22, %24, %cst {dimension_numbers = #tpu.dot_dimension_numbers<[1], [0], [0], [1], [0, 0, 1, 1], [], []>} : vector<128x128xbf16>, vector<128x128xbf16>, vector<128x128xf32> -> vector<128x128xf32>
    %26 = vector.broadcast %8 : vector<1x128xf32> to vector<128x128xf32>
    %27 = arith.addf %25, %26 : vector<128x128xf32>
    %cst_30 = arith.constant 5.000000e-01 : f32
    %28 = vector.broadcast %cst_30 : f32 to vector<128x128xf32>
    %29 = arith.mulf %28, %27 : vector<128x128xf32>
    %30 = arith.mulf %27, %27 : vector<128x128xf32>
    %31 = arith.mulf %30, %27 : vector<128x128xf32>
    %cst_31 = arith.constant 4.471500e-02 : f32
    %32 = vector.broadcast %cst_31 : f32 to vector<128x128xf32>
    %33 = arith.mulf %32, %31 : vector<128x128xf32>
    %34 = arith.addf %27, %33 : vector<128x128xf32>
    %cst_32 = arith.constant 0.797884583 : f32
    %35 = vector.broadcast %cst_32 : f32 to vector<128x128xf32>
    %36 = arith.mulf %35, %34 : vector<128x128xf32>
    %37 = math.tanh %36 : vector<128x128xf32>
    %cst_33 = arith.constant 1.000000e+00 : f32
    %38 = vector.broadcast %cst_33 : f32 to vector<128x128xf32>
    %39 = arith.addf %38, %37 : vector<128x128xf32>
    %40 = arith.mulf %29, %39 : vector<128x128xf32>
    %41 = arith.truncf %40 : vector<128x128xf32> to vector<128x128xbf16>
    %42 = vector.shape_cast %6 : vector<2x16x128xbf16> to vector<32x128xbf16>
    %c0_34 = arith.constant 0 : index
    %c0_35 = arith.constant 0 : index
    %c0_36 = arith.constant 0 : index
    %43 = vector.load %arg7[%c0_34, %c0_35, %c0_36] : memref<1x128x128xbf16, #tpu.memory_space<vmem>>, vector<1x128x128xbf16>
    %44 = vector.shape_cast %43 : vector<1x128x128xbf16> to vector<128x128xbf16>
    %cst_37 = arith.constant dense<0.000000e+00> : vector<32x128xf32>
    %45 = tpu.matmul %42, %44, %cst_37 {dimension_numbers = #tpu.dot_dimension_numbers<[1], [0], [0], [1], [0, 0, 1, 1], [], []>} : vector<32x128xbf16>, vector<128x128xbf16>, vector<32x128xf32> -> vector<32x128xf32>
    %46 = vector.broadcast %10 : vector<1x128xf32> to vector<32x128xf32>
    %47 = arith.addf %45, %46 : vector<32x128xf32>
    %48 = vector.shape_cast %47 : vector<32x128xf32> to vector<2x16x128xf32>
    %cst_38 = arith.constant dense<0.000000e+00> : vector<2x128xf32>
    %49 = vector.multi_reduction <add>, %48, %cst_38 [1] : vector<2x16x128xf32> to vector<2x128xf32>
    %50 = vector.shape_cast %49 : vector<2x128xf32> to vector<2x1x128xf32>
    %cst_39 = arith.constant 1.600000e+01 : f32
    %51 = vector.broadcast %cst_39 : f32 to vector<2x1x128xf32>
    %52 = arith.divf %50, %51 : vector<2x1x128xf32>
    %53 = vector.broadcast %52 : vector<2x1x128xf32> to vector<2x16x128xf32>
    %54 = arith.subf %48, %53 : vector<2x16x128xf32>
    %55 = arith.mulf %54, %54 : vector<2x16x128xf32>
    %cst_40 = arith.constant dense<0.000000e+00> : vector<2x128xf32>
    %56 = vector.multi_reduction <add>, %55, %cst_40 [1] : vector<2x16x128xf32> to vector<2x128xf32>
    %57 = vector.shape_cast %56 : vector<2x128xf32> to vector<2x1x128xf32>
    %cst_41 = arith.constant 1.600000e+01 : f32
    %58 = vector.broadcast %cst_41 : f32 to vector<2x1x128xf32>
    %59 = arith.divf %57, %58 : vector<2x1x128xf32>
    %60 = vector.broadcast %52 : vector<2x1x128xf32> to vector<2x16x128xf32>
    %61 = arith.subf %48, %60 : vector<2x16x128xf32>
    %cst_42 = arith.constant 9.99999974E-6 : f32
    %62 = vector.broadcast %cst_42 : f32 to vector<2x1x128xf32>
    %63 = arith.addf %59, %62 : vector<2x1x128xf32>
    %64 = math.rsqrt %63 : vector<2x1x128xf32>
    %65 = vector.broadcast %64 : vector<2x1x128xf32> to vector<2x16x128xf32>
    %66 = arith.mulf %61, %65 : vector<2x16x128xf32>
    %67 = vector.broadcast %4 : vector<2x16x1xf32> to vector<2x16x128xf32>
    %68 = arith.mulf %66, %67 : vector<2x16x128xf32>
    %c0_43 = arith.constant 0 : index
    %c0_44 = arith.constant 0 : index
    %c0_45 = arith.constant 0 : index
    %69 = vector.load %arg8[%c0_43, %c0_44, %c0_45] : memref<1x128x256xbf16, #tpu.memory_space<vmem>>, vector<1x128x256xbf16>
    %70 = vector.shape_cast %69 : vector<1x128x256xbf16> to vector<128x256xbf16>
    %cst_46 = arith.constant dense<0.000000e+00> : vector<128x256xf32>
    %71 = tpu.matmul %41, %70, %cst_46 {dimension_numbers = #tpu.dot_dimension_numbers<[1], [0], [0], [1], [0, 0, 1, 1], [], []>} : vector<128x128xbf16>, vector<128x256xbf16>, vector<128x256xf32> -> vector<128x256xf32>
    %72 = vector.broadcast %12 : vector<1x256xf32> to vector<128x256xf32>
    %73 = arith.addf %71, %72 : vector<128x256xf32>
    %74 = vector.shape_cast %73 : vector<128x256xf32> to vector<2x64x256xf32>
    %75 = arith.truncf %74 : vector<2x64x256xf32> to vector<2x64x256xbf16>
    %76 = vector.extract_strided_slice %75 {offsets = [0, 0, 0], sizes = [2, 64, 128], strides = [1, 1, 1]} : vector<2x64x256xbf16> to vector<2x64x128xbf16>
    %77 = vector.extract_strided_slice %75 {offsets = [0, 0, 128], sizes = [2, 64, 128], strides = [1, 1, 1]} : vector<2x64x256xbf16> to vector<2x64x128xbf16>
    %78 = arith.truncf %68 : vector<2x16x128xf32> to vector<2x16x128xbf16>
    "tpu.trace_start"() <{level = 10 : i32, message = "blw,bhw->blh"}> : () -> ()
    %cst_47 = arith.constant dense<0.000000e+00> : vector<2x16x64xf32>
    %79 = tpu.matmul %78, %76, %cst_47 {dimension_numbers = #tpu.dot_dimension_numbers<[2], [2], [1], [1], [0, 0, 0, 1, 1, 1], [0], [0]>} : vector<2x16x128xbf16>, vector<2x64x128xbf16>, vector<2x16x64xf32> -> vector<2x16x64xf32>
    "tpu.trace_stop"() : () -> ()
    %cst_48 = arith.constant 0.0883883461 : f32
    %80 = vector.broadcast %cst_48 : f32 to vector<2x16x64xf32>
    %81 = arith.mulf %79, %80 : vector<2x16x64xf32>
    %82 = vector.broadcast %5 : vector<2x16x1xf32> to vector<2x16x64xf32>
    %83 = arith.addf %81, %82 : vector<2x16x64xf32>
    %cst_49 = arith.constant dense<0xFF800000> : vector<2x64xf32>
    %84 = vector.multi_reduction <maximumf>, %83, %cst_49 [1] : vector<2x16x64xf32> to vector<2x64xf32>
    %85 = vector.shape_cast %84 : vector<2x64xf32> to vector<2x1x64xf32>
    %86 = vector.broadcast %85 : vector<2x1x64xf32> to vector<2x16x64xf32>
    %87 = arith.subf %83, %86 : vector<2x16x64xf32>
    %88 = math.exp %87 : vector<2x16x64xf32>
    %cst_50 = arith.constant dense<0.000000e+00> : vector<2x64xf32>
    %89 = vector.multi_reduction <add>, %88, %cst_50 [1] : vector<2x16x64xf32> to vector<2x64xf32>
    %90 = vector.shape_cast %89 : vector<2x64xf32> to vector<2x1x64xf32>
    %91 = tpu.reciprocal %90 {approx = true} : vector<2x1x64xf32> -> vector<2x1x64xf32>
    %92 = vector.broadcast %91 : vector<2x1x64xf32> to vector<2x16x64xf32>
    %93 = arith.mulf %88, %92 : vector<2x16x64xf32>
    %94 = arith.truncf %93 : vector<2x16x64xf32> to vector<2x16x64xbf16>
    "tpu.trace_start"() <{level = 10 : i32, message = "blh,bhw->blw"}> : () -> ()
    %cst_51 = arith.constant dense<0.000000e+00> : vector<2x16x128xf32>
    %95 = tpu.matmul %94, %77, %cst_51 {dimension_numbers = #tpu.dot_dimension_numbers<[2], [1], [1], [2], [0, 0, 0, 1, 1, 2], [0], [0]>} : vector<2x16x64xbf16>, vector<2x64x128xbf16>, vector<2x16x128xf32> -> vector<2x16x128xf32>
    "tpu.trace_stop"() : () -> ()
    %96 = arith.truncf %95 : vector<2x16x128xf32> to vector<2x16x128xbf16>
    %97 = vector.shape_cast %96 : vector<2x16x128xbf16> to vector<32x128xbf16>
    %c0_52 = arith.constant 0 : index
    %c0_53 = arith.constant 0 : index
    %c0_54 = arith.constant 0 : index
    %98 = vector.load %arg9[%c0_52, %c0_53, %c0_54] : memref<1x128x128xbf16, #tpu.memory_space<vmem>>, vector<1x128x128xbf16>
    %99 = vector.shape_cast %98 : vector<1x128x128xbf16> to vector<128x128xbf16>
    %cst_55 = arith.constant dense<0.000000e+00> : vector<32x128xf32>
    %100 = tpu.matmul %97, %99, %cst_55 {dimension_numbers = #tpu.dot_dimension_numbers<[1], [0], [0], [1], [0, 0, 1, 1], [], []>} : vector<32x128xbf16>, vector<128x128xbf16>, vector<32x128xf32> -> vector<32x128xf32>
    %101 = vector.broadcast %14 : vector<1x128xf32> to vector<32x128xf32>
    %102 = arith.addf %100, %101 : vector<32x128xf32>
    %103 = vector.shape_cast %102 : vector<32x128xf32> to vector<2x16x128xf32>
    %cst_56 = arith.constant dense<0.000000e+00> : vector<2x128xf32>
    %104 = vector.multi_reduction <add>, %103, %cst_56 [1] : vector<2x16x128xf32> to vector<2x128xf32>
    %105 = vector.shape_cast %104 : vector<2x128xf32> to vector<2x1x128xf32>
    %cst_57 = arith.constant 1.600000e+01 : f32
    %106 = vector.broadcast %cst_57 : f32 to vector<2x1x128xf32>
    %107 = arith.divf %105, %106 : vector<2x1x128xf32>
    %108 = vector.broadcast %107 : vector<2x1x128xf32> to vector<2x16x128xf32>
    %109 = arith.subf %103, %108 : vector<2x16x128xf32>
    %110 = arith.mulf %109, %109 : vector<2x16x128xf32>
    %cst_58 = arith.constant dense<0.000000e+00> : vector<2x128xf32>
    %111 = vector.multi_reduction <add>, %110, %cst_58 [1] : vector<2x16x128xf32> to vector<2x128xf32>
    %112 = vector.shape_cast %111 : vector<2x128xf32> to vector<2x1x128xf32>
    %cst_59 = arith.constant 1.600000e+01 : f32
    %113 = vector.broadcast %cst_59 : f32 to vector<2x1x128xf32>
    %114 = arith.divf %112, %113 : vector<2x1x128xf32>
    %115 = vector.broadcast %107 : vector<2x1x128xf32> to vector<2x16x128xf32>
    %116 = arith.subf %103, %115 : vector<2x16x128xf32>
    %cst_60 = arith.constant 9.99999974E-6 : f32
    %117 = vector.broadcast %cst_60 : f32 to vector<2x1x128xf32>
    %118 = arith.addf %114, %117 : vector<2x1x128xf32>
    %119 = math.rsqrt %118 : vector<2x1x128xf32>
    %120 = vector.broadcast %119 : vector<2x1x128xf32> to vector<2x16x128xf32>
    %121 = arith.mulf %116, %120 : vector<2x16x128xf32>
    %122 = arith.mulf %3, %121 : vector<2x16x128xf32>
    %123 = arith.truncf %122 : vector<2x16x128xf32> to vector<2x16x128xbf16>
    %124 = vector.shape_cast %123 : vector<2x16x128xbf16> to vector<32x128xbf16>
    %c0_61 = arith.constant 0 : index
    %c0_62 = arith.constant 0 : index
    %c0_63 = arith.constant 0 : index
    %125 = vector.load %arg10[%c0_61, %c0_62, %c0_63] : memref<1x128x128xbf16, #tpu.memory_space<vmem>>, vector<1x128x128xbf16>
    %126 = vector.shape_cast %125 : vector<1x128x128xbf16> to vector<128x128xbf16>
    %cst_64 = arith.constant dense<0.000000e+00> : vector<32x128xf32>
    %127 = tpu.matmul %124, %126, %cst_64 {dimension_numbers = #tpu.dot_dimension_numbers<[1], [0], [0], [1], [0, 0, 1, 1], [], []>} : vector<32x128xbf16>, vector<128x128xbf16>, vector<32x128xf32> -> vector<32x128xf32>
    %128 = vector.broadcast %16 : vector<1x128xf32> to vector<32x128xf32>
    %129 = arith.addf %127, %128 : vector<32x128xf32>
    %cst_65 = arith.constant 5.000000e-01 : f32
    %130 = vector.broadcast %cst_65 : f32 to vector<32x128xf32>
    %131 = arith.mulf %130, %129 : vector<32x128xf32>
    %132 = arith.mulf %129, %129 : vector<32x128xf32>
    %133 = arith.mulf %132, %129 : vector<32x128xf32>
    %cst_66 = arith.constant 4.471500e-02 : f32
    %134 = vector.broadcast %cst_66 : f32 to vector<32x128xf32>
    %135 = arith.mulf %134, %133 : vector<32x128xf32>
    %136 = arith.addf %129, %135 : vector<32x128xf32>
    %cst_67 = arith.constant 0.797884583 : f32
    %137 = vector.broadcast %cst_67 : f32 to vector<32x128xf32>
    %138 = arith.mulf %137, %136 : vector<32x128xf32>
    %139 = math.tanh %138 : vector<32x128xf32>
    %cst_68 = arith.constant 1.000000e+00 : f32
    %140 = vector.broadcast %cst_68 : f32 to vector<32x128xf32>
    %141 = arith.addf %140, %139 : vector<32x128xf32>
    %142 = arith.mulf %131, %141 : vector<32x128xf32>
    %cst_69 = arith.constant dense<0.000000e+00> : vector<32xf32>
    %143 = vector.multi_reduction <add>, %142, %cst_69 [1] : vector<32x128xf32> to vector<32xf32>
    %144 = vector.shape_cast %143 : vector<32xf32> to vector<32x1xf32>
    %cst_70 = arith.constant 1.280000e+02 : f32
    %145 = vector.broadcast %cst_70 : f32 to vector<32x1xf32>
    %146 = arith.divf %144, %145 : vector<32x1xf32>
    %147 = vector.broadcast %146 : vector<32x1xf32> to vector<32x128xf32>
    %148 = arith.subf %142, %147 : vector<32x128xf32>
    %149 = arith.mulf %148, %148 : vector<32x128xf32>
    %cst_71 = arith.constant dense<0.000000e+00> : vector<32xf32>
    %150 = vector.multi_reduction <add>, %149, %cst_71 [1] : vector<32x128xf32> to vector<32xf32>
    %151 = vector.shape_cast %150 : vector<32xf32> to vector<32x1xf32>
    %cst_72 = arith.constant 1.280000e+02 : f32
    %152 = vector.broadcast %cst_72 : f32 to vector<32x1xf32>
    %153 = arith.divf %151, %152 : vector<32x1xf32>
    %154 = vector.broadcast %146 : vector<32x1xf32> to vector<32x128xf32>
    %155 = arith.subf %142, %154 : vector<32x128xf32>
    %cst_73 = arith.constant 9.99999974E-6 : f32
    %156 = vector.broadcast %cst_73 : f32 to vector<32x1xf32>
    %157 = arith.addf %153, %156 : vector<32x1xf32>
    %158 = math.rsqrt %157 : vector<32x1xf32>
    %159 = vector.broadcast %158 : vector<32x1xf32> to vector<32x128xf32>
    %160 = arith.mulf %155, %159 : vector<32x128xf32>
    %161 = vector.broadcast %18 : vector<1x128xf32> to vector<32x128xf32>
    %162 = arith.mulf %160, %161 : vector<32x128xf32>
    %163 = vector.broadcast %20 : vector<1x128xf32> to vector<32x128xf32>
    %164 = arith.addf %162, %163 : vector<32x128xf32>
    %165 = vector.shape_cast %164 : vector<32x128xf32> to vector<2x16x128xf32>
    %c0_74 = arith.constant 0 : index
    %c0_75 = arith.constant 0 : index
    %c0_76 = arith.constant 0 : index
    %166 = vector.load %arg12[%c0_74, %c0_75, %c0_76] : memref<2x16x128xf32, #tpu.memory_space<vmem>>, vector<2x16x128xf32>
    tpu.vector_store %arg12[%c0_74, %c0_75, %c0_76], %165 {strides = array<i32>} : memref<2x16x128xf32, #tpu.memory_space<vmem>>, vector<2x16x128xf32>,
    return
  }
  func.func @transform_0(%arg0: i32, %arg1: i32) -> (i32, i32, i32) {
    %c0_i32 = arith.constant 0 : i32
    %c0_i32_0 = arith.constant 0 : i32
    %c0_i32_1 = arith.constant 0 : i32
    return %arg0, %c0_i32, %c0_i32_0 : i32, i32, i32
  }
  func.func @transform_1(%arg0: i32, %arg1: i32) -> (i32, i32, i32) {
    %c0_i32 = arith.constant 0 : i32
    %c0_i32_0 = arith.constant 0 : i32
    %c0_i32_1 = arith.constant 0 : i32
    return %arg0, %c0_i32, %c0_i32_0 : i32, i32, i32
  }
  func.func @transform_2(%arg0: i32, %arg1: i32) -> (i32, i32, i32) {
    %c0_i32 = arith.constant 0 : i32
    %c0_i32_0 = arith.constant 0 : i32
    %c0_i32_1 = arith.constant 0 : i32
    return %arg0, %c0_i32, %c0_i32_0 : i32, i32, i32
  }
  func.func @transform_3(%arg0: i32, %arg1: i32) -> (i32, i32, i32) {
    %c0_i32 = arith.constant 0 : i32
    %c0_i32_0 = arith.constant 0 : i32
    %c0_i32_1 = arith.constant 0 : i32
    return %arg0, %c0_i32, %c0_i32_0 : i32, i32, i32
  }
  func.func @transform_4(%arg0: i32, %arg1: i32) -> (i32, i32, i32) {
    %c0_i32 = arith.constant 0 : i32
    %c0_i32_0 = arith.constant 0 : i32
    %c0_i32_1 = arith.constant 0 : i32
    return %arg1, %c0_i32, %c0_i32_0 : i32, i32, i32
  }
  func.func @transform_5(%arg0: i32, %arg1: i32) -> (i32, i32, i32) {
    %c0_i32 = arith.constant 0 : i32
    %c0_i32_0 = arith.constant 0 : i32
    %c0_i32_1 = arith.constant 0 : i32
    return %arg1, %c0_i32, %c0_i32_0 : i32, i32, i32
  }
  func.func @transform_6(%arg0: i32, %arg1: i32) -> (i32, i32, i32) {
    %c0_i32 = arith.constant 0 : i32
    %c0_i32_0 = arith.constant 0 : i32
    %c0_i32_1 = arith.constant 0 : i32
    return %arg1, %c0_i32, %c0_i32_0 : i32, i32, i32
  }
  func.func @transform_7(%arg0: i32, %arg1: i32) -> (i32, i32, i32) {
    %c0_i32 = arith.constant 0 : i32
    %c0_i32_0 = arith.constant 0 : i32
    %c0_i32_1 = arith.constant 0 : i32
    return %arg1, %c0_i32, %c0_i32_0 : i32, i32, i32
  }
  func.func @transform_8(%arg0: i32, %arg1: i32) -> (i32, i32, i32) {
    %c0_i32 = arith.constant 0 : i32
    %c0_i32_0 = arith.constant 0 : i32
    %c0_i32_1 = arith.constant 0 : i32
    return %arg1, %c0_i32, %c0_i32_0 : i32, i32, i32
  }
  func.func @transform_9(%arg0: i32, %arg1: i32) -> (i32, i32, i32) {
    %c0_i32 = arith.constant 0 : i32
    %c0_i32_0 = arith.constant 0 : i32
    %c0_i32_1 = arith.constant 0 : i32
    return %arg1, %c0_i32, %c0_i32_0 : i32, i32, i32
  }
  func.func @transform_10(%arg0: i32, %arg1: i32) -> (i32, i32, i32) {
    %c0_i32 = arith.constant 0 : i32
    %c0_i32_0 = arith.constant 0 : i32
    %c0_i32_1 = arith.constant 0 : i32
    return %arg0, %c0_i32, %c0_i32_0 : i32, i32, i32
  }
}

</mosaic_0001>

<bundles_post_ra>
// kernel: tpu_custom_call.1
= control target key start
LH: loop header
LB: loop body
LE: loop exit
PB: predicated region body
PF: predicated region fallthrough
CT: control target
= control target key end

     0   :  { %s3982_s0 = inlined_call_operand.hbm [shape: f32[2,16,128], index: 0, kind: input, shape index: {}]   ;;  %s3983_s1 = inlined_call_operand.vmem [shape: bf16[2,64,128], index: 1, kind: input, shape index: {}]   ;;  %s3984_s2 = inlined_call_operand.vmem [shape: f32[2,16,1], index: 2, kind: input, shape index: {}]   ;;  %s3985_s3 = inlined_call_operand.vmem [shape: f32[2,16,1], index: 3, kind: input, shape index: {}]   ;;  %s3986_s4 = inlined_call_operand.hbm [shape: bf16[2,128,128], index: 4, kind: input, shape index: {}]   ;;  %s3987_s5 = inlined_call_operand.hbm [shape: bf16[2,128,128], index: 5, kind: input, shape index: {}]   ;;  %s3988_s6 = inlined_call_operand.hbm [shape: bf16[2,128,256], index: 6, kind: input, shape index: {}]   ;;  %s3989_s7 = inlined_call_operand.hbm [shape: bf16[2,128,128], index: 7, kind: input, shape index: {}]   ;;  %s3990_s8 = inlined_call_operand.hbm [shape: bf16[2,128,128], index: 8, kind: input, shape index: {}]   ;;  %s3991_s9 = inlined_call_operand.vmem [shape: f32[2,8,256], index: 9, kind: input, shape index: {}]   ;;  %s3992_s10 = inlined_call_operand.hbm [shape: f32[2,16,128], index: 10, kind: output, shape index: {}]  }
   0x1   :  { %4016 = sst [smem:[#allocation24_spill]] %s3983_s1 }
   0x2   :  { %4017 = sst [smem:[#allocation25_spill]] %s3984_s2 }
   0x3   :  { %4018 = sst [smem:[#allocation26_spill]] %s3985_s3 }
   0x4   :  { %4019 = sst [smem:[#allocation27_spill]] %s3986_s4 }
   0x5   :  { %4020 = sst [smem:[#allocation28_spill]] %s3987_s5 }
   0x6   :  { %4021 = sst [smem:[#allocation29_spill]] %s3988_s6 }
   0x7   :  { %4022 = sst [smem:[#allocation30_spill]] %s3991_s9 }
   0x8   :  { %4023 = sst [smem:[#allocation31_spill]] %s3992_s10 }
   0x9   :  { %15 = vsyncpa [#allocation3], 0 }
   0xa   :  { %16 = vsyncpa [#allocation6], 0 }
   0xb   :  { %18 = vsyncpa [#allocation6 + $0x1], 0 }
   0xc   :  { %19 = vsyncpa [#allocation9], 0 }
   0xd   :  { %21 = vsyncpa [#allocation9 + $0x1], 0 }
   0xe   :  { %22 = vsyncpa [#allocation12], 0 }
   0xf   :  { %24 = vsyncpa [#allocation12 + $0x1], 0 }
  0x10   :  { %25 = vsyncpa [#allocation4], 0  ;;  %s3245_s13 = smov 0   ;;  %s3247_s14 = smov 0  }
  0x11   :  { %s3249_s15 = smov 0   ;;  %s3251_s16 = smov 0  }
  0x12   :  { %s3253_s17 = smov 0   ;;  %s3255_s18 = smov 0  }
  0x13 LB: > { %4024 = sst [smem:[#allocation19_spill]] %s3160_s15  ;;  %s40_s19 = sadd.s32 1, %s3168_s17  ;;  %s3172_s18 = sphi %s3255_s18, %s31_s18   ;;  %s3168_s17 = sphi %s3253_s17, %s4059_s17   ;;  %s3164_s16 = sphi %s3251_s16, %s4058_s16   ;;  %s3160_s15 = sphi %s3249_s15, %s4062_s15   ;;  %s3156_s14 = sphi %s3247_s14, %s4061_s14   ;;  %s3152_s13 = sphi %s3245_s13, %s4060_s13  }
  0x14   : > { %4025 = sst [smem:[#allocation20_spill]] %s3168_s17  ;;  %s154_s20 = sadd.s32 1, %s3160_s15 }
  0x15   : > { %4026 = sst [smem:[#allocation21_spill]] %s3172_s18  ;;  %p41_p0 = scmp.ge.s32.totalorder %s40_s19, 2 }
  0x16   : > { %p161_p1 = scmp.ne.s32.totalorder %s3160_s15, %s3156_s14  ;;  %p162_p2 = scmp.eq.s32.totalorder %s3172_s18, 0 }
  0x17   : > { %s4064_s19 = smov (%p41_p0, %s40_s19), 0  ;;  %p2701_p4 = scmp.lt.s32.totalorder %s3172_s18, 2 }
  0x18   : > { %4027 = sst [smem:[#allocation22_spill]] %s4064_s19  ;;  %p163_p3 = por %p162_p2, %p161_p1 }
  0x19   : > { %s151_s21 = ssub.s32 %s3168_s17, %s4064_s19  ;;  %s3995_s22 = sand.u32 1, %s3172_s18  }
  0x1a   : > { %p152_p5 = scmp.eq.s32.totalorder %s151_s21, 0  ;;  %s3287_s23 = sand.u32 1, %s3160_s15  }
  0x1b   : > { %s3290_s24 = sshll.u32 %s3168_s17, 10  ;;  %s3296_s26 = sshll.u32 %s3287_s23, 6 }
  0x1c   : > { %s3293_s25 = scalar_select %p152_p5, %s3160_s15, %s154_s20  }
  0x1d   : > { %s4029_s4 = sld [smem:[#allocation27_spill]]  ;;  %p3304_p6 = pnand %p2701_p4, %p163_p3 }
  0x1e   : > { %4028 = sst [smem:[#allocation23_spill]] %s3293_s25  ;;  %s398_s11 = scalar_lea.vmem [#allocation5], %s3296_s26 }
  0x1f   : > { %s4030_s30 = scalar_select %p3304_p6, 1, 0 }
  0x20   : > { %s405_s12 = sshll.u32 %s398_s11, 4  ;;  %s3313_s20 = scalar_lea.sflag [#allocation6], %s3995_s22  ;;  %s3309_s12 = int_to_ptr.vmem [resolvable:$true] %s405_s12 }
  0x21   : > { %p3319_p8 = pneg %p3304_p6 }
  0x23   : > { %s3302_s29 = scalar_lea.hbm %s4029_s4, %s3290_s24  ;;  %s2907_s11 = scalar_lea.hbm %s4029_s4, 2048 }
  0x24   : > { %s2902_s21 = scalar_lea.hbm %s3302_s29, 1024  ;;  %p2908_p11 = scmp.lt.u32.totalorder %s3302_s29, %s4029_s4 }
  0x25   : > { %p2903_p7 = scmp.ne.s32.totalorder %s3302_s29, %s2902_s21  ;;  %p2909_p12 = scmp.lt.u32.totalorder %s2907_s11, %s2902_s21 }
  0x26   : > { %s4031_s27 = scalar_select %p3319_p8, 1, 0 }
  0x27   : > { %p2905_p9 = pnand %p3319_p8, %p2903_p7  ;;  %p2910_p13 = por %p2909_p12, %p2908_p11 }
  0x28   : > { %p2911_p0 = scmp.lt.u32.totalorder %s2902_s21, %s3302_s29 }
  0x29   : > { %p2906_p10 = pneg %p2905_p9 }
  0x2a   : > { %p2912_p1 = por %p2911_p0, %p2910_p13 }
  0x2c   : > { %p2913_p2 = pnand %p2912_p1, %p2906_p10 }
  0x2e   : > { %2916 = shalt.err (!%p2913_p2)
}
  0x2f   : > { %s2917_s22 = scalar_lea.vmem %s3309_s12, 1024  ;;  %s3174_s19 = smov [#allocation5]  }
  0x30   : > { %p2918_p3 = scmp.ne.s32.totalorder %s3309_s12, %s2917_s22  ;;  %s2922_s28 = sshll.u32 %s3174_s19, 4  ;;  %s2923_s28 = int_to_ptr.vmem [resolvable:$false] %s2922_s28 }
  0x31   : > { %s2924_s15 = scalar_lea.vmem %s2923_s28, 2048  ;;  %p2925_p7 = scmp.lt.s32.totalorder %s3309_s12, %s2923_s28 }
  0x32   : > { %p2920_p4 = pnand %p2918_p3, %p3319_p8  ;;  %p2926_p9 = scmp.lt.s32.totalorder %s2924_s15, %s2917_s22 }
  0x34   : > { %p2921_p5 = pneg %p2920_p4  ;;  %p2927_p11 = por %p2926_p9, %p2925_p7 }
  0x36   : > { %p2928_p12 = pnand %p2927_p11, %p2921_p5 }
  0x38   : > { %2931 = shalt.err (!%p2928_p12)
}
  0x39   : > { %s4002_s25 = smov 64   ;;  %s4004_s21 = smov 4  }
  0x3a   : > { %2687 = dma.hbm_to_vmem [thread:$0]  (!%p3304_p6), %s3302_s29, 1024, %s3309_s12, %s3313_s20, %s4002_s25, %s4002_s25, %s4004_s21  }
  0x3b   : > { %s2368_s11 = sshll.u32 %s3287_s23, 7  ;;  %s2452_s22 = sshll.u32 %s3168_s17, 11 }
  0x3c   : > { %s4032_s6 = sld [smem:[#allocation29_spill]]  ;;  %s440_s4 = scalar_lea.vmem [#allocation8], %s2368_s11 }
  0x3d   : > { %s447_s10 = sshll.u32 %s440_s4, 4  ;;  %s4033_s3 = sand.u32 1, %s3172_s18   ;;  %s3353_s10 = int_to_ptr.vmem [resolvable:$true] %s447_s10 }
  0x3e   : > { %s3357_s2 = scalar_lea.sflag [#allocation9], %s4033_s3 }
  0x42   : > { %s3351_s15 = scalar_lea.hbm %s4032_s6, %s2452_s22  ;;  %s2937_s22 = scalar_lea.hbm %s4032_s6, 4096 }
  0x43   : > { %s2932_s1 = scalar_lea.hbm %s3351_s15, 2048  ;;  %p2938_p1 = scmp.lt.u32.totalorder %s3351_s15, %s4032_s6 }
  0x44   : > { %p2933_p10 = scmp.ne.s32.totalorder %s3351_s15, %s2932_s1  ;;  %p2939_p2 = scmp.lt.u32.totalorder %s2937_s22, %s2932_s1 }
  0x45   : > { %p2941_p4 = scmp.lt.u32.totalorder %s2932_s1, %s3351_s15 }
  0x46   : > { %p2935_p13 = pnand %p2933_p10, %p3319_p8  ;;  %p2940_p3 = por %p2939_p2, %p2938_p1 }
  0x48   : > { %p2936_p0 = pneg %p2935_p13  ;;  %p2942_p5 = por %p2941_p4, %p2940_p3 }
  0x4a   : > { %p2943_p7 = pnand %p2942_p5, %p2936_p0 }
  0x4c   : > { %2946 = shalt.err (!%p2943_p7)
}
  0x4d   : > { %s2947_s3 = scalar_lea.vmem %s3353_s10, 2048  ;;  %s3177_s4 = smov [#allocation8]  }
  0x4e   : > { %p2948_p9 = scmp.ne.s32.totalorder %s3353_s10, %s2947_s3  ;;  %s2952_s11 = sshll.u32 %s3177_s4, 4  ;;  %s2953_s11 = int_to_ptr.vmem [resolvable:$false] %s2952_s11 }
  0x4f   : > { %s2954_s29 = scalar_lea.vmem %s2953_s11, 4096  ;;  %p2955_p10 = scmp.lt.s32.totalorder %s3353_s10, %s2953_s11 }
  0x50   : > { %p2950_p11 = pnand %p2948_p9, %p3319_p8  ;;  %p2956_p13 = scmp.lt.s32.totalorder %s2954_s29, %s2947_s3 }
  0x52   : > { %p2951_p12 = pneg %p2950_p11  ;;  %p2957_p1 = por %p2956_p13, %p2955_p10 }
  0x54   : > { %p2958_p2 = pnand %p2957_p1, %p2951_p12 }
  0x56   : > { %2961 = shalt.err (!%p2958_p2)
}
  0x57   : > { %s4000_s1 = smov 128   ;;  %s4001_s12 = smov 8  }
  0x58   : > { %2693 = dma.hbm_to_vmem [thread:$0]  (!%p3304_p6), %s3351_s15, 2048, %s3353_s10, %s3357_s2, %s4000_s1, %s4000_s1, %s4001_s12  }
  0x59   : > { %s3385_s22 = sadd.s32 4294967295, %s3172_s18   ;;  %p167_p0 = scmp.ne.s32.totalorder %s3156_s14, %s3152_s13 }
  0x5a   : > { %p4006_p3 = scmp.eq.s32.totalorder %s3385_s22, 0  ;;  %p2356_p4 = scmp.ge.s32.totalorder %s3172_s18, 1 }
  0x5b   : > { %p334_p5 = scmp.lt.s32.totalorder %s3172_s18, 3  ;;  %s3180_s10 = smov [#allocation2]  }
  0x5c   : > { %p3394_p7 = por %p4006_p3, %p167_p0  ;;  %s350_s15 = sshll.u32 %s3180_s10, 4  ;;  %s3402_s15 = int_to_ptr.vmem [resolvable:$true] %s350_s15 }
  0x5d   : > { %p3398_p9 = pnand %p2356_p4, %p334_p5  ;;  %s4036_s5 = sld [smem:[#allocation28_spill]] }
  0x5e   : > { %s4034_s19 = scalar_select %p3394_p7, 1, 0 }
  0x5f   : > { %s4035_s28 = scalar_select %p3398_p9, 1, 0 }
  0x60   : > { %p2680_p11 = pneg %p3398_p9  ;;  %s419_s11 = scalar_lea.vmem [#allocation7], %s3296_s26 }
  0x61   : > { %s426_s29 = sshll.u32 %s419_s11, 4  ;;  %s3419_s29 = int_to_ptr.vmem [resolvable:$true] %s426_s29 }
  0x62   : > { %p3415_p12 = pnand %p2680_p11, %p4006_p3 }
  0x63   : > { %s3410_s4 = scalar_lea.hbm %s4036_s5, %s3290_s24  ;;  %s2967_s12 = scalar_lea.hbm %s4036_s5, 2048 }
  0x64   : > { %s4037_s1 = scalar_select %p3415_p12, 1, 0 }
  0x65   : > { %s2962_s10 = scalar_lea.hbm %s3410_s4, 1024  ;;  %p2968_p2 = scmp.lt.u32.totalorder %s3410_s4, %s4036_s5 }
  0x66   : > { %p2963_p10 = scmp.ne.s32.totalorder %s3410_s4, %s2962_s10  ;;  %p2969_p0 = scmp.lt.u32.totalorder %s2967_s12, %s2962_s10 }
  0x67   : > { %p2971_p5 = scmp.lt.u32.totalorder %s2962_s10, %s3410_s4 }
  0x68   : > { %p2965_p13 = pnand %p2963_p10, %p3319_p8  ;;  %p2970_p4 = por %p2969_p0, %p2968_p2 }
  0x6a   : > { %p2966_p1 = pneg %p2965_p13  ;;  %p2972_p11 = por %p2971_p5, %p2970_p4 }
  0x6c   : > { %p2973_p3 = pnand %p2972_p11, %p2966_p1 }
  0x6e   : > { %2976 = shalt.err (!%p2973_p3)
}
  0x6f   : > { %s2977_s11 = scalar_lea.vmem %s3419_s29, 1024  ;;  %s3181_s13 = smov [#allocation7]  }
  0x70   : > { %p2978_p10 = scmp.ne.s32.totalorder %s3419_s29, %s2977_s11  ;;  %s2982_s3 = sshll.u32 %s3181_s13, 4  ;;  %s2983_s3 = int_to_ptr.vmem [resolvable:$false] %s2982_s3 }
  0x71   : > { %s2984_s25 = scalar_lea.vmem %s2983_s3, 2048  ;;  %p2985_p9 = scmp.lt.s32.totalorder %s3419_s29, %s2983_s3 }
  0x72   : > { %p2980_p13 = pnand %p2978_p10, %p3319_p8  ;;  %p2986_p12 = scmp.lt.s32.totalorder %s2984_s25, %s2977_s11 }
  0x74   : > { %p2981_p7 = pneg %p2980_p13  ;;  %p2987_p2 = por %p2986_p12, %p2985_p9 }
  0x76   : > { %p2988_p0 = pnand %p2987_p2, %p2981_p7 }
  0x78   : > { %2991 = shalt.err (!%p2988_p0)
}
  0x79   : > { %s4038_s21 = smov 4   ;;  %s4039_s12 = smov 64  }
  0x7a   : > { %2690 = dma.hbm_to_vmem [thread:$0]  (!%p3304_p6), %s3410_s4, 1024, %s3419_s29, %s3313_s20, %s4039_s12, %s4039_s12, %s4038_s21  }
  0x7b   : > { %s3450_s5 = scalar_lea.hbm %s3989_s7, %s3290_s24  ;;  %s2992_s25 = scalar_lea.hbm %s3982_s0, 512 }
  0x7c   : > { %p2993_p3 = scmp.ne.s32.totalorder %s3982_s0, %s2992_s25  ;;  %p4040_p7 = scmp.ne.s32.totalorder %s4037_s1, 0 }
  0x7d   : > { %p2999_p4 = scmp.lt.u32.totalorder %s2992_s25, %s3982_s0 }
  0x7e   : > { %p2994_p9 = pneg %p4040_p7 }
  0x80   : > { %p2995_p12 = pnand %p2994_p9, %p2993_p3 }
  0x82   : > { %p2996_p1 = pneg %p2995_p12 }
  0x84   : > { %p3001_p5 = pnand %p2999_p4, %p2996_p1 }
  0x86   : > { %3004 = shalt.err (!%p3001_p5)
}
  0x87   : > { %s3005_s20 = scalar_lea.vmem %s3402_s15, 512  ;;  %p3013_p2 = scmp.lt.s32.totalorder %s3402_s15, %s3402_s15 }
  0x88   : > { %p3006_p11 = scmp.ne.s32.totalorder %s3402_s15, %s3005_s20  ;;  %p3014_p0 = scmp.lt.s32.totalorder %s3005_s20, %s3005_s20 }
  0x8a   : > { %p3008_p10 = pnand %p3006_p11, %p2994_p9  ;;  %p3015_p6 = por %p3014_p0, %p3013_p2 }
  0x8c   : > { %p3009_p13 = pneg %p3008_p10 }
  0x8e   : > { %p3016_p8 = pnand %p3015_p6, %p3009_p13 }
  0x90   : > { %3019 = shalt.err (!%p3016_p8)
}
  0x91   : > { %s4041_s6 = smov 8   ;;  %s4042_s9 = smov 128  }
  0x92   : > { %2683 = dma.hbm_to_vmem [thread:$0]  (!%p4040_p7), %s3982_s0, 512, %s3402_s15, [#allocation3], %s4042_s9, %s4042_s9, %s4041_s6  }
  0x93   : > { %s461_s4 = scalar_lea.vmem [#allocation10], %s3296_s26  ;;  %s3020_s10 = scalar_lea.hbm %s3450_s5, 1024 }
  0x94   : > { %s468_s29 = sshll.u32 %s461_s4, 4  ;;  %p3021_p6 = scmp.ne.s32.totalorder %s3450_s5, %s3020_s10  ;;  %s3477_s29 = int_to_ptr.vmem [resolvable:$true] %s468_s29 }
  0x95   : > { %p4043_p8 = scmp.ne.s32.totalorder %s4031_s27, 0  ;;  %s3025_s11 = scalar_lea.hbm %s3989_s7, 2048 }
  0x96   : > { %p3026_p12 = scmp.lt.u32.totalorder %s3450_s5, %s3989_s7  ;;  %p3027_p1 = scmp.lt.u32.totalorder %s3025_s11, %s3020_s10 }
  0x97   : > { %p3023_p3 = pnand %p3021_p6, %p4043_p8  ;;  %p3029_p7 = scmp.lt.u32.totalorder %s3020_s10, %s3450_s5 }
  0x98   : > { %p3028_p4 = por %p3027_p1, %p3026_p12 }
  0x99   : > { %p3024_p9 = pneg %p3023_p3 }
  0x9a   : > { %p3030_p5 = por %p3029_p7, %p3028_p4 }
  0x9c   : > { %p3031_p11 = pnand %p3030_p5, %p3024_p9 }
  0x9e   : > { %3034 = shalt.err (!%p3031_p11)
}
  0x9f   : > { %s3035_s15 = scalar_lea.vmem %s3477_s29, 1024  ;;  %s3182_s20 = smov [#allocation10]  }
  0xa0   : > { %p3036_p10 = scmp.ne.s32.totalorder %s3477_s29, %s3035_s15  ;;  %s3040_s6 = sshll.u32 %s3182_s20, 4  ;;  %s3041_s6 = int_to_ptr.vmem [resolvable:$false] %s3040_s6 }
  0xa1   : > { %s3042_s9 = scalar_lea.vmem %s3041_s6, 2048  ;;  %p3043_p0 = scmp.lt.s32.totalorder %s3477_s29, %s3041_s6 }
  0xa2   : > { %p3038_p13 = pnand %p3036_p10, %p4043_p8  ;;  %p3044_p6 = scmp.lt.s32.totalorder %s3042_s9, %s3035_s15 }
  0xa4   : > { %p3039_p2 = pneg %p3038_p13  ;;  %p3045_p3 = por %p3044_p6, %p3043_p0 }
  0xa6   : > { %p3046_p12 = pnand %p3045_p3, %p3039_p2 }
  0xa8   : > { %3049 = shalt.err (!%p3046_p12)
}
  0xa9   : > { %p4044_p9 = scmp.ne.s32.totalorder %s4030_s30, 0  ;;  %s3508_s4 = scalar_lea.hbm %s3990_s8, %s3290_s24 }
  0xaa   : > { %s482_s10 = scalar_lea.vmem [#allocation11], %s3296_s26  ;;  %s479_s13 = scalar_lea.sflag [#allocation12], %s3287_s23 }
  0xab   : > { %2696 = dma.hbm_to_vmem [thread:$0]  (!%p4044_p9), %s3450_s5, 1024, %s3477_s29, %s3357_s2, %s4039_s12, %s4039_s12, %s4038_s21  }
  0xac   : > { %s489_s1 = sshll.u32 %s482_s10, 4  ;;  %s3050_s11 = scalar_lea.hbm %s3508_s4, 1024  ;;  %s3511_s1 = int_to_ptr.vmem [resolvable:$true] %s489_s1 }
  0xad   : > { %p3051_p1 = scmp.ne.s32.totalorder %s3508_s4, %s3050_s11  ;;  %s3055_s29 = scalar_lea.hbm %s3990_s8, 2048 }
  0xae   : > { %p3056_p5 = scmp.lt.u32.totalorder %s3508_s4, %s3990_s8  ;;  %p3057_p11 = scmp.lt.u32.totalorder %s3055_s29, %s3050_s11 }
  0xaf   : > { %p3053_p4 = pnand %p3051_p1, %p4043_p8  ;;  %p3059_p13 = scmp.lt.u32.totalorder %s3050_s11, %s3508_s4 }
  0xb0   : > { %p3058_p10 = por %p3057_p11, %p3056_p5 }
  0xb1   : > { %p3054_p7 = pneg %p3053_p4 }
  0xb2   : > { %p3060_p2 = por %p3059_p13, %p3058_p10 }
  0xb4   : > { %p3061_p0 = pnand %p3060_p2, %p3054_p7 }
  0xb6   : > { %3064 = shalt.err (!%p3061_p0)
}
  0xb7   : > { %s3065_s26 = scalar_lea.vmem %s3511_s1, 1024  ;;  %s3183_s25 = smov [#allocation11]  }
  0xb8   : > { %p3066_p6 = scmp.ne.s32.totalorder %s3511_s1, %s3065_s26  ;;  %s3070_s15 = sshll.u32 %s3183_s25, 4  ;;  %s3071_s15 = int_to_ptr.vmem [resolvable:$false] %s3070_s15 }
  0xb9   : > { %s3072_s20 = scalar_lea.vmem %s3071_s15, 2048  ;;  %p3073_p1 = scmp.lt.s32.totalorder %s3511_s1, %s3071_s15 }
  0xba   : > { %p3068_p3 = pnand %p3066_p6, %p4043_p8  ;;  %p3074_p4 = scmp.lt.s32.totalorder %s3072_s20, %s3065_s26 }
  0xbc   : > { %p3069_p12 = pneg %p3068_p3  ;;  %p3075_p5 = por %p3074_p4, %p3073_p1 }
  0xbe   : > { %p3076_p11 = pnand %p3075_p5, %p3069_p12 }
  0xc0   : > { %3079 = shalt.err (!%p3076_p11)
}
  0xc1   : > { %2699 = dma.hbm_to_vmem [thread:$0]  (!%p4044_p9), %s3508_s4, 1024, %s3511_s1, %s479_s13, %s4039_s12, %s4039_s12, %s4038_s21  }
  0xc2   : > { %p4045_p8 = scmp.ne.s32.totalorder %s4035_s28, 0 }
  0xc3   : > { %p4046_p7 = scmp.eq.s32.totalorder (!%p4045_p8), %s3385_s22, 0 }
  0xc4   : > { %509 = sbr.rel (%p4045_p8) target bundleno = 2132 (0x854), region = 60 }
  0xcb   : > { %3131 = dma.done.wait (%p4046_p7), [#allocation3], 512   ;;  %p4047_p10 = pmov %p4046_p7 }
  0xcc   : > { %s515_s30 = sand.u32 1, %s3385_s22   ;;  %s517_s27 = sand.u32 1, %s3156_s14  }
  0xcd   : > { %3133 = vsyncadd (%p4047_p10), [#allocation3], 4294966784  ;;  %s2379_s6 = sshll.u32 %s517_s27, 6  ;;  %s516_s9 = scalar_lea.sflag [#allocation6], %s515_s30 }
  0xce   : > { %s3548_s23 = scalar_lea.vmem [#allocation5], %s2379_s6  ;;  %p4048_p13 = scmp.ne.s32.totalorder %s4034_s19, 0 }
  0xd0   : > { %3135 = dma.done.wait (%p4048_p13), %s516_s9, 2048  }
  0xd1   : > { %3137 = vsyncadd (%p4048_p13), %s516_s9, 4294965248  ;;  %s2381_s28 = sshll.u32 %s517_s27, 7  ;;  %s3554_s21 = scalar_lea.vmem [#allocation7], %s2379_s6 }
  0xd2   : > { %s534_s12 = scalar_lea.sflag [#allocation9], %s515_s30  ;;  %s3556_s17 = scalar_lea.vmem [#allocation8], %s2381_s28 }
  0xd3   : > { %3139 = dma.done.wait (%p4048_p13), %s534_s12, 3072  }
  0xd4   : > { %3141 = vsyncadd (%p4048_p13), %s534_s12, 4294964224  ;;  %s3562_s18 = scalar_lea.vmem [#allocation10], %s2379_s6  ;;  %s552_s4 = scalar_lea.sflag [#allocation12], %s517_s27 }
  0xd5   : > { %s3564_s10 = scalar_lea.vmem [#allocation11], %s2379_s6 }
  0xd6   : > { %3143 = dma.done.wait (%p4048_p13), %s552_s4, 1024  }
  0xd7   : > { %3145 = vsyncadd (%p4048_p13), %s552_s4, 4294966272  ;;  %p652_p9 = scmp.lt.s32.totalorder %s3164_s16, 1  ;;  %s4049_s5 = sld [smem:[#allocation30_spill]] }
  0xd8   : > { %p2386_p2 = scmp.ne.s32.totalorder %s3164_s16, 0 }
  0xd9   : > { %s653_s1 = scalar_select %p652_p9, %s3164_s16, 1 }
  0xda   : > { %662 = sbr.rel (%p2386_p2) target bundleno = 225 (0xe1), region = 88  ;;  %v663_v0 = vld [vmem:[#allocation2] sm:$0xff] (!%p2386_p2)  ;;  %v664_v1 = vld [vmem:[#allocation2 + $0x8] sm:$0xff] (!%p2386_p2)  ;;  %v665_v2 = vld [vmem:[#allocation2 + $0x10] sm:$0xff] (!%p2386_p2) }
  0xdb   : > { %s2455_s13 = sshll.u32 %s653_s1, 4  ;;  %667 = vst [vmem:[#allocation13] sm:$0xff] (!%p2386_p2), %v663_v0  ;;  %668 = vst [vmem:[#allocation13 + $0x8] sm:$0xff] (!%p2386_p2), %v664_v1  ;;  %v666_v3 = vld [vmem:[#allocation2 + $0x18] sm:$0xff] (!%p2386_p2) }
  0xdc   : > { %669 = vst [vmem:[#allocation13 + $0x10] sm:$0xff] (!%p2386_p2), %v665_v2  ;;  %670 = vst [vmem:[#allocation13 + $0x18] sm:$0xff] (!%p2386_p2), %v666_v3 }
  0xdd   : > { %s3575_s29 = scalar_lea.vmem %s4049_s5, %s2455_s13 }
  0xe1 PF: > { %v2766_v4 = vld [vmem:[%s3548_s23] sm:$0xff]   ;;  %v2767_v5 = vld [vmem:[%s3548_s23 + $0x8] sm:$0xff]   ;;  %v2768_v6 = vld [vmem:[%s3548_s23 + $0x10] sm:$0xff]   ;;  %s4050_s24 = sld [smem:[#allocation24_spill]]  ;;  %v3184_v50 = vmov 0   ;;  %s4051_s11 = sld [smem:[#allocation25_spill]] }
  0xe2   : > { %2522 = vmatprep.subr.bf16.mxu0 %v2766_v4  ;;  %v2769_v7 = vld [vmem:[%s3548_s23 + $0x18] sm:$0xff]   ;;  %v2770_v9 = vld [vmem:[%s3548_s23 + $0x20] sm:$0xff]   ;;  %v2771_v10 = vld [vmem:[%s3548_s23 + $0x28] sm:$0xff]   ;;  %2765 = vset.pattern.permute.xlu1 %v3184_v50  ;;  %s4052_s15 = sld [smem:[#allocation26_spill]]  ;;  %vm3186_vm0 = vmmov 0   ;;  %vm1604_vm1 = vcmask 523264  }
  0xe3   : > { %2523 = vmatpush3.bf16.msra.mxu0 %v2766_v4  ;;  %v2782_v11 = vld [vmem:[%s3554_s21] sm:$0xff]   ;;  %v2783_v12 = vld [vmem:[%s3554_s21 + $0x8] sm:$0xff]   ;;  %v2772_v13 = vld [vmem:[%s3548_s23 + $0x30] sm:$0xff]   ;;  %2764 = vset.pattern.permute.xlu0 %v3184_v50  ;;  %p2703_p0 = scmp.eq.s32.totalorder %s3385_s22, 1 }
  0xe4   : > { %2524 = vmatprep.subr.bf16.mxu0 %v2767_v5  ;;  %2554 = vmatprep.subr.bf16.mxu1 %v2782_v11  ;;  %v2784_v14 = vld [vmem:[%s3554_s21 + $0x10] sm:$0xff]   ;;  %v2773_v15 = vld [vmem:[%s3548_s23 + $0x38] sm:$0xff]   ;;  %v671_v17 = vld [vmem:[#allocation13] sm:$0xff] }
  0xe5   : > { %2555 = vmatpush3.bf16.msra.mxu1 %v2782_v11  ;;  %v2785_v16 = vld [vmem:[%s3554_s21 + $0x18] sm:$0xff]   ;;  %v672_v18 = vld [vmem:[#allocation13 + $0x8] sm:$0xff]  ;;  %v2786_v20 = vld [vmem:[%s3554_s21 + $0x20] sm:$0xff]  }
  0xe6   : > { %2556 = vmatprep.subr.bf16.mxu1 %v2783_v12  ;;  %v683_v19 = vpack.c.bf16 %v672_v18, %v671_v17  ;;  %v2787_v23 = vld [vmem:[%s3554_s21 + $0x28] sm:$0xff]   ;;  %v2788_v24 = vld [vmem:[%s3554_s21 + $0x30] sm:$0xff]   ;;  %v2789_v27 = vld [vmem:[%s3554_s21 + $0x38] sm:$0xff]  }
  0xe7   : > { %2525 = vmatpush3.bf16.msra.mxu0 %v2767_v5  ;;  %v2774_v8 = vld [vmem:[%s4050_s24] sm:$0xff]   ;;  %v2775_v21 = vld [vmem:[%s4050_s24 + $0x8] sm:$0xff]   ;;  %v2776_v22 = vld [vmem:[%s4050_s24 + $0x10] sm:$0xff]  }
  0xe8   : > { %2526 = vmatprep.subr.bf16.mxu0 %v2768_v6  ;;  %2538 = vmatprep.mubr.bf16.mxu0 %v2774_v8  ;;  %v2777_v25 = vld [vmem:[%s4050_s24 + $0x18] sm:$0xff]   ;;  %v2778_v26 = vld [vmem:[%s4050_s24 + $0x20] sm:$0xff]   ;;  %v673_v28 = vld [vmem:[#allocation13 + $0x10] sm:$0xff]  ;;  %s4053_s20 = smov %s4052_s15 }
  0xe9   : > { %2557 = vmatpush3.bf16.msra.mxu1 %v2783_v12  ;;  %2570 = vmatprep.mubr.bf16.mxu1 %v683_v19  ;;  %v674_v29 = vld [vmem:[#allocation13 + $0x18] sm:$0xff]  ;;  %v2779_v30 = vld [vmem:[%s4050_s24 + $0x28] sm:$0xff]   ;;  %v2780_v32 = vld [vmem:[%s4050_s24 + $0x30] sm:$0xff]  }
  0xea   : > { %2558 = vmatprep.subr.bf16.mxu1 %v2784_v14  ;;  %v684_v31 = vpack.c.bf16 %v674_v29, %v673_v28  ;;  %v2781_v33 = vld [vmem:[%s4050_s24 + $0x38] sm:$0xff]   ;;  %v2792_v34 = vld [vmem:[%s3556_s17 + $0x4] ss:$8 sps:$4 sm:$0xff]   ;;  %v2790_v35 = vld [vmem:[%s3556_s17] ss:$8 sps:$4 sm:$0xff]  }
  0xeb   : > { %2527 = vmatpush3.bf16.msra.mxu0 %v2768_v6  ;;  %v2795_v36 = vld [vmem:[%s3556_s17 + $0x14] ss:$8 sps:$4 sm:$0xff]   ;;  %v2793_v37 = vld [vmem:[%s3556_s17 + $0x10] ss:$8 sps:$4 sm:$0xff]   ;;  %v2798_v38 = vld [vmem:[%s3556_s17 + $0x24] ss:$8 sps:$4 sm:$0xff]  }
  0xec   : > { %2528 = vmatprep.subr.bf16.mxu0 %v2769_v7  ;;  %v2796_v39 = vld [vmem:[%s3556_s17 + $0x20] ss:$8 sps:$4 sm:$0xff]   ;;  %v2801_v40 = vld [vmem:[%s3556_s17 + $0x34] ss:$8 sps:$4 sm:$0xff]   ;;  %v2799_v41 = vld [vmem:[%s3556_s17 + $0x30] ss:$8 sps:$4 sm:$0xff]  }
  0xed   : > { %2559 = vmatpush3.bf16.msra.mxu1 %v2784_v14  ;;  %v2804_v42 = vld [vmem:[%s3556_s17 + $0x44] ss:$8 sps:$4 sm:$0xff]   ;;  %v2802_v43 = vld [vmem:[%s3556_s17 + $0x40] ss:$8 sps:$4 sm:$0xff]   ;;  %v2807_v44 = vld [vmem:[%s3556_s17 + $0x54] ss:$8 sps:$4 sm:$0xff]  }
  0xee   : > { %2560 = vmatprep.subr.bf16.mxu1 %v2785_v16  ;;  %v2805_v45 = vld [vmem:[%s3556_s17 + $0x50] ss:$8 sps:$4 sm:$0xff]   ;;  %v2810_v46 = vld [vmem:[%s3556_s17 + $0x64] ss:$8 sps:$4 sm:$0xff]   ;;  %v2808_v47 = vld [vmem:[%s3556_s17 + $0x60] ss:$8 sps:$4 sm:$0xff]  }
  0xef   : > { %2529 = vmatpush3.bf16.msra.mxu0 %v2769_v7  ;;  %v2813_v48 = vld [vmem:[%s3556_s17 + $0x74] ss:$8 sps:$4 sm:$0xff]   ;;  %v2811_v49 = vld [vmem:[%s3556_s17 + $0x70] ss:$8 sps:$4 sm:$0xff]   ;;  %v675_v52 = vld [vmem:[%s4051_s11] sm:$0xff] }
  0xf0   : > { %2530 = vmatprep.subr.bf16.mxu0 %v2770_v9  ;;  %v677_v51 = vld [vmem:[%s4051_s11 + $0x10] sm:$0xff]  ;;  %1234 = vperm.xlu0 %2764, %v675_v52   ;;  %v678_v53 = vld [vmem:[%s4051_s11 + $0x18] sm:$0xff]  ;;  %v676_v54 = vld [vmem:[%s4051_s11 + $0x8] sm:$0xff] }
  0xf1   : > { %2561 = vmatpush3.bf16.msra.mxu1 %v2785_v16  ;;  %1244 = vperm.xlu1 %2765, %v677_v51   ;;  %v679_v55 = vld [vmem:[%s4052_s15] sm:$0xff]  ;;  %v680_v56 = vld [vmem:[%s4053_s20 + $0x8] sm:$0xff]  ;;  %v681_v57 = vld [vmem:[%s4053_s20 + $0x10] sm:$0xff] }
  0xf2   : > { %2562 = vmatprep.subr.bf16.mxu1 %v2786_v20  ;;  %v682_v58 = vld [vmem:[%s4053_s20 + $0x18] sm:$0xff]  ;;  %v3662_v59 = vld [vmem:[%s3575_s29] ss:$0 sm:$0xff] }
  0xf3   : > { %2531 = vmatpush3.bf16.msra.mxu0 %v2770_v9 }
  0xf4   : > { %2532 = vmatprep.subr.bf16.mxu0 %v2771_v10  ;;  %1239 = vperm.xlu0 %2764, %v676_v54  }
  0xf5   : > { %2563 = vmatpush3.bf16.msra.mxu1 %v2786_v20  ;;  %1249 = vperm.xlu1 %2765, %v678_v53  }
  0xf6   : > { %2564 = vmatprep.subr.bf16.mxu1 %v2787_v23 }
  0xf7   : > { %2533 = vmatpush3.bf16.msra.mxu0 %v2771_v10 }
  0xf8   : > { %2534 = vmatprep.subr.bf16.mxu0 %v2772_v13  ;;  %1582 = vperm.xlu0 %2764, %v679_v55  }
  0xf9   : > { %2565 = vmatpush3.bf16.msra.mxu1 %v2787_v23  ;;  %1587 = vperm.xlu1 %2765, %v680_v56  }
  0xfa   : > { %2566 = vmatprep.subr.bf16.mxu1 %v2788_v24 }
  0xfb   : > { %2535 = vmatpush3.bf16.msra.mxu0 %v2772_v13 }
  0xfc   : > { %2536 = vmatprep.subr.bf16.mxu0 %v2773_v15  ;;  %1592 = vperm.xlu0 %2764, %v681_v57  }
  0xfd   : > { %2567 = vmatpush3.bf16.msra.mxu1 %v2788_v24  ;;  %1597 = vperm.xlu1 %2765, %v682_v58  }
  0xfe   : > { %2568 = vmatprep.subr.bf16.mxu1 %v2789_v27 }
  0xff   : > { %2537 = vmatpush3.bf16.msra.mxu0 %v2773_v15 }
 0x100   : > { %1363 = vmatprep.subr.bf16.mxu0 %v2792_v34 }
 0x101   : > { %2569 = vmatpush3.bf16.msra.mxu1 %v2789_v27 }
 0x102   : > { %2539 = vmatmul.mubr.bf16.vlgmr.msra.gmra.mrb[0].mxu0 %v2775_v21 }
 0x103   : > { %2542 = vmatprep.mubr.bf16.mxu0 %v2776_v22  ;;  %1364 = vmatpush1.bf16.msra.mxu0 %v2790_v35 }
 0x104   : > { %2571 = vmatmul.mubr.bf16.vlgmr.msra.gmra.mrb[0].mxu1 %v684_v31  ;;  %1365 = vmatprep.subr.bf16.mxu0 %v2795_v36 }
 0x107   : > { %1366 = vmatpush1.bf16.msra.mxu0 %v2793_v37 }
 0x108   : > { %1367 = vmatprep.subr.bf16.mxu0 %v2798_v38 }
 0x10a   : > { %2543 = vmatmul.mubr.bf16.gmra.mrb[4].mxu0 %v2777_v25 }
 0x10b   : > { %2546 = vmatprep.mubr.bf16.mxu0 %v2778_v26  ;;  %1368 = vmatpush1.bf16.msra.mxu0 %v2796_v39 }
 0x10c   : > { %1369 = vmatprep.subr.bf16.mxu0 %v2801_v40 }
 0x10f   : > { %1370 = vmatpush1.bf16.msra.mxu0 %v2799_v41 }
 0x110   : > { %1371 = vmatprep.subr.bf16.mxu0 %v2804_v42 }
 0x112   : > { %2547 = vmatmul.mubr.bf16.gmra.mrb[8].mxu0 %v2779_v30 }
 0x113   : > { %2550 = vmatprep.mubr.bf16.mxu0 %v2780_v32  ;;  %1372 = vmatpush1.bf16.msra.mxu0 %v2802_v43 }
 0x114   : > { %1373 = vmatprep.subr.bf16.mxu0 %v2807_v44 }
 0x117   : > { %1374 = vmatpush1.bf16.msra.mxu0 %v2805_v45 }
 0x118   : > { %1375 = vmatprep.subr.bf16.mxu0 %v2810_v46 }
 0x11a   : > { %2551 = vmatmul.mubr.bf16.gmra.mrb[12].mxu0 %v2781_v33 }
 0x11b   : > { %1376 = vmatpush1.bf16.msra.mxu0 %v2808_v47  ;;  %1395 = vmatprep.mubr.bf16.mxu0 %v3184_v50 }
 0x11c   : > { %1377 = vmatprep.subr.bf16.mxu0 %v2813_v48 }
 0x11f   : > { %1378 = vmatpush1.bf16.msra.mxu0 %v2811_v49 }
 0x1d5   : > { %v2540_v60 = vpop.f32.mrb[0].mxu0 }
 0x1d6   : > { %v864_v61 = vadd.f32 %v2540_v60, %v3662_v59  ;;  %v855_v62 = vpop.f32.mrb[1].mxu0 }
 0x1d7   : > { %v856_v63 = vadd.f32 %v855_v62, %v3662_v59  ;;  %v2541_v0 = vpop.f32.mrb[2].mxu0  ;;  %v3685_v47 = vpop.f32.mrb[0].mxu1 }
 0x1d8   : > { %v936_v1 = vmul.f32 %v864_v61, %v864_v61  ;;  %v867_v2 = vadd.f32 %v2541_v0, %v3662_v59  ;;  %v858_v3 = vpop.f32.mrb[3].mxu0  ;;  %v3671_v19 = vmul.f32 0.5, %v864_v61  ;;  %v3693_v54 = vpop.f32.mrb[1].mxu1 }
 0x1d9   : > { %v934_v4 = vmul.f32 %v856_v63, %v856_v63  ;;  %v859_v5 = vadd.f32 %v858_v3, %v3662_v59  ;;  %v3673_v20 = vmul.f32 0.5, %v856_v63 }
 0x1da   : > { %v952_v6 = vmul.f32 %v936_v1, %v864_v61  ;;  %v937_v7 = vmul.f32 %v867_v2, %v867_v2  ;;  %v3681_v42 = vmul.f32 0.5, %v867_v2 }
 0x1db   : > { %v950_v8 = vmul.f32 %v934_v4, %v856_v63  ;;  %v935_v9 = vmul.f32 %v859_v5, %v859_v5  ;;  %v3683_v43 = vmul.f32 0.5, %v859_v5 }
 0x1dc   : > { %v968_v10 = vmul.f32 0.044715, %v952_v6  ;;  %v953_v11 = vmul.f32 %v937_v7, %v867_v2 }
 0x1dd   : > { %v966_v12 = vmul.f32 0.044715, %v950_v8  ;;  %v951_v13 = vmul.f32 %v935_v9, %v859_v5  ;;  %v2544_v14 = vpop.f32.mrb[4].mxu0 }
 0x1de   : > { %v984_v15 = vadd.f32 %v968_v10, %v864_v61  ;;  %v969_v16 = vmul.f32 0.044715, %v953_v11  ;;  %v3669_v17 = vadd.f32 %v2544_v14, %v3662_v59  ;;  %v871_v18 = vpop.f32.mrb[5].mxu0  ;;  %v3700_v61 = vpop.f32.mrb[2].mxu1 }
 0x1df   : > { %v982_v21 = vadd.f32 %v966_v12, %v856_v63  ;;  %v967_v22 = vmul.f32 0.044715, %v951_v13  ;;  %v872_v23 = vadd.f32 %v871_v18, %v3662_v59  ;;  %v2545_v24 = vpop.f32.mrb[6].mxu0  ;;  %v3707_v3 = vpop.f32.mrb[3].mxu1 }
 0x1e0   : > { %v1000_v25 = vmul.f32 0.7978846, %v984_v15  ;;  %v985_v26 = vadd.f32 %v969_v16, %v867_v2  ;;  %v940_v27 = vmul.f32 %v3669_v17, %v3669_v17  ;;  %v883_v28 = vadd.f32 %v2545_v24, %v3662_v59  ;;  %v874_v29 = vpop.f32.mrb[7].mxu0 }
 0x1e1   : > { %v998_v30 = vmul.f32 0.7978846, %v982_v21  ;;  %v983_v31 = vadd.f32 %v967_v22, %v859_v5  ;;  %v938_v32 = vmul.f32 %v872_v23, %v872_v23  ;;  %v875_v33 = vadd.f32 %v874_v29, %v3662_v59 }
 0x1e2   : > { %2830 = vtanh.f32 %v1000_v25  ;;  %v1001_v34 = vmul.f32 0.7978846, %v985_v26  ;;  %v956_v35 = vmul.f32 %v940_v27, %v3669_v17  ;;  %v941_v36 = vmul.f32 %v883_v28, %v883_v28 }
 0x1e3   : > { %2832 = vtanh.f32 %v998_v30  ;;  %v999_v37 = vmul.f32 0.7978846, %v983_v31  ;;  %v954_v38 = vmul.f32 %v938_v32, %v872_v23  ;;  %v939_v39 = vmul.f32 %v875_v33, %v875_v33 }
 0x1e4   : > { %2834 = vtanh.f32 %v1001_v34  ;;  %v972_v40 = vmul.f32 0.044715, %v956_v35  ;;  %v957_v41 = vmul.f32 %v941_v36, %v883_v28  ;;  %v3691_v53 = vmul.f32 0.5, %v872_v23 }
 0x1e5   : > { %2836 = vtanh.f32 %v999_v37  ;;  %v970_v44 = vmul.f32 0.044715, %v954_v38  ;;  %v955_v45 = vmul.f32 %v939_v39, %v875_v33  ;;  %v2548_v46 = vpop.f32.mrb[8].mxu0  ;;  %v3698_v60 = vmul.f32 0.5, %v875_v33 }
 0x1e6   : > { %v988_v48 = vadd.f32 %v972_v40, %v3669_v17  ;;  %v973_v49 = vmul.f32 0.044715, %v957_v41  ;;  %v3689_v51 = vadd.f32 %v2548_v46, %v3662_v59  ;;  %v887_v52 = vpop.f32.mrb[9].mxu0  ;;  %v3721_v18 = vmul.f32 0.5, %v883_v28 }
 0x1e7   : > { %v986_v55 = vadd.f32 %v970_v44, %v872_v23  ;;  %v971_v56 = vmul.f32 0.044715, %v955_v45  ;;  %v3696_v57 = vadd.f32 %v887_v52, %v3662_v59  ;;  %v2549_v58 = vpop.f32.mrb[10].mxu0 }
 0x1e8   : > { %v1004_v62 = vmul.f32 0.7978846, %v988_v48  ;;  %v989_v63 = vadd.f32 %v973_v49, %v883_v28  ;;  %v944_v0 = vmul.f32 %v3689_v51, %v3689_v51  ;;  %v3705_v1 = vadd.f32 %v2549_v58, %v3662_v59  ;;  %v890_v2 = vpop.f32.mrb[11].mxu0 }
 0x1e9   : > { %v1002_v4 = vmul.f32 0.7978846, %v986_v55  ;;  %v987_v5 = vadd.f32 %v971_v56, %v875_v33  ;;  %v942_v6 = vmul.f32 %v3696_v57, %v3696_v57  ;;  %v3712_v7 = vadd.f32 %v890_v2, %v3662_v59 }
 0x1ea   : > { %2838 = vtanh.f32 %v1004_v62  ;;  %v1005_v8 = vmul.f32 0.7978846, %v989_v63  ;;  %v960_v9 = vmul.f32 %v944_v0, %v3689_v51  ;;  %v945_v10 = vmul.f32 %v3705_v1, %v3705_v1 }
 0x1eb   : > { %2840 = vtanh.f32 %v1002_v4  ;;  %v1003_v11 = vmul.f32 0.7978846, %v987_v5  ;;  %v958_v12 = vmul.f32 %v942_v6, %v3696_v57  ;;  %v943_v13 = vmul.f32 %v3712_v7, %v3712_v7 }
 0x1ec   : > { %v2831_v14 = vpop.eup %2830  ;;  %2842 = vtanh.f32 %v1005_v8  ;;  %v976_v15 = vmul.f32 0.044715, %v960_v9  ;;  %v961_v16 = vmul.f32 %v945_v10, %v3705_v1 }
 0x1ed   : > { %v2833_v21 = vpop.eup %2832  ;;  %2844 = vtanh.f32 %v1003_v11  ;;  %v974_v22 = vmul.f32 0.044715, %v958_v12  ;;  %v959_v23 = vmul.f32 %v943_v13, %v3712_v7  ;;  %v2552_v24 = vpop.f32.mrb[12].mxu0  ;;  %v1032_v25 = vadd.f32 1.0, %v2831_v14 }
 0x1ee   : > { %v2835_v26 = vpop.eup %2834  ;;  %v1030_v27 = vadd.f32 1.0, %v2833_v21  ;;  %v992_v29 = vadd.f32 %v976_v15, %v3689_v51  ;;  %v977_v30 = vmul.f32 0.044715, %v961_v16  ;;  %v3726_v31 = vadd.f32 %v2552_v24, %v3662_v59  ;;  %v903_v32 = vpop.f32.mrb[13].mxu0 }
 0x1ef   : > { %v2837_v33 = vpop.eup %2836  ;;  %v990_v28 = vadd.f32 %v974_v22, %v3696_v57  ;;  %v975_v34 = vmul.f32 0.044715, %v959_v23  ;;  %v3730_v35 = vadd.f32 %v903_v32, %v3662_v59  ;;  %v2553_v36 = vpop.f32.mrb[14].mxu0  ;;  %v1033_v37 = vadd.f32 1.0, %v2835_v26 }
 0x1f0   : > { %v1046_v38 = vmul.f32 %v1030_v27, %v3673_v20  ;;  %v1031_v39 = vadd.f32 1.0, %v2837_v33  ;;  %v1008_v40 = vmul.f32 0.7978846, %v992_v29  ;;  %v993_v41 = vadd.f32 %v977_v30, %v3705_v1  ;;  %v906_v44 = vpop.f32.mrb[15].mxu0 }
 0x1f1   : > { %v1006_v45 = vmul.f32 0.7978846, %v990_v28  ;;  %v991_v46 = vadd.f32 %v975_v34, %v3712_v7  ;;  %v948_v48 = vmul.f32 %v3726_v31, %v3726_v31  ;;  %v946_v49 = vmul.f32 %v3730_v35, %v3730_v35 }
 0x1f2   : > { %v1047_v52 = vmul.f32 %v1031_v39, %v3683_v43  ;;  %2846 = vtanh.f32 %v1008_v40  ;;  %v1009_v55 = vmul.f32 0.7978846, %v993_v41  ;;  %v3741_v20 = vadd.f32 %v2553_v36, %v3662_v59 }
 0x1f3   : > { %2848 = vtanh.f32 %v1006_v45  ;;  %v1007_v56 = vmul.f32 0.7978846, %v991_v46  ;;  %v964_v58 = vmul.f32 %v948_v48, %v3726_v31  ;;  %v962_v62 = vmul.f32 %v946_v49, %v3730_v35 }
 0x1f4   : > { %v2839_v63 = vpop.eup %2838  ;;  %2850 = vtanh.f32 %v1009_v55  ;;  %v949_v0 = vmul.f32 %v3741_v20, %v3741_v20  ;;  %v3748_v2 = vadd.f32 %v906_v44, %v3662_v59  ;;  %v1062_v43 = vpack.c.bf16 %v1047_v52, %v1046_v38 }
 0x1f5   : > { %v2841_v4 = vpop.eup %2840  ;;  %2852 = vtanh.f32 %v1007_v56  ;;  %v980_v5 = vmul.f32 0.044715, %v964_v58  ;;  %v978_v6 = vmul.f32 0.044715, %v962_v62  ;;  %v1048_v8 = vmul.f32 %v1032_v25, %v3671_v19 }
 0x1f6   : > { %v2843_v9 = vpop.eup %2842  ;;  %v965_v10 = vmul.f32 %v949_v0, %v3741_v20  ;;  %v947_v11 = vmul.f32 %v3748_v2, %v3748_v2  ;;  %1396 = vmatmul.mubr.bf16.vlgmr.msra.gmra.mrb[16].mxu0 %v1062_v43  ;;  %v1049_v12 = vmul.f32 %v1033_v37, %v3681_v42  ;;  %v1034_v13 = vadd.f32 1.0, %v2841_v4 }
 0x1f7   : > { %v2845_v14 = vpop.eup %2844  ;;  %v996_v59 = vadd.f32 %v980_v5, %v3726_v31  ;;  %v994_v15 = vadd.f32 %v978_v6, %v3730_v35  ;;  %1405 = vmatprep.mubr.bf16.mxu0 %v3184_v50  ;;  %v1036_v16 = vadd.f32 1.0, %v2839_v63  ;;  %v1037_v21 = vadd.f32 1.0, %v2843_v9 }
 0x1f8   : > { %v981_v19 = vmul.f32 0.044715, %v965_v10  ;;  %v963_v22 = vmul.f32 %v947_v11, %v3748_v2  ;;  %v1063_v23 = vpack.c.bf16 %v1049_v12, %v1048_v8  ;;  %v1035_v24 = vadd.f32 1.0, %v2845_v14 }
 0x1f9   : > { %v1012_v25 = vmul.f32 0.7978846, %v996_v59  ;;  %v1010_v26 = vmul.f32 0.7978846, %v994_v15  ;;  %v1050_v42 = vmul.f32 %v1034_v13, %v3691_v53  ;;  %v924_v27 = vmul.f32 0.5, %v3669_v17 }
 0x1fa   : > { %v997_v29 = vadd.f32 %v981_v19, %v3741_v20  ;;  %v979_v30 = vmul.f32 0.044715, %v963_v22  ;;  %v1051_v32 = vmul.f32 %v1035_v24, %v3698_v60  ;;  %v3764_v33 = vmul.f32 %v1037_v21, %v3721_v18  ;;  %v686_v53 = vld [vmem:[%s3575_s29 + $0x1] ss:$0 sm:$0xff] }
 0x1fb   : > { %2854 = vtanh.f32 %v1012_v25  ;;  %v3766_v28 = vmul.f32 %v1036_v16, %v924_v27  ;;  %v926_v18 = vmul.f32 0.5, %v3696_v57  ;;  %v928_v46 = vmul.f32 0.5, %v3689_v51 }
 0x1fc   : > { %v2847_v34 = vpop.eup %2846  ;;  %2856 = vtanh.f32 %v1010_v26  ;;  %v1013_v36 = vmul.f32 0.7978846, %v997_v29  ;;  %v995_v37 = vadd.f32 %v979_v30, %v3748_v2  ;;  %v1064_v38 = vpack.c.bf16 %v1051_v32, %v1050_v42 }
 0x1fd   : > { %v2849_v39 = vpop.eup %2848  ;;  %v1065_v17 = vpack.c.bf16 %v3764_v33, %v3766_v28  ;;  %v1040_v40 = vadd.f32 1.0, %v2847_v34  ;;  %v929_v48 = vmul.f32 0.5, %v3705_v1  ;;  %v1177_v52 = vadd.f32 %v3685_v47, %v686_v53 }
 0x1fe   : > { %v2851_v41 = vpop.eup %2850  ;;  %2858 = vtanh.f32 %v1013_v36  ;;  %v1011_v60 = vmul.f32 0.7978846, %v995_v37  ;;  %1406 = vmatmul.mubr.bf16.gmra.mrb[20].mxu0 %v1063_v23  ;;  %v1038_v44 = vadd.f32 1.0, %v2849_v39  ;;  %v927_v55 = vmul.f32 0.5, %v3712_v7 }
 0x1ff   : > { %v2853_v45 = vpop.eup %2852  ;;  %1415 = vmatprep.mubr.bf16.mxu0 %v3184_v50  ;;  %v1041_v49 = vadd.f32 1.0, %v2851_v41  ;;  %v1169_v58 = vadd.f32 %v3693_v54, %v686_v53  ;;  %v3779_v62 = vmul.f32 %v1040_v40, %v928_v46  ;;  %v1180_v63 = vadd.f32 %v3700_v61, %v686_v53 }
 0x200   : > { %2860 = vtanh.f32 %v1011_v60  ;;  %v1039_v56 = vadd.f32 1.0, %v2853_v45  ;;  %v1172_v0 = vadd.f32 %v3707_v3, %v686_v53  ;;  %v1054_v51 = vmul.f32 %v1038_v44, %v926_v18 }
 0x201   : > { %v3781_v57 = vmul.f32 %v1041_v49, %v929_v48  ;;  %v1190_v47 = vadd.f32 %v1180_v63, %v1177_v52  ;;  %v932_v6 = vmul.f32 0.5, %v3726_v31  ;;  %v930_v10 = vmul.f32 0.5, %v3730_v35 }
 0x202   : > { %v1055_v43 = vmul.f32 %v1039_v56, %v927_v55  ;;  %v1183_v4 = vadd.f32 %v1172_v0, %v1169_v58  ;;  %v933_v11 = vmul.f32 0.5, %v3741_v20  ;;  %v931_v59 = vmul.f32 0.5, %v3748_v2 }
 0x203   : > { %v1067_v1 = vpack.c.bf16 %v3781_v57, %v3779_v62  ;;  %v1191_v54 = vrot.slane %v1190_v47, 4 }
 0x204   : > { %v1066_v5 = vpack.c.bf16 %v1055_v43, %v1054_v51  ;;  %v1184_v8 = vrot.slane %v1183_v4, 4  ;;  %v1245_v43 = vpop.permute.xlu1 %1244 }
 0x205   : > { %v2855_v7 = vpop.eup %2854  ;;  %v1192_v12 = vadd.f32 %v1191_v54, %v1190_v47 }
 0x206   : > { %v2857_v9 = vpop.eup %2856  ;;  %1416 = vmatmul.mubr.bf16.gmra.mrb[24].mxu0 %v1064_v38  ;;  %v1044_v61 = vadd.f32 1.0, %v2855_v7  ;;  %v1185_v13 = vadd.f32 %v1184_v8, %v1183_v4 }
 0x207   : > { %1425 = vmatprep.mubr.bf16.mxu0 %v3184_v50  ;;  %v1042_v3 = vadd.f32 1.0, %v2857_v9  ;;  %v1193_v31 = vrot.slane %v1192_v12, 2 }
 0x208   : > { %v2859_v14 = vpop.eup %2858  ;;  %v1060_v16 = vmul.f32 %v1044_v61, %v932_v6  ;;  %v1186_v21 = vrot.slane %v1185_v13, 2  ;;  %v1250_v4 = vpop.permute.xlu1 %1249 }
 0x209   : > { %v1045_v15 = vadd.f32 1.0, %v2859_v14  ;;  %v1058_v22 = vmul.f32 %v1042_v3, %v930_v10  ;;  %v1194_v35 = vadd.f32 %v1193_v31, %v1192_v12  ;;  %v1273_v14 = vlaneseq }
 0x20a   : > { %v2861_v19 = vpop.eup %2860  ;;  %v1187_v25 = vadd.f32 %v1186_v21, %v1185_v13  ;;  %v3185_v13 = vmov 0.0  }
 0x20b   : > { %v1043_v23 = vadd.f32 1.0, %v2861_v19  ;;  %v1061_v24 = vmul.f32 %v1045_v15, %v933_v11  ;;  %v1195_v27 = vrot.slane %v1194_v35, 1  ;;  %2574 = vmatprep.subr.bf16.mxu1 %v3185_v13  ;;  %2610 = vmatprep.subr.bf16.mxu0 %v3185_v13 }
 0x20c   : > { %v1188_v29 = vrot.slane %v1187_v25, 1  ;;  %2582 = vmatprep.mubr.msk.bf16.mxu1 %vm3186_vm0, %v3185_v13 }
 0x20d   : > { %v1059_v26 = vmul.f32 %v1043_v23, %v931_v59  ;;  %v1069_v42 = vpack.c.bf16 %v1061_v24, %v1060_v16  ;;  %v1196_v30 = vadd.f32 %v1195_v27, %v1194_v35  ;;  %v1274_v59 = vshrl.u32 %v1273_v14, 7  ;;  %v2387_v16 = vld [vmem:[%s3575_s29 + $0x2] ss:$8 sm:$0x3] }
 0x20e   : > { %1426 = vmatmul.mubr.bf16.gmra.mrb[28].mxu0 %v1065_v17  ;;  %v1189_v2 = vadd.f32 %v1188_v29, %v1187_v25 }
 0x20f   : > { %1435 = vmatprep.mubr.bf16.mxu0 %v3184_v50  ;;  %v1068_v20 = vpack.c.bf16 %v1059_v26, %v1058_v22  ;;  %v1199_v32 = vmul.f32 0.0625, %v1196_v30  ;;  %v1275_v15 = vsub.s32 0, %v1274_v59  ;;  %v1279_v31 = vsub.s32 1, %v1274_v59 }
 0x210   : > { %v1198_v33 = vmul.f32 0.0625, %v1189_v2 }
 0x211   : > { %v1203_v28 = vsub.f32 %v1180_v63, %v1199_v32  ;;  %v1202_v36 = vsub.f32 %v1177_v52, %v1199_v32  ;;  %v3815_v21 = vrot.slane %v2387_v16, %v1275_v15  ;;  %v3817_v22 = vrot.slane %v2387_v16, %v1279_v31 }
 0x212   : > { %v1201_v34 = vsub.f32 %v1172_v0, %v1198_v33  ;;  %v1200_v37 = vsub.f32 %v1169_v58, %v1198_v33 }
 0x213   : > { %v1207_v38 = vmul.f32 %v1203_v28, %v1203_v28  ;;  %v1206_v39 = vmul.f32 %v1202_v36, %v1202_v36 }
 0x214   : > { %v1205_v53 = vmul.f32 %v1201_v34, %v1201_v34  ;;  %v1204_v40 = vmul.f32 %v1200_v37, %v1200_v37 }
 0x215   : > { %v1215_v41 = vadd.f32 %v1207_v38, %v1206_v39 }
 0x216   : > { %1436 = vmatmul.mubr.bf16.gmra.mrb[32].mxu0 %v1066_v5  ;;  %v1208_v17 = vadd.f32 %v1205_v53, %v1204_v40 }
 0x217   : > { %1445 = vmatprep.mubr.bf16.mxu0 %v3184_v50  ;;  %v1216_v60 = vrot.slane %v1215_v41, 4 }
 0x218   : > { %v1209_v18 = vrot.slane %v1208_v17, 4 }
 0x219   : > { %v1217_v44 = vadd.f32 %v1216_v60, %v1215_v41 }
 0x21a   : > { %v1210_v45 = vadd.f32 %v1209_v18, %v1208_v17 }
 0x21b   : > { %v1218_v46 = vrot.slane %v1217_v44, 2 }
 0x21c   : > { %v1211_v48 = vrot.slane %v1210_v45, 2 }
 0x21d   : > { %v1219_v49 = vadd.f32 %v1218_v46, %v1217_v44 }
 0x21e   : > { %1446 = vmatmul.mubr.bf16.gmra.mrb[36].mxu0 %v1067_v1  ;;  %v1212_v52 = vadd.f32 %v1211_v48, %v1210_v45  ;;  %v1235_v1 = vpop.permute.xlu0 %1234 }
 0x21f   : > { %1455 = vmatprep.mubr.bf16.mxu0 %v3184_v50  ;;  %v1220_v55 = vrot.slane %v1219_v49, 1 }
 0x220   : > { %v1213_v56 = vrot.slane %v1212_v52, 1 }
 0x221   : > { %v1221_v58 = vadd.f32 %v1220_v55, %v1219_v49 }
 0x222   : > { %v1214_v62 = vadd.f32 %v1213_v56, %v1212_v52  ;;  %v1240_v54 = vpop.permute.xlu0 %1239 }
 0x223   : > { %v1223_v57 = vmul.f32 0.0625, %v1221_v58 }
 0x224   : > { %v1222_v63 = vmul.f32 0.0625, %v1214_v62 }
 0x225   : > { %v1225_v0 = vadd.f32 1e-05, %v1223_v57 }
 0x226   : > { %1456 = vmatmul.mubr.bf16.gmra.mrb[40].mxu0 %v1068_v20  ;;  %v1224_v51 = vadd.f32 1e-05, %v1222_v63 }
 0x227   : > { %1465 = vmatprep.mubr.bf16.mxu0 %v3184_v50  ;;  %2862 = vrsqrt.f32 %v1225_v0 }
 0x228   : > { %2864 = vrsqrt.f32 %v1224_v51 }
 0x22e   : > { %1466 = vmatmul.mubr.bf16.gmra.mrb[44].mxu0 %v1069_v42 }
 0x22f   : > { %2618 = vmatprep.mubr.msk.bf16.mxu0 %vm3186_vm0, %v3185_v13 }
 0x231   : > { %v2863_v47 = vpop.eup %2862 }
 0x232   : > { %v2865_v5 = vpop.eup %2864  ;;  %v1230_v7 = vmul.f32 %v2863_v47, %v1202_v36  ;;  %v1231_v6 = vmul.f32 %v2863_v47, %v1203_v28 }
 0x233   : > { %v1228_v8 = vmul.f32 %v2865_v5, %v1200_v37  ;;  %v1229_v9 = vmul.f32 %v2865_v5, %v1201_v34 }
 0x234   : > { %v3796_v10 = vmul.f32 %v1245_v43, %v1230_v7  ;;  %v3798_v61 = vmul.f32 %v1250_v4, %v1231_v6 }
 0x235   : > { %v3800_v50 = vmul.f32 %v1235_v1, %v1228_v8  ;;  %v3802_v3 = vmul.f32 %v1240_v54, %v1229_v9 }
 0x236   : > { %v1493_v11 = vpack.c.bf16 %v3798_v61, %v3796_v10 }
 0x237   : > { %v1492_v12 = vpack.c.bf16 %v3802_v3, %v3800_v50 }
 0x2c9   : > { %v1397_v19 = vpop.f32.mrb[16].mxu0 }
 0x2ca   : > { %v1399_v23 = vpop.f32.mrb[17].mxu0  ;;  %v1398_v35 = vadd.f32 %v1397_v19, %v3815_v21 }
 0x2cb   : > { %v1401_v24 = vpop.f32.mrb[18].mxu0  ;;  %v3822_v42 = vadd.f32 %v1399_v23, %v3817_v22 }
 0x2cc   : > { %v1402_v25 = vadd.f32 %v1401_v24, %v3815_v21  ;;  %v1403_v26 = vpop.f32.mrb[19].mxu0 }
 0x2cd   : > { %v3825_v27 = vadd.f32 %v1403_v26, %v3817_v22 }
 0x2ce   : > { %v1476_v29 = vpack.c.bf16 %v1402_v25, %v1398_v35 }
 0x2cf   : > { %v1477_v20 = vpack.c.bf16 %v3825_v27, %v3822_v42 }
 0x2d0   : > { %2575 = vmatpush3.bf16.xpose.msra.mxu1 %v1476_v29 }
 0x2d1   : > { %v1407_v30 = vpop.f32.mrb[20].mxu0  ;;  %2576 = vmatprep.subr.bf16.mxu1 %v3185_v13 }
 0x2d2   : > { %v1409_v2 = vpop.f32.mrb[21].mxu0  ;;  %v1408_v33 = vadd.f32 %v1407_v30, %v3815_v21 }
 0x2d3   : > { %v1411_v32 = vpop.f32.mrb[22].mxu0  ;;  %v3833_v36 = vadd.f32 %v1409_v2, %v3817_v22 }
 0x2d4   : > { %v1412_v28 = vadd.f32 %v1411_v32, %v3815_v21  ;;  %v1413_v34 = vpop.f32.mrb[23].mxu0 }
 0x2d5   : > { %v3836_v37 = vadd.f32 %v1413_v34, %v3817_v22 }
 0x2d6   : > { %v1478_v38 = vpack.c.bf16 %v1412_v28, %v1408_v33 }
 0x2d7   : > { %v1479_v53 = vpack.c.bf16 %v3836_v37, %v3833_v36  ;;  %v1588_v36 = vpop.permute.xlu1 %1587 }
 0x2d8   : > { %2577 = vmatpush3.bf16.xpose.msra.mxu1 %v1478_v38 }
 0x2d9   : > { %v1417_v39 = vpop.f32.mrb[24].mxu0  ;;  %2578 = vmatprep.subr.bf16.mxu1 %v3185_v13 }
 0x2da   : > { %v1419_v40 = vpop.f32.mrb[25].mxu0  ;;  %v1418_v17 = vadd.f32 %v1417_v39, %v3815_v21 }
 0x2db   : > { %v1421_v41 = vpop.f32.mrb[26].mxu0  ;;  %v3844_v44 = vadd.f32 %v1419_v40, %v3817_v22 }
 0x2dc   : > { %v1422_v60 = vadd.f32 %v1421_v41, %v3815_v21  ;;  %v1423_v18 = vpop.f32.mrb[27].mxu0 }
 0x2dd   : > { %v3847_v45 = vadd.f32 %v1423_v18, %v3817_v22 }
 0x2de   : > { %v1480_v46 = vpack.c.bf16 %v1422_v60, %v1418_v17 }
 0x2df   : > { %v1481_v48 = vpack.c.bf16 %v3847_v45, %v3844_v44 }
 0x2e0   : > { %2579 = vmatpush3.bf16.xpose.msra.mxu1 %v1480_v46 }
 0x2e1   : > { %v1427_v49 = vpop.f32.mrb[28].mxu0  ;;  %2580 = vmatprep.subr.bf16.mxu1 %v3185_v13 }
 0x2e2   : > { %v1429_v52 = vpop.f32.mrb[29].mxu0  ;;  %v1428_v56 = vadd.f32 %v1427_v49, %v3815_v21 }
 0x2e3   : > { %v1431_v55 = vpop.f32.mrb[30].mxu0  ;;  %v3855_v57 = vadd.f32 %v1429_v52, %v3817_v22 }
 0x2e4   : > { %v1432_v58 = vadd.f32 %v1431_v55, %v3815_v21  ;;  %v1433_v62 = vpop.f32.mrb[31].mxu0 }
 0x2e5   : > { %v3858_v63 = vadd.f32 %v1433_v62, %v3817_v22 }
 0x2e6   : > { %v1482_v0 = vpack.c.bf16 %v1432_v58, %v1428_v56 }
 0x2e7   : > { %v1483_v51 = vpack.c.bf16 %v3858_v63, %v3855_v57 }
 0x2e8   : > { %2581 = vmatpush3.bf16.xpose.msra.mxu1 %v1482_v0 }
 0x2e9   : > { %v1437_v43 = vpop.f32.mrb[32].mxu0  ;;  %2586 = vmatprep.subr.bf16.mxu1 %v3185_v13 }
 0x2ea   : > { %v1439_v1 = vpop.f32.mrb[33].mxu0  ;;  %v1438_v4 = vadd.f32 %v1437_v43, %v3815_v21 }
 0x2eb   : > { %v1441_v47 = vpop.f32.mrb[34].mxu0  ;;  %v1440_v6 = vadd.f32 %v1439_v1, %v3817_v22 }
 0x2ec   : > { %v1442_v5 = vadd.f32 %v1441_v47, %v3815_v21  ;;  %v1443_v7 = vpop.f32.mrb[35].mxu0 }
 0x2ed   : > { %v1444_v54 = vadd.f32 %v1443_v7, %v3817_v22 }
 0x2ee   : > { %v1484_v8 = vpack.c.bf16 %v1442_v5, %v1438_v4 }
 0x2ef   : > { %v1485_v9 = vpack.c.bf16 %v1444_v54, %v1440_v6  ;;  %2583 = vmatmul.mubr.bf16.vlgmr.msra.gmra.mrb[4].mxu1 %v1492_v12 }
 0x2f0   : > { %2587 = vmatpush3.bf16.xpose.msra.mxu1 %v1484_v8  ;;  %2594 = vmatprep.mubr.msk.bf16.mxu1 %vm3186_vm0, %v3185_v13  ;;  %v1598_v8 = vpop.permute.xlu1 %1597 }
 0x2f1   : > { %v1447_v14 = vpop.f32.mrb[36].mxu0  ;;  %2611 = vmatpush3.bf16.msra.mxu0 %v1485_v9  ;;  %2588 = vmatprep.subr.bf16.mxu1 %v3185_v13 }
 0x2f2   : > { %v1449_v59 = vpop.f32.mrb[37].mxu0  ;;  %2612 = vmatprep.subr.bf16.mxu0 %v3185_v13  ;;  %v1448_v16 = vadd.f32 %v1447_v14, %v3815_v21 }
 0x2f3   : > { %v1451_v15 = vpop.f32.mrb[38].mxu0  ;;  %v1450_v50 = vadd.f32 %v1449_v59, %v3817_v22 }
 0x2f4   : > { %v1452_v31 = vadd.f32 %v1451_v15, %v3815_v21  ;;  %v1453_v19 = vpop.f32.mrb[39].mxu0 }
 0x2f5   : > { %v1454_v3 = vadd.f32 %v1453_v19, %v3817_v22 }
 0x2f6   : > { %v1486_v12 = vpack.c.bf16 %v1452_v31, %v1448_v16 }
 0x2f7   : > { %v1487_v23 = vpack.c.bf16 %v1454_v3, %v1450_v50 }
 0x2f8   : > { %2589 = vmatpush3.bf16.xpose.msra.mxu1 %v1486_v12 }
 0x2f9   : > { %v1457_v24 = vpop.f32.mrb[40].mxu0  ;;  %2613 = vmatpush3.bf16.msra.mxu0 %v1487_v23  ;;  %2590 = vmatprep.subr.bf16.mxu1 %v3185_v13 }
 0x2fa   : > { %v1459_v35 = vpop.f32.mrb[41].mxu0  ;;  %2614 = vmatprep.subr.bf16.mxu0 %v3185_v13  ;;  %v1458_v26 = vadd.f32 %v1457_v24, %v3815_v21 }
 0x2fb   : > { %v1461_v25 = vpop.f32.mrb[42].mxu0  ;;  %v1460_v2 = vadd.f32 %v1459_v35, %v3817_v22 }
 0x2fc   : > { %v1462_v29 = vadd.f32 %v1461_v25, %v3815_v21  ;;  %v1463_v30 = vpop.f32.mrb[43].mxu0 }
 0x2fd   : > { %v1464_v32 = vadd.f32 %v1463_v30, %v3817_v22 }
 0x2fe   : > { %v1488_v33 = vpack.c.bf16 %v1462_v29, %v1458_v26 }
 0x2ff   : > { %v1489_v28 = vpack.c.bf16 %v1464_v32, %v1460_v2 }
 0x300   : > { %2591 = vmatpush3.bf16.xpose.msra.mxu1 %v1488_v33 }
 0x301   : > { %v1467_v34 = vpop.f32.mrb[44].mxu0  ;;  %2615 = vmatpush3.bf16.msra.mxu0 %v1489_v28  ;;  %2592 = vmatprep.subr.bf16.mxu1 %v3185_v13 }
 0x302   : > { %v1469_v38 = vpop.f32.mrb[45].mxu0  ;;  %2616 = vmatprep.subr.bf16.mxu0 %v3185_v13  ;;  %v1468_v40 = vadd.f32 %v1467_v34, %v3815_v21 }
 0x303   : > { %v1471_v39 = vpop.f32.mrb[46].mxu0  ;;  %v1470_v60 = vadd.f32 %v1469_v38, %v3817_v22 }
 0x304   : > { %v1472_v41 = vadd.f32 %v1471_v39, %v3815_v21  ;;  %v1473_v17 = vpop.f32.mrb[47].mxu0  ;;  %v1583_v21 = vpop.permute.xlu0 %1582 }
 0x305   : > { %v1474_v18 = vadd.f32 %v1473_v17, %v3817_v22 }
 0x306   : > { %v1490_v46 = vpack.c.bf16 %v1472_v41, %v1468_v40 }
 0x307   : > { %v1491_v49 = vpack.c.bf16 %v1474_v18, %v1470_v60 }
 0x308   : > { %2593 = vmatpush3.bf16.xpose.msra.mxu1 %v1490_v46  ;;  %v1593_v47 = vpop.permute.xlu0 %1592 }
 0x309   : > { %2617 = vmatpush3.bf16.msra.mxu0 %v1491_v49  ;;  %2598 = vmatprep.subr.bf16.mxu1 %v3185_v13 }
 0x30f   : > { %2595 = vmatmul.mubr.bf16.vlgmr.msra.gmra.mrb[8].mxu1 %v1493_v11 }
 0x310   : > { %2599 = vmatpush3.bf16.msra.mxu1 %v1477_v20  ;;  %2606 = vmatprep.mubr.msk.bf16.mxu1 %vm3186_vm0, %v3185_v13 }
 0x311   : > { %2600 = vmatprep.subr.bf16.mxu1 %v3185_v13 }
 0x314   : > { %2601 = vmatpush3.bf16.msra.mxu1 %v1479_v53 }
 0x315   : > { %2602 = vmatprep.subr.bf16.mxu1 %v3185_v13 }
 0x318   : > { %2603 = vmatpush3.bf16.msra.mxu1 %v1481_v48 }
 0x319   : > { %2604 = vmatprep.subr.bf16.mxu1 %v3185_v13 }
 0x31c   : > { %2605 = vmatpush3.bf16.msra.mxu1 %v1483_v51 }
 0x3c2   : > { %v1528_v10 = vpop.f32.mrb[4].mxu1 }
 0x3c3   : > { %v1576_v61 = vmul.f32 0.088388346, %v1528_v10  ;;  %v2584_v11 = vpop.f32.mrb[5].mxu1 }
 0x3c4   : > { %v1531_v22 = vpop.f32.mrb[6].mxu1 }
 0x3c5   : > { %v1600_v42 = vadd.f32 %v1583_v21, %v1576_v61  ;;  %v1577_v27 = vmul.f32 0.088388346, %v1531_v22  ;;  %v2585_v20 = vpop.f32.mrb[7].mxu1 }
 0x3c7   : > { %v1601_v37 = vadd.f32 %v1588_v36, %v1577_v27  ;;  %v1605_v53 = vsel %vm1604_vm1, %v1600_v42, -inf }
 0x3c9   : > { %v1606_v44 = vsel %vm1604_vm1, %v1601_v37, -inf }
 0x3ca   : > { %v1607_v13 = vmax.f32 %v1605_v53, %v1606_v44 }
 0x3cc   : > { %v1608_v45 = vrot.slane %v1607_v13, 4 }
 0x3ce   : > { %v1609_v48 = vmax.f32 %v1607_v13, %v1608_v45  ;;  %v2814_v13 = vld [vmem:[%s3562_s18] sm:$0xff]   ;;  %v2815_v45 = vld [vmem:[%s3562_s18 + $0x8] sm:$0xff]  }
 0x3cf   : > { %2622 = vmatprep.subr.bf16.mxu1 %v2814_v13 }
 0x3d0   : > { %v1610_v52 = vrot.slane %v1609_v48, 2 }
 0x3d2   : > { %v1611_v55 = vmax.f32 %v1609_v48, %v1610_v52  ;;  %v2816_v48 = vld [vmem:[%s3562_s18 + $0x10] sm:$0xff]   ;;  %v2817_v52 = vld [vmem:[%s3562_s18 + $0x18] sm:$0xff]  }
 0x3d4   : > { %v1612_v56 = vrot.slane %v1611_v55, 1 }
 0x3d6   : > { %v1613_v58 = vmax.f32 %v1611_v55, %v1612_v56  ;;  %v2818_v55 = vld [vmem:[%s3562_s18 + $0x20] sm:$0xff]   ;;  %v2819_v56 = vld [vmem:[%s3562_s18 + $0x28] sm:$0xff]  }
 0x3d8   : > { %v1623_v62 = vsub.f32 %v1600_v42, %v1613_v58  ;;  %v1624_v57 = vsub.f32 %v1601_v37, %v1613_v58  ;;  %v2820_v58 = vld [vmem:[%s3562_s18 + $0x30] sm:$0xff]  }
 0x3da   : > { %v1627_v63 = vmul.f32 1.442695, %v1623_v62  ;;  %v1629_v0 = vmul.f32 1.442695, %v1624_v57  ;;  %v2821_v62 = vld [vmem:[%s3562_s18 + $0x38] sm:$0xff]   ;;  %s3187_s18 = smov [#allocation13]  }
 0x3dc   : > { %2866 = vpow2.f32 %v1627_v63 }
 0x3dd   : > { %2868 = vpow2.f32 %v1629_v0 }
 0x3e2   : > { %v1569_v51 = vpop.f32.mrb[8].mxu1 }
 0x3e3   : > { %v1578_v43 = vmul.f32 0.088388346, %v1569_v51  ;;  %v2596_v1 = vpop.f32.mrb[9].mxu1 }
 0x3e4   : > { %v1572_v4 = vpop.f32.mrb[10].mxu1 }
 0x3e5   : > { %v1602_v5 = vadd.f32 %v1593_v47, %v1578_v43  ;;  %v1579_v7 = vmul.f32 0.088388346, %v1572_v4  ;;  %v2597_v6 = vpop.f32.mrb[11].mxu1 }
 0x3e6   : > { %v2867_v54 = vpop.eup %2866  ;;  %v2822_v6 = vld [vmem:[%s3564_s10] sm:$0xff]  }
 0x3e7   : > { %v2869_v9 = vpop.eup %2868  ;;  %v1635_v14 = vsel %vm1604_vm1, %v2867_v54, 0.0  ;;  %v1603_v59 = vadd.f32 %v1598_v8, %v1579_v7  ;;  %v1614_v31 = vsel %vm1604_vm1, %v1602_v5, -inf  ;;  %2642 = vmatprep.subr.bf16.mxu0 %v2822_v6  ;;  %v2824_v8 = vld [vmem:[%s3564_s10 + $0x10] sm:$0xff]  }
 0x3e8   : > { %v1636_v15 = vsel %vm1604_vm1, %v2869_v9, 0.0 }
 0x3e9   : > { %v1637_v16 = vadd.f32 %v1636_v15, %v1635_v14  ;;  %v1615_v19 = vsel %vm1604_vm1, %v1603_v59, -inf  ;;  %v2826_v14 = vld [vmem:[%s3564_s10 + $0x20] sm:$0xff]   ;;  %v2828_v15 = vld [vmem:[%s3564_s10 + $0x30] sm:$0xff]  }
 0x3ea   : > { %v1616_v50 = vmax.f32 %v1614_v31, %v1615_v19  ;;  %v689_v19 = vld [vmem:[%s3575_s29 + $0x3] ss:$0 sm:$0xff] }
 0x3eb   : > { %v1638_v3 = vrot.slane %v1637_v16, 4 }
 0x3ec   : > { %v1617_v12 = vrot.slane %v1616_v50, 4 }
 0x3ed   : > { %v1639_v23 = vadd.f32 %v1638_v3, %v1637_v16  ;;  %v2829_v16 = vld [vmem:[%s3564_s10 + $0x38] sm:$0xff]  }
 0x3ee   : > { %v1618_v24 = vmax.f32 %v1616_v50, %v1617_v12 }
 0x3ef   : > { %v1640_v35 = vrot.slane %v1639_v23, 2 }
 0x3f0   : > { %v1619_v25 = vrot.slane %v1618_v24, 2 }
 0x3f1   : > { %v1641_v26 = vadd.f32 %v1640_v35, %v1639_v23 }
 0x3f2   : > { %v1620_v29 = vmax.f32 %v1618_v24, %v1619_v25 }
 0x3f3   : > { %v1642_v30 = vrot.slane %v1641_v26, 1 }
 0x3f4   : > { %v1621_v2 = vrot.slane %v1620_v29, 1 }
 0x3f5   : > { %v1643_v32 = vadd.f32 %v1642_v30, %v1641_v26 }
 0x3f6   : > { %v1622_v33 = vmax.f32 %v1620_v29, %v1621_v2 }
 0x3f7   : > { %2870 = vrcp.f32 %v1643_v32 }
 0x3f8   : > { %v1625_v28 = vsub.f32 %v1602_v5, %v1622_v33  ;;  %v1626_v34 = vsub.f32 %v1603_v59, %v1622_v33  ;;  %v2827_v59 = vld [vmem:[%s3564_s10 + $0x28] sm:$0xff]  }
 0x3fa   : > { %v1631_v38 = vmul.f32 1.442695, %v1625_v28  ;;  %v1633_v39 = vmul.f32 1.442695, %v1626_v34 }
 0x3fc   : > { %2872 = vpow2.f32 %v1631_v38 }
 0x3fd   : > { %2874 = vpow2.f32 %v1633_v39 }
 0x401   : > { %v2871_v40 = vpop.eup %2870 }
 0x402   : > { %v1655_v41 = vmul.f32 %v2871_v40, %v2867_v54  ;;  %v1656_v17 = vmul.f32 %v2871_v40, %v2869_v9  ;;  %v2823_v54 = vld [vmem:[%s3564_s10 + $0x8] sm:$0xff]   ;;  %v2825_v9 = vld [vmem:[%s3564_s10 + $0x18] sm:$0xff]   ;;  %s2134_s10 = sshll.u32 %s3187_s18, 4  ;;  %s2135_s10 = int_to_ptr.vmem [resolvable:$true] %s2134_s10 }
 0x403   : > { %p3087_p1 = scmp.lt.s32.totalorder %s2135_s10, %s2135_s10 }
 0x404   : > { %v1659_v60 = vpack.c.bf16 %v1656_v17, %v1655_v41 }
 0x406   : > { %v2873_v18 = vpop.eup %2872  ;;  %2607 = vmatmul.mubr.msk.bf16.vlgmr.msra.gmra.mrb[12].mxu1 %vm1604_vm1, %v1659_v60 }
 0x407   : > { %v2875_v46 = vpop.eup %2874  ;;  %v1644_v49 = vsel %vm1604_vm1, %v2873_v18, 0.0  ;;  %2623 = vmatpush3.bf16.msra.mxu1 %v2814_v13 }
 0x408   : > { %v1645_v10 = vsel %vm1604_vm1, %v2875_v46, 0.0  ;;  %2624 = vmatprep.subr.bf16.mxu1 %v2815_v45 }
 0x409   : > { %v1646_v61 = vadd.f32 %v1645_v10, %v1644_v49 }
 0x40b   : > { %v1647_v11 = vrot.slane %v1646_v61, 4  ;;  %2625 = vmatpush3.bf16.msra.mxu1 %v2815_v45 }
 0x40c   : > { %2626 = vmatprep.subr.bf16.mxu1 %v2816_v48 }
 0x40d   : > { %v1648_v21 = vadd.f32 %v1647_v11, %v1646_v61 }
 0x40f   : > { %v1649_v22 = vrot.slane %v1648_v21, 2  ;;  %2627 = vmatpush3.bf16.msra.mxu1 %v2816_v48 }
 0x410   : > { %2628 = vmatprep.subr.bf16.mxu1 %v2817_v52 }
 0x411   : > { %v1650_v42 = vadd.f32 %v1649_v22, %v1648_v21 }
 0x413   : > { %v1651_v27 = vrot.slane %v1650_v42, 1  ;;  %2629 = vmatpush3.bf16.msra.mxu1 %v2817_v52 }
 0x414   : > { %2630 = vmatprep.subr.bf16.mxu1 %v2818_v55 }
 0x415   : > { %v1652_v20 = vadd.f32 %v1651_v27, %v1650_v42 }
 0x417   : > { %2876 = vrcp.f32 %v1652_v20  ;;  %2631 = vmatpush3.bf16.msra.mxu1 %v2818_v55 }
 0x418   : > { %2632 = vmatprep.subr.bf16.mxu1 %v2819_v56 }
 0x41b   : > { %2633 = vmatpush3.bf16.msra.mxu1 %v2819_v56 }
 0x41c   : > { %2634 = vmatprep.subr.bf16.mxu1 %v2820_v58 }
 0x41f   : > { %2635 = vmatpush3.bf16.msra.mxu1 %v2820_v58 }
 0x420   : > { %2636 = vmatprep.subr.bf16.mxu1 %v2821_v62 }
 0x421   : > { %v2877_v36 = vpop.eup %2876 }
 0x422   : > { %v1658_v37 = vmul.f32 %v2877_v36, %v2875_v46  ;;  %v1657_v53 = vmul.f32 %v2877_v36, %v2873_v18 }
 0x423   : > { %2637 = vmatpush3.bf16.msra.mxu1 %v2821_v62 }
 0x424   : > { %v1660_v44 = vpack.c.bf16 %v1658_v37, %v1657_v53 }
 0x426   : > { %2619 = vmatmul.mubr.msk.bf16.vlgmr.msra.gmra.mrb[48].mxu0 %vm1604_vm1, %v1660_v44 }
 0x427   : > { %2643 = vmatpush3.bf16.msra.mxu0 %v2822_v6 }
 0x428   : > { %2644 = vmatprep.subr.bf16.mxu0 %v2823_v54 }
 0x42b   : > { %2645 = vmatpush3.bf16.msra.mxu0 %v2823_v54  ;;  %v2898_v54 = vld [vmem:[#allocation13 + $0x18] sm:$0xff] }
 0x42c   : > { %2646 = vmatprep.subr.bf16.mxu0 %v2824_v8 }
 0x42f   : > { %2647 = vmatpush3.bf16.msra.mxu0 %v2824_v8 }
 0x430   : > { %2648 = vmatprep.subr.bf16.mxu0 %v2825_v9 }
 0x433   : > { %2649 = vmatpush3.bf16.msra.mxu0 %v2825_v9  ;;  %v2899_v9 = vld [vmem:[#allocation13 + $0x10] sm:$0xff] }
 0x434   : > { %2650 = vmatprep.subr.bf16.mxu0 %v2826_v14 }
 0x437   : > { %2651 = vmatpush3.bf16.msra.mxu0 %v2826_v14 }
 0x438   : > { %2652 = vmatprep.subr.bf16.mxu0 %v2827_v59 }
 0x43b   : > { %2653 = vmatpush3.bf16.msra.mxu0 %v2827_v59  ;;  %v2900_v59 = vld [vmem:[#allocation13] sm:$0xff] }
 0x43c   : > { %2654 = vmatprep.subr.bf16.mxu0 %v2828_v15 }
 0x43f   : > { %2655 = vmatpush3.bf16.msra.mxu0 %v2828_v15 }
 0x440   : > { %2656 = vmatprep.subr.bf16.mxu0 %v2829_v16 }
 0x443   : > { %2657 = vmatpush3.bf16.msra.mxu0 %v2829_v16  ;;  %v2901_v16 = vld [vmem:[#allocation13 + $0x8] sm:$0xff] }
 0x4d9   : > { %v1698_v57 = vpop.f32.mrb[12].mxu1 }
 0x4da   : > { %v2608_v63 = vpop.f32.mrb[13].mxu1 }
 0x4db   : > { %v1701_v0 = vpop.f32.mrb[14].mxu1 }
 0x4dc   : > { %v1749_v51 = vpack.c.bf16 %v1701_v0, %v1698_v57  ;;  %v2609_v43 = vpop.f32.mrb[15].mxu1 }
 0x4de   : > { %2638 = vmatprep.mubr.bf16.mxu1 %v1749_v51 }
 0x4f9   : > { %v1742_v1 = vpop.f32.mrb[48].mxu0 }
 0x4fa   : > { %v2620_v47 = vpop.f32.mrb[49].mxu0 }
 0x4fb   : > { %v1745_v4 = vpop.f32.mrb[50].mxu0 }
 0x4fc   : > { %v1750_v5 = vpack.c.bf16 %v1745_v4, %v1742_v1  ;;  %v2621_v7 = vpop.f32.mrb[51].mxu0 }
 0x4fe   : > { %2639 = vmatmul.mubr.bf16.vlgmr.msra.gmra.mrb[16].mxu1 %v1750_v5 }
 0x5d1   : > { %v2640_v31 = vpop.f32.mrb[16].mxu1 }
 0x5d2   : > { %v1849_v50 = vpop.f32.mrb[17].mxu1  ;;  %v1858_v12 = vadd.f32 %v2640_v31, %v689_v19 }
 0x5d3   : > { %v2641_v3 = vpop.f32.mrb[18].mxu1  ;;  %v1850_v35 = vadd.f32 %v1849_v50, %v689_v19 }
 0x5d4   : > { %v1861_v23 = vadd.f32 %v2641_v3, %v689_v19  ;;  %v1852_v24 = vpop.f32.mrb[19].mxu1  ;;  %v690_v3 = vld [vmem:[%s3575_s29 + $0x4] ss:$0 sm:$0xff] }
 0x5d5   : > { %v1853_v25 = vadd.f32 %v1852_v24, %v689_v19 }
 0x5d6   : > { %v1871_v26 = vadd.f32 %v1861_v23, %v1858_v12 }
 0x5d7   : > { %v1864_v29 = vadd.f32 %v1853_v25, %v1850_v35 }
 0x5d8   : > { %v1872_v30 = vrot.slane %v1871_v26, 4 }
 0x5d9   : > { %v1865_v2 = vrot.slane %v1864_v29, 4 }
 0x5da   : > { %v1873_v32 = vadd.f32 %v1872_v30, %v1871_v26 }
 0x5db   : > { %v1866_v33 = vadd.f32 %v1865_v2, %v1864_v29 }
 0x5dc   : > { %v1874_v28 = vrot.slane %v1873_v32, 2 }
 0x5dd   : > { %v1867_v34 = vrot.slane %v1866_v33, 2 }
 0x5de   : > { %v1875_v38 = vadd.f32 %v1874_v28, %v1873_v32 }
 0x5df   : > { %v1868_v39 = vadd.f32 %v1867_v34, %v1866_v33 }
 0x5e0   : > { %v1876_v40 = vrot.slane %v1875_v38, 1 }
 0x5e1   : > { %v1869_v41 = vrot.slane %v1868_v39, 1 }
 0x5e2   : > { %v1877_v17 = vadd.f32 %v1876_v40, %v1875_v38 }
 0x5e3   : > { %v1870_v60 = vadd.f32 %v1869_v41, %v1868_v39 }
 0x5e4   : > { %v1879_v18 = vmul.f32 0.0625, %v1877_v17 }
 0x5e5   : > { %v1878_v46 = vmul.f32 0.0625, %v1870_v60 }
 0x5e6   : > { %v1882_v49 = vsub.f32 %v1858_v12, %v1879_v18  ;;  %v1883_v10 = vsub.f32 %v1861_v23, %v1879_v18 }
 0x5e7   : > { %v1880_v61 = vsub.f32 %v1850_v35, %v1878_v46  ;;  %v1881_v11 = vsub.f32 %v1853_v25, %v1878_v46 }
 0x5e8   : > { %v1886_v21 = vmul.f32 %v1882_v49, %v1882_v49  ;;  %v1887_v22 = vmul.f32 %v1883_v10, %v1883_v10 }
 0x5e9   : > { %v1884_v42 = vmul.f32 %v1880_v61, %v1880_v61  ;;  %v1885_v27 = vmul.f32 %v1881_v11, %v1881_v11 }
 0x5ea   : > { %v1895_v20 = vadd.f32 %v1887_v22, %v1886_v21 }
 0x5eb   : > { %v1888_v36 = vadd.f32 %v1885_v27, %v1884_v42 }
 0x5ec   : > { %v1896_v37 = vrot.slane %v1895_v20, 4 }
 0x5ed   : > { %v1889_v53 = vrot.slane %v1888_v36, 4 }
 0x5ee   : > { %v1897_v44 = vadd.f32 %v1896_v37, %v1895_v20 }
 0x5ef   : > { %v1890_v13 = vadd.f32 %v1889_v53, %v1888_v36 }
 0x5f0   : > { %v1898_v45 = vrot.slane %v1897_v44, 2 }
 0x5f1   : > { %v1891_v48 = vrot.slane %v1890_v13, 2 }
 0x5f2   : > { %v1899_v52 = vadd.f32 %v1898_v45, %v1897_v44 }
 0x5f3   : > { %v1892_v55 = vadd.f32 %v1891_v48, %v1890_v13 }
 0x5f4   : > { %v1900_v56 = vrot.slane %v1899_v52, 1 }
 0x5f5   : > { %v1893_v58 = vrot.slane %v1892_v55, 1 }
 0x5f6   : > { %v1901_v62 = vadd.f32 %v1900_v56, %v1899_v52 }
 0x5f7   : > { %v1894_v57 = vadd.f32 %v1893_v58, %v1892_v55 }
 0x5f8   : > { %v1903_v63 = vmul.f32 0.0625, %v1901_v62 }
 0x5f9   : > { %v1902_v0 = vmul.f32 0.0625, %v1894_v57 }
 0x5fa   : > { %v1905_v51 = vadd.f32 1e-05, %v1903_v63 }
 0x5fb   : > { %v1904_v43 = vadd.f32 1e-05, %v1902_v0 }
 0x5fc   : > { %2878 = vrsqrt.f32 %v1905_v51 }
 0x5fd   : > { %2880 = vrsqrt.f32 %v1904_v43 }
 0x606   : > { %v2879_v1 = vpop.eup %2878 }
 0x607   : > { %v2881_v47 = vpop.eup %2880  ;;  %v1910_v4 = vmul.f32 %v2879_v1, %v1882_v49  ;;  %v1911_v5 = vmul.f32 %v2879_v1, %v1883_v10 }
 0x608   : > { %v1909_v7 = vmul.f32 %v2881_v47, %v1881_v11  ;;  %v1908_v6 = vmul.f32 %v2881_v47, %v1880_v61 }
 0x609   : > { %v1915_v8 = vmul.f32 %v2898_v54, %v1911_v5  ;;  %v1914_v14 = vmul.f32 %v2899_v9, %v1910_v4 }
 0x60a   : > { %v1912_v15 = vmul.f32 %v2900_v59, %v1908_v6  ;;  %v1913_v31 = vmul.f32 %v2901_v16, %v1909_v7 }
 0x60b   : > { %v1917_v19 = vpack.c.bf16 %v1915_v8, %v1914_v14 }
 0x60c   : > { %v1916_v50 = vpack.c.bf16 %v1913_v31, %v1912_v15 }
 0x60e   : > { %2658 = vmatprep.mubr.bf16.mxu0 %v1916_v50 }
 0x60f   : > { %2659 = vmatmul.mubr.bf16.vlgmr.msra.gmra.mrb[52].mxu0 %v1917_v19 }
 0x6e2   : > { %v2660_v12 = vpop.f32.mrb[52].mxu0 }
 0x6e3   : > { %v2025_v23 = vadd.f32 %v2660_v12, %v690_v3  ;;  %v2016_v24 = vpop.f32.mrb[53].mxu0 }
 0x6e4   : > { %v2017_v35 = vadd.f32 %v2016_v24, %v690_v3  ;;  %v2661_v25 = vpop.f32.mrb[54].mxu0 }
 0x6e5   : > { %v2037_v26 = vmul.f32 %v2025_v23, %v2025_v23  ;;  %v2028_v29 = vadd.f32 %v2661_v25, %v690_v3  ;;  %v2019_v30 = vpop.f32.mrb[55].mxu0  ;;  %v2033_v56 = vmul.f32 0.5, %v2025_v23 }
 0x6e6   : > { %v2035_v2 = vmul.f32 %v2017_v35, %v2017_v35  ;;  %v2020_v32 = vadd.f32 %v2019_v30, %v690_v3  ;;  %v2031_v36 = vmul.f32 0.5, %v2017_v35 }
 0x6e7   : > { %v2041_v33 = vmul.f32 %v2037_v26, %v2025_v23  ;;  %v2038_v28 = vmul.f32 %v2028_v29, %v2028_v29  ;;  %v2034_v57 = vmul.f32 0.5, %v2028_v29 }
 0x6e8   : > { %v2039_v34 = vmul.f32 %v2035_v2, %v2017_v35  ;;  %v2036_v38 = vmul.f32 %v2020_v32, %v2020_v32  ;;  %v2032_v13 = vmul.f32 0.5, %v2020_v32 }
 0x6e9   : > { %v2045_v39 = vmul.f32 0.044715, %v2041_v33  ;;  %v2042_v40 = vmul.f32 %v2038_v28, %v2028_v29 }
 0x6ea   : > { %v2043_v41 = vmul.f32 0.044715, %v2039_v34  ;;  %v2040_v17 = vmul.f32 %v2036_v38, %v2020_v32  ;;  %v692_v34 = vld [vmem:[%s3575_s29 + $0x6] ss:$0 sm:$0xff] }
 0x6eb   : > { %v2046_v60 = vmul.f32 0.044715, %v2042_v40  ;;  %v2049_v18 = vadd.f32 %v2045_v39, %v2025_v23 }
 0x6ec   : > { %v2044_v46 = vmul.f32 0.044715, %v2040_v17  ;;  %v2047_v49 = vadd.f32 %v2043_v41, %v2017_v35 }
 0x6ed   : > { %v2053_v10 = vmul.f32 0.7978846, %v2049_v18  ;;  %v2050_v61 = vadd.f32 %v2046_v60, %v2028_v29 }
 0x6ee   : > { %v2051_v11 = vmul.f32 0.7978846, %v2047_v49  ;;  %v2048_v21 = vadd.f32 %v2044_v46, %v2020_v32  ;;  %v691_v32 = vld [vmem:[%s3575_s29 + $0x5] ss:$0 sm:$0xff]  ;;  %s3080_s29 = scalar_lea.vmem %s2135_s10, 512 }
 0x6ef   : > { %2882 = vtanh.f32 %v2053_v10  ;;  %v2054_v42 = vmul.f32 0.7978846, %v2050_v61  ;;  %p3081_p6 = scmp.ne.s32.totalorder %s2135_s10, %s3080_s29  ;;  %p3088_p4 = scmp.lt.s32.totalorder %s3080_s29, %s3080_s29 }
 0x6f0   : > { %2884 = vtanh.f32 %v2051_v11  ;;  %v2052_v22 = vmul.f32 0.7978846, %v2048_v21 }
 0x6f1   : > { %p3082_p3 = pnand %p3081_p6, %p2703_p0  ;;  %p3089_p5 = por %p3088_p4, %p3087_p1 }
 0x6f2   : > { %2886 = vtanh.f32 %v2052_v22 }
 0x6f3   : > { %2888 = vtanh.f32 %v2054_v42  ;;  %p3083_p12 = pneg %p3082_p3 }
 0x6f5   : > { %p3090_p11 = pnand %p3089_p5, %p3083_p12 }
 0x6f9   : > { %v2883_v27 = vpop.eup %2882 }
 0x6fa   : > { %v2885_v20 = vpop.eup %2884  ;;  %v2061_v48 = vadd.f32 1.0, %v2883_v27 }
 0x6fb   : > { %v2059_v37 = vadd.f32 1.0, %v2885_v20 }
 0x6fc   : > { %v2887_v53 = vpop.eup %2886  ;;  %v2065_v58 = vmul.f32 %v2061_v48, %v2033_v56 }
 0x6fd   : > { %v2063_v44 = vmul.f32 %v2059_v37, %v2031_v36  ;;  %v2060_v45 = vadd.f32 1.0, %v2887_v53  ;;  %v2889_v52 = vpop.eup %2888 }
 0x6fe   : > { %v2062_v62 = vadd.f32 1.0, %v2889_v52 }
 0x6ff   : > { %2067 = vadd.xlane.f32.xlu0 %v2063_v44  ;;  %v2064_v55 = vmul.f32 %v2060_v45, %v2032_v13 }
 0x700   : > { %v2066_v63 = vmul.f32 %v2062_v62, %v2034_v57 }
 0x701   : > { %2069 = vadd.xlane.f32.xlu1 %v2064_v55 }
 0x703   : > { %2071 = vadd.xlane.f32.xlu0 %v2065_v58 }
 0x707   : > { %2073 = vadd.xlane.f32.xlu0 %v2066_v63 }
 0x78c   : > { %v2068_v0 = vpop.xlane.xlu0 %2067 }
 0x78d   : > { %v2076_v51 = vmul.f32 0.0078125, %v2068_v0 }
 0x78e   : > { %v2070_v43 = vpop.xlane.xlu1 %2069 }
 0x78f   : > { %v2080_v1 = vsub.f32 %v2063_v44, %v2076_v51  ;;  %v2077_v47 = vmul.f32 0.0078125, %v2070_v43 }
 0x790   : > { %v2072_v4 = vpop.xlane.xlu0 %2071 }
 0x791   : > { %v2081_v5 = vsub.f32 %v2064_v55, %v2077_v47  ;;  %v2078_v7 = vmul.f32 0.0078125, %v2072_v4  ;;  %v2084_v6 = vmul.f32 %v2080_v1, %v2080_v1 }
 0x793   : > { %v2082_v54 = vsub.f32 %v2065_v58, %v2078_v7  ;;  %2088 = vadd.xlane.f32.xlu1 %v2084_v6  ;;  %v2085_v8 = vmul.f32 %v2081_v5, %v2081_v5 }
 0x794   : > { %v2074_v9 = vpop.xlane.xlu0 %2073 }
 0x795   : > { %v2079_v14 = vmul.f32 0.0078125, %v2074_v9  ;;  %2090 = vadd.xlane.f32.xlu0 %v2085_v8  ;;  %v2086_v59 = vmul.f32 %v2082_v54, %v2082_v54 }
 0x797   : > { %v2083_v15 = vsub.f32 %v2066_v63, %v2079_v14  ;;  %2092 = vadd.xlane.f32.xlu1 %v2086_v59 }
 0x799   : > { %v2087_v16 = vmul.f32 %v2083_v15, %v2083_v15 }
 0x79b   : > { %2094 = vadd.xlane.f32.xlu0 %v2087_v16 }
 0x820   : > { %v2089_v31 = vpop.xlane.xlu1 %2088 }
 0x821   : > { %v2096_v19 = vmul.f32 0.0078125, %v2089_v31 }
 0x822   : > { %v2091_v50 = vpop.xlane.xlu0 %2090 }
 0x823   : > { %v2100_v3 = vadd.f32 1e-05, %v2096_v19  ;;  %v2097_v12 = vmul.f32 0.0078125, %v2091_v50 }
 0x824   : > { %v2093_v23 = vpop.xlane.xlu1 %2092 }
 0x825   : > { %2890 = vrsqrt.f32 %v2100_v3  ;;  %v2101_v24 = vadd.f32 1e-05, %v2097_v12  ;;  %v2098_v35 = vmul.f32 0.0078125, %v2093_v23 }
 0x827   : > { %2892 = vrsqrt.f32 %v2101_v24  ;;  %v2102_v25 = vadd.f32 1e-05, %v2098_v35 }
 0x828   : > { %v2095_v26 = vpop.xlane.xlu0 %2094 }
 0x829   : > { %2894 = vrsqrt.f32 %v2102_v25  ;;  %v2099_v29 = vmul.f32 0.0078125, %v2095_v26 }
 0x82b   : > { %v2103_v30 = vadd.f32 1e-05, %v2099_v29 }
 0x82d   : > { %2896 = vrsqrt.f32 %v2103_v30 }
 0x82f   : > { %v2891_v2 = vpop.eup %2890 }
 0x830   : > { %v2108_v33 = vmul.f32 %v2891_v2, %v2080_v1 }
 0x831   : > { %v2893_v28 = vpop.eup %2892 }
 0x832   : > { %v2112_v38 = vmul.f32 %v2108_v33, %v691_v32  ;;  %v2109_v39 = vmul.f32 %v2893_v28, %v2081_v5 }
 0x833   : > { %v2895_v40 = vpop.eup %2894 }
 0x834   : > { %v2116_v41 = vadd.f32 %v2112_v38, %v692_v34  ;;  %v2113_v17 = vmul.f32 %v2109_v39, %v691_v32  ;;  %v2110_v60 = vmul.f32 %v2895_v40, %v2082_v54 }
 0x836   : > { %2120 = vst [vmem:[#allocation13] sm:$0xff] %v2116_v41  ;;  %v2117_v18 = vadd.f32 %v2113_v17, %v692_v34  ;;  %v2114_v46 = vmul.f32 %v2110_v60, %v691_v32 }
 0x837   : > { %v2897_v49 = vpop.eup %2896 }
 0x838   : > { %2121 = vst [vmem:[#allocation13 + $0x8] sm:$0xff] %v2117_v18  ;;  %v2118_v10 = vadd.f32 %v2114_v46, %v692_v34  ;;  %v2111_v61 = vmul.f32 %v2897_v49, %v2083_v15 }
 0x83a   : > { %2122 = vst [vmem:[#allocation13 + $0x10] sm:$0xff] %v2118_v10  ;;  %v2115_v11 = vmul.f32 %v2111_v61, %v691_v32 }
 0x83c   : > { %v2119_v21 = vadd.f32 %v2115_v11, %v692_v34 }
 0x83e   : > { %2123 = vst [vmem:[#allocation13 + $0x18] sm:$0xff] %v2119_v21 }
 0x83f   : > { %3093 = shalt.err (!%p3090_p11)
}
 0x840   : > { %s4054_s4 = sld [smem:[#allocation31_spill]] }
 0x846   : > { %s3094_s1 = scalar_lea.hbm %s4054_s4, 512 }
 0x847   : > { %p3095_p8 = scmp.ne.s32.totalorder %s4054_s4, %s3094_s1  ;;  %p3100_p13 = scmp.lt.u32.totalorder %s3094_s1, %s4054_s4 }
 0x849   : > { %p3096_p7 = pnand %p3095_p8, %p2703_p0 }
 0x84b   : > { %p3097_p10 = pneg %p3096_p7 }
 0x84d   : > { %p3102_p9 = pnand %p3100_p13, %p3097_p10 }
 0x84f   : > { %3105 = shalt.err (!%p3102_p9)
}
 0x850   : > { %s3188_s16 = smov 128   ;;  %s3189_s19 = smov 8  }
 0x851   : > { %2677 = dma.vmem_to_hbm [thread:$0]  (%p2703_p0), %s2135_s10, 512, %s4054_s4, [#allocation4], %s3188_s16, %s3188_s16, %s3189_s19  }
 0x852   : > { %3147 = dma.done.wait (%p2703_p0), [#allocation4], 512  }
 0x853   : > { %3149 = vsyncadd (%p2703_p0), [#allocation4], 4294966784 }
 0x854 PF: > { %s4055_s25 = sld [smem:[#allocation21_spill]]  ;;  %s4056_s15 = sld [smem:[#allocation19_spill]] }
 0x855   : > { %s4057_s30 = sld [smem:[#allocation23_spill]]  ;;  %s4058_s16 = sld [smem:[#allocation20_spill]] }
 0x856   : > { %s4059_s17 = sld [smem:[#allocation22_spill]]  ;;  %s4060_s13 = smov %s3156_s14 }
 0x85a   : > { %s31_s18 = sadd.s32 1, %s4055_s25   ;;  %s4061_s14 = smov %s4056_s15 }
 0x85b   : > { %p28_p2 = scmp.ge.s32.totalorder %s31_s18, 4   ;;  %s4062_s15 = smov %s4057_s30 }
 0x85d   :  { %30 = sbr.rel (!%p28_p2) target bundleno = 19 (0x13), region = 169 }
 0x864   :  { %2150 = vsyncpa [#allocation3], 1 }
 0x865   :  { %2152 = vsyncpa [#allocation3 + $0x1], 1 }
 0x866   :  { %2153 = vsyncpa [#allocation6], 1 }
 0x867   :  { %2155 = vsyncpa [#allocation6 + $0x1], 1 }
 0x868   :  { %2156 = vsyncpa [#allocation9], 1 }
 0x869   :  { %2158 = vsyncpa [#allocation9 + $0x1], 1 }
 0x86a   :  { %2159 = vsyncpa [#allocation12], 1 }
 0x86b   :  { %2161 = vsyncpa [#allocation12 + $0x1], 1 }
 0x86c   :  { %2162 = vsyncpa [#allocation4], 1 }
 0x86d   :  { %2164 = vsyncpa [#allocation4 + $0x1], 1 }

// kernel: tpu_custom_call.1
= control target key start
LH: loop header
LB: loop body
LE: loop exit
PB: predicated region body
PF: predicated region fallthrough
CT: control target
= control target key end

     0   :  { %s3982_s0 = inlined_call_operand.hbm [shape: f32[2,16,128], index: 0, kind: input, shape index: {}]   ;;  %s3983_s1 = inlined_call_operand.vmem [shape: bf16[2,64,128], index: 1, kind: input, shape index: {}]   ;;  %s3984_s2 = inlined_call_operand.vmem [shape: f32[2,16,1], index: 2, kind: input, shape index: {}]   ;;  %s3985_s3 = inlined_call_operand.vmem [shape: f32[2,16,1], index: 3, kind: input, shape index: {}]   ;;  %s3986_s4 = inlined_call_operand.hbm [shape: bf16[2,128,128], index: 4, kind: input, shape index: {}]   ;;  %s3987_s5 = inlined_call_operand.hbm [shape: bf16[2,128,128], index: 5, kind: input, shape index: {}]   ;;  %s3988_s6 = inlined_call_operand.hbm [shape: bf16[2,128,256], index: 6, kind: input, shape index: {}]   ;;  %s3989_s7 = inlined_call_operand.hbm [shape: bf16[2,128,128], index: 7, kind: input, shape index: {}]   ;;  %s3990_s8 = inlined_call_operand.hbm [shape: bf16[2,128,128], index: 8, kind: input, shape index: {}]   ;;  %s3991_s9 = inlined_call_operand.vmem [shape: f32[2,8,256], index: 9, kind: input, shape index: {}]   ;;  %s3992_s10 = inlined_call_operand.hbm [shape: f32[2,16,128], index: 10, kind: output, shape index: {}]  }
   0x1   :  { %4016 = sst [smem:[#allocation24_spill]] %s3983_s1 }
   0x2   :  { %4017 = sst [smem:[#allocation25_spill]] %s3984_s2 }
   0x3   :  { %4018 = sst [smem:[#allocation26_spill]] %s3985_s3 }
   0x4   :  { %4019 = sst [smem:[#allocation27_spill]] %s3986_s4 }
   0x5   :  { %4020 = sst [smem:[#allocation28_spill]] %s3987_s5 }
   0x6   :  { %4021 = sst [smem:[#allocation29_spill]] %s3988_s6 }
   0x7   :  { %4022 = sst [smem:[#allocation30_spill]] %s3991_s9 }
   0x8   :  { %4023 = sst [smem:[#allocation31_spill]] %s3992_s10 }
   0x9   :  { %15 = vsyncpa [#allocation3], 0 }
   0xa   :  { %16 = vsyncpa [#allocation6], 0 }
   0xb   :  { %18 = vsyncpa [#allocation6 + $0x1], 0 }
   0xc   :  { %19 = vsyncpa [#allocation9], 0 }
   0xd   :  { %21 = vsyncpa [#allocation9 + $0x1], 0 }
   0xe   :  { %22 = vsyncpa [#allocation12], 0 }
   0xf   :  { %24 = vsyncpa [#allocation12 + $0x1], 0 }
  0x10   :  { %25 = vsyncpa [#allocation4], 0  ;;  %s3245_s13 = smov 0   ;;  %s3247_s14 = smov 0  }
  0x11   :  { %s3249_s15 = smov 0   ;;  %s3251_s16 = smov 0  }
  0x12   :  { %s3253_s17 = smov 0   ;;  %s3255_s18 = smov 0  }
  0x13 LB: > { %4024 = sst [smem:[#allocation19_spill]] %s3160_s15  ;;  %s40_s19 = sadd.s32 1, %s3168_s17  ;;  %s3172_s18 = sphi %s3255_s18, %s31_s18   ;;  %s3168_s17 = sphi %s3253_s17, %s4059_s17   ;;  %s3164_s16 = sphi %s3251_s16, %s4058_s16   ;;  %s3160_s15 = sphi %s3249_s15, %s4062_s15   ;;  %s3156_s14 = sphi %s3247_s14, %s4061_s14   ;;  %s3152_s13 = sphi %s3245_s13, %s4060_s13  }
  0x14   : > { %4025 = sst [smem:[#allocation20_spill]] %s3168_s17  ;;  %s154_s20 = sadd.s32 1, %s3160_s15 }
  0x15   : > { %4026 = sst [smem:[#allocation21_spill]] %s3172_s18  ;;  %p41_p0 = scmp.ge.s32.totalorder %s40_s19, 2 }
  0x16   : > { %p161_p1 = scmp.ne.s32.totalorder %s3160_s15, %s3156_s14  ;;  %p162_p2 = scmp.eq.s32.totalorder %s3172_s18, 0 }
  0x17   : > { %s4064_s19 = smov (%p41_p0, %s40_s19), 0  ;;  %p2701_p4 = scmp.lt.s32.totalorder %s3172_s18, 2 }
  0x18   : > { %4027 = sst [smem:[#allocation22_spill]] %s4064_s19  ;;  %p163_p3 = por %p162_p2, %p161_p1 }
  0x19   : > { %s151_s21 = ssub.s32 %s3168_s17, %s4064_s19  ;;  %s3995_s22 = sand.u32 1, %s3172_s18  }
  0x1a   : > { %p152_p5 = scmp.eq.s32.totalorder %s151_s21, 0  ;;  %s3287_s23 = sand.u32 1, %s3160_s15  }
  0x1b   : > { %s3290_s24 = sshll.u32 %s3168_s17, 10  ;;  %s3296_s26 = sshll.u32 %s3287_s23, 6 }
  0x1c   : > { %s3293_s25 = scalar_select %p152_p5, %s3160_s15, %s154_s20  }
  0x1d   : > { %s4029_s4 = sld [smem:[#allocation27_spill]]  ;;  %p3304_p6 = pnand %p2701_p4, %p163_p3 }
  0x1e   : > { %4028 = sst [smem:[#allocation23_spill]] %s3293_s25  ;;  %s398_s11 = scalar_lea.vmem [#allocation5], %s3296_s26 }
  0x1f   : > { %s4030_s30 = scalar_select %p3304_p6, 1, 0 }
  0x20   : > { %s405_s12 = sshll.u32 %s398_s11, 4  ;;  %s3313_s20 = scalar_lea.sflag [#allocation6], %s3995_s22  ;;  %s3309_s12 = int_to_ptr.vmem [resolvable:$true] %s405_s12 }
  0x21   : > { %p3319_p8 = pneg %p3304_p6 }
  0x23   : > { %s3302_s29 = scalar_lea.hbm %s4029_s4, %s3290_s24  ;;  %s2907_s11 = scalar_lea.hbm %s4029_s4, 2048 }
  0x24   : > { %s2902_s21 = scalar_lea.hbm %s3302_s29, 1024  ;;  %p2908_p11 = scmp.lt.u32.totalorder %s3302_s29, %s4029_s4 }
  0x25   : > { %p2903_p7 = scmp.ne.s32.totalorder %s3302_s29, %s2902_s21  ;;  %p2909_p12 = scmp.lt.u32.totalorder %s2907_s11, %s2902_s21 }
  0x26   : > { %s4031_s27 = scalar_select %p3319_p8, 1, 0 }
  0x27   : > { %p2905_p9 = pnand %p3319_p8, %p2903_p7  ;;  %p2910_p13 = por %p2909_p12, %p2908_p11 }
  0x28   : > { %p2911_p0 = scmp.lt.u32.totalorder %s2902_s21, %s3302_s29 }
  0x29   : > { %p2906_p10 = pneg %p2905_p9 }
  0x2a   : > { %p2912_p1 = por %p2911_p0, %p2910_p13 }
  0x2c   : > { %p2913_p2 = pnand %p2912_p1, %p2906_p10 }
  0x2e   : > { %2916 = shalt.err (!%p2913_p2)
}
  0x2f   : > { %s2917_s22 = scalar_lea.vmem %s3309_s12, 1024  ;;  %s3174_s19 = smov [#allocation5]  }
  0x30   : > { %p2918_p3 = scmp.ne.s32.totalorder %s3309_s12, %s2917_s22  ;;  %s2922_s28 = sshll.u32 %s3174_s19, 4  ;;  %s2923_s28 = int_to_ptr.vmem [resolvable:$false] %s2922_s28 }
  0x31   : > { %s2924_s15 = scalar_lea.vmem %s2923_s28, 2048  ;;  %p2925_p7 = scmp.lt.s32.totalorder %s3309_s12, %s2923_s28 }
  0x32   : > { %p2920_p4 = pnand %p2918_p3, %p3319_p8  ;;  %p2926_p9 = scmp.lt.s32.totalorder %s2924_s15, %s2917_s22 }
  0x34   : > { %p2921_p5 = pneg %p2920_p4  ;;  %p2927_p11 = por %p2926_p9, %p2925_p7 }
  0x36   : > { %p2928_p12 = pnand %p2927_p11, %p2921_p5 }
  0x38   : > { %2931 = shalt.err (!%p2928_p12)
}
  0x39   : > { %s4002_s25 = smov 64   ;;  %s4004_s21 = smov 4  }
  0x3a   : > { %2687 = dma.hbm_to_vmem [thread:$0]  (!%p3304_p6), %s3302_s29, 1024, %s3309_s12, %s3313_s20, %s4002_s25, %s4002_s25, %s4004_s21  }
  0x3b   : > { %s2368_s11 = sshll.u32 %s3287_s23, 7  ;;  %s2452_s22 = sshll.u32 %s3168_s17, 11 }
  0x3c   : > { %s4032_s6 = sld [smem:[#allocation29_spill]]  ;;  %s440_s4 = scalar_lea.vmem [#allocation8], %s2368_s11 }
  0x3d   : > { %s447_s10 = sshll.u32 %s440_s4, 4  ;;  %s4033_s3 = sand.u32 1, %s3172_s18   ;;  %s3353_s10 = int_to_ptr.vmem [resolvable:$true] %s447_s10 }
  0x3e   : > { %s3357_s2 = scalar_lea.sflag [#allocation9], %s4033_s3 }
  0x42   : > { %s3351_s15 = scalar_lea.hbm %s4032_s6, %s2452_s22  ;;  %s2937_s22 = scalar_lea.hbm %s4032_s6, 4096 }
  0x43   : > { %s2932_s1 = scalar_lea.hbm %s3351_s15, 2048  ;;  %p2938_p1 = scmp.lt.u32.totalorder %s3351_s15, %s4032_s6 }
  0x44   : > { %p2933_p10 = scmp.ne.s32.totalorder %s3351_s15, %s2932_s1  ;;  %p2939_p2 = scmp.lt.u32.totalorder %s2937_s22, %s2932_s1 }
  0x45   : > { %p2941_p4 = scmp.lt.u32.totalorder %s2932_s1, %s3351_s15 }
  0x46   : > { %p2935_p13 = pnand %p2933_p10, %p3319_p8  ;;  %p2940_p3 = por %p2939_p2, %p2938_p1 }
  0x48   : > { %p2936_p0 = pneg %p2935_p13  ;;  %p2942_p5 = por %p2941_p4, %p2940_p3 }
  0x4a   : > { %p2943_p7 = pnand %p2942_p5, %p2936_p0 }
  0x4c   : > { %2946 = shalt.err (!%p2943_p7)
}
  0x4d   : > { %s2947_s3 = scalar_lea.vmem %s3353_s10, 2048  ;;  %s3177_s4 = smov [#allocation8]  }
  0x4e   : > { %p2948_p9 = scmp.ne.s32.totalorder %s3353_s10, %s2947_s3  ;;  %s2952_s11 = sshll.u32 %s3177_s4, 4  ;;  %s2953_s11 = int_to_ptr.vmem [resolvable:$false] %s2952_s11 }
  0x4f   : > { %s2954_s29 = scalar_lea.vmem %s2953_s11, 4096  ;;  %p2955_p10 = scmp.lt.s32.totalorder %s3353_s10, %s2953_s11 }
  0x50   : > { %p2950_p11 = pnand %p2948_p9, %p3319_p8  ;;  %p2956_p13 = scmp.lt.s32.totalorder %s2954_s29, %s2947_s3 }
  0x52   : > { %p2951_p12 = pneg %p2950_p11  ;;  %p2957_p1 = por %p2956_p13, %p2955_p10 }
  0x54   : > { %p2958_p2 = pnand %p2957_p1, %p2951_p12 }
  0x56   : > { %2961 = shalt.err (!%p2958_p2)
}
  0x57   : > { %s4000_s1 = smov 128   ;;  %s4001_s12 = smov 8  }
  0x58   : > { %2693 = dma.hbm_to_vmem [thread:$0]  (!%p3304_p6), %s3351_s15, 2048, %s3353_s10, %s3357_s2, %s4000_s1, %s4000_s1, %s4001_s12  }
  0x59   : > { %s3385_s22 = sadd.s32 4294967295, %s3172_s18   ;;  %p167_p0 = scmp.ne.s32.totalorder %s3156_s14, %s3152_s13 }
  0x5a   : > { %p4006_p3 = scmp.eq.s32.totalorder %s3385_s22, 0  ;;  %p2356_p4 = scmp.ge.s32.totalorder %s3172_s18, 1 }
  0x5b   : > { %p334_p5 = scmp.lt.s32.totalorder %s3172_s18, 3  ;;  %s3180_s10 = smov [#allocation2]  }
  0x5c   : > { %p3394_p7 = por %p4006_p3, %p167_p0  ;;  %s350_s15 = sshll.u32 %s3180_s10, 4  ;;  %s3402_s15 = int_to_ptr.vmem [resolvable:$true] %s350_s15 }
  0x5d   : > { %p3398_p9 = pnand %p2356_p4, %p334_p5  ;;  %s4036_s5 = sld [smem:[#allocation28_spill]] }
  0x5e   : > { %s4034_s19 = scalar_select %p3394_p7, 1, 0 }
  0x5f   : > { %s4035_s28 = scalar_select %p3398_p9, 1, 0 }
  0x60   : > { %p2680_p11 = pneg %p3398_p9  ;;  %s419_s11 = scalar_lea.vmem [#allocation7], %s3296_s26 }
  0x61   : > { %s426_s29 = sshll.u32 %s419_s11, 4  ;;  %s3419_s29 = int_to_ptr.vmem [resolvable:$true] %s426_s29 }
  0x62   : > { %p3415_p12 = pnand %p2680_p11, %p4006_p3 }
  0x63   : > { %s3410_s4 = scalar_lea.hbm %s4036_s5, %s3290_s24  ;;  %s2967_s12 = scalar_lea.hbm %s4036_s5, 2048 }
  0x64   : > { %s4037_s1 = scalar_select %p3415_p12, 1, 0 }
  0x65   : > { %s2962_s10 = scalar_lea.hbm %s3410_s4, 1024  ;;  %p2968_p2 = scmp.lt.u32.totalorder %s3410_s4, %s4036_s5 }
  0x66   : > { %p2963_p10 = scmp.ne.s32.totalorder %s3410_s4, %s2962_s10  ;;  %p2969_p0 = scmp.lt.u32.totalorder %s2967_s12, %s2962_s10 }
  0x67   : > { %p2971_p5 = scmp.lt.u32.totalorder %s2962_s10, %s3410_s4 }
  0x68   : > { %p2965_p13 = pnand %p2963_p10, %p3319_p8  ;;  %p2970_p4 = por %p2969_p0, %p2968_p2 }
  0x6a   : > { %p2966_p1 = pneg %p2965_p13  ;;  %p2972_p11 = por %p2971_p5, %p2970_p4 }
  0x6c   : > { %p2973_p3 = pnand %p2972_p11, %p2966_p1 }
  0x6e   : > { %2976 = shalt.err (!%p2973_p3)
}
  0x6f   : > { %s2977_s11 = scalar_lea.vmem %s3419_s29, 1024  ;;  %s3181_s13 = smov [#allocation7]  }
  0x70   : > { %p2978_p10 = scmp.ne.s32.totalorder %s3419_s29, %s2977_s11  ;;  %s2982_s3 = sshll.u32 %s3181_s13, 4  ;;  %s2983_s3 = int_to_ptr.vmem [resolvable:$false] %s2982_s3 }
  0x71   : > { %s2984_s25 = scalar_lea.vmem %s2983_s3, 2048  ;;  %p2985_p9 = scmp.lt.s32.totalorder %s3419_s29, %s2983_s3 }
  0x72   : > { %p2980_p13 = pnand %p2978_p10, %p3319_p8  ;;  %p2986_p12 = scmp.lt.s32.totalorder %s2984_s25, %s2977_s11 }
  0x74   : > { %p2981_p7 = pneg %p2980_p13  ;;  %p2987_p2 = por %p2986_p12, %p2985_p9 }
  0x76   : > { %p2988_p0 = pnand %p2987_p2, %p2981_p7 }
  0x78   : > { %2991 = shalt.err (!%p2988_p0)
}
  0x79   : > { %s4038_s21 = smov 4   ;;  %s4039_s12 = smov 64  }
  0x7a   : > { %2690 = dma.hbm_to_vmem [thread:$0]  (!%p3304_p6), %s3410_s4, 1024, %s3419_s29, %s3313_s20, %s4039_s12, %s4039_s12, %s4038_s21  }
  0x7b   : > { %s3450_s5 = scalar_lea.hbm %s3989_s7, %s3290_s24  ;;  %s2992_s25 = scalar_lea.hbm %s3982_s0, 512 }
  0x7c   : > { %p2993_p3 = scmp.ne.s32.totalorder %s3982_s0, %s2992_s25  ;;  %p4040_p7 = scmp.ne.s32.totalorder %s4037_s1, 0 }
  0x7d   : > { %p2999_p4 = scmp.lt.u32.totalorder %s2992_s25, %s3982_s0 }
  0x7e   : > { %p2994_p9 = pneg %p4040_p7 }
  0x80   : > { %p2995_p12 = pnand %p2994_p9, %p2993_p3 }
  0x82   : > { %p2996_p1 = pneg %p2995_p12 }
  0x84   : > { %p3001_p5 = pnand %p2999_p4, %p2996_p1 }
  0x86   : > { %3004 = shalt.err (!%p3001_p5)
}
  0x87   : > { %s3005_s20 = scalar_lea.vmem %s3402_s15, 512  ;;  %p3013_p2 = scmp.lt.s32.totalorder %s3402_s15, %s3402_s15 }
  0x88   : > { %p3006_p11 = scmp.ne.s32.totalorder %s3402_s15, %s3005_s20  ;;  %p3014_p0 = scmp.lt.s32.totalorder %s3005_s20, %s3005_s20 }
  0x8a   : > { %p3008_p10 = pnand %p3006_p11, %p2994_p9  ;;  %p3015_p6 = por %p3014_p0, %p3013_p2 }
  0x8c   : > { %p3009_p13 = pneg %p3008_p10 }
  0x8e   : > { %p3016_p8 = pnand %p3015_p6, %p3009_p13 }
  0x90   : > { %3019 = shalt.err (!%p3016_p8)
}
  0x91   : > { %s4041_s6 = smov 8   ;;  %s4042_s9 = smov 128  }
  0x92   : > { %2683 = dma.hbm_to_vmem [thread:$0]  (!%p4040_p7), %s3982_s0, 512, %s3402_s15, [#allocation3], %s4042_s9, %s4042_s9, %s4041_s6  }
  0x93   : > { %s461_s4 = scalar_lea.vmem [#allocation10], %s3296_s26  ;;  %s3020_s10 = scalar_lea.hbm %s3450_s5, 1024 }
  0x94   : > { %s468_s29 = sshll.u32 %s461_s4, 4  ;;  %p3021_p6 = scmp.ne.s32.totalorder %s3450_s5, %s3020_s10  ;;  %s3477_s29 = int_to_ptr.vmem [resolvable:$true] %s468_s29 }
  0x95   : > { %p4043_p8 = scmp.ne.s32.totalorder %s4031_s27, 0  ;;  %s3025_s11 = scalar_lea.hbm %s3989_s7, 2048 }
  0x96   : > { %p3026_p12 = scmp.lt.u32.totalorder %s3450_s5, %s3989_s7  ;;  %p3027_p1 = scmp.lt.u32.totalorder %s3025_s11, %s3020_s10 }
  0x97   : > { %p3023_p3 = pnand %p3021_p6, %p4043_p8  ;;  %p3029_p7 = scmp.lt.u32.totalorder %s3020_s10, %s3450_s5 }
  0x98   : > { %p3028_p4 = por %p3027_p1, %p3026_p12 }
  0x99   : > { %p3024_p9 = pneg %p3023_p3 }
  0x9a   : > { %p3030_p5 = por %p3029_p7, %p3028_p4 }
  0x9c   : > { %p3031_p11 = pnand %p3030_p5, %p3024_p9 }
  0x9e   : > { %3034 = shalt.err (!%p3031_p11)
}
  0x9f   : > { %s3035_s15 = scalar_lea.vmem %s3477_s29, 1024  ;;  %s3182_s20 = smov [#allocation10]  }
  0xa0   : > { %p3036_p10 = scmp.ne.s32.totalorder %s3477_s29, %s3035_s15  ;;  %s3040_s6 = sshll.u32 %s3182_s20, 4  ;;  %s3041_s6 = int_to_ptr.vmem [resolvable:$false] %s3040_s6 }
  0xa1   : > { %s3042_s9 = scalar_lea.vmem %s3041_s6, 2048  ;;  %p3043_p0 = scmp.lt.s32.totalorder %s3477_s29, %s3041_s6 }
  0xa2   : > { %p3038_p13 = pnand %p3036_p10, %p4043_p8  ;;  %p3044_p6 = scmp.lt.s32.totalorder %s3042_s9, %s3035_s15 }
  0xa4   : > { %p3039_p2 = pneg %p3038_p13  ;;  %p3045_p3 = por %p3044_p6, %p3043_p0 }
  0xa6   : > { %p3046_p12 = pnand %p3045_p3, %p3039_p2 }
  0xa8   : > { %3049 = shalt.err (!%p3046_p12)
}
  0xa9   : > { %p4044_p9 = scmp.ne.s32.totalorder %s4030_s30, 0  ;;  %s3508_s4 = scalar_lea.hbm %s3990_s8, %s3290_s24 }
  0xaa   : > { %s482_s10 = scalar_lea.vmem [#allocation11], %s3296_s26  ;;  %s479_s13 = scalar_lea.sflag [#allocation12], %s3287_s23 }
  0xab   : > { %2696 = dma.hbm_to_vmem [thread:$0]  (!%p4044_p9), %s3450_s5, 1024, %s3477_s29, %s3357_s2, %s4039_s12, %s4039_s12, %s4038_s21  }
  0xac   : > { %s489_s1 = sshll.u32 %s482_s10, 4  ;;  %s3050_s11 = scalar_lea.hbm %s3508_s4, 1024  ;;  %s3511_s1 = int_to_ptr.vmem [resolvable:$true] %s489_s1 }
  0xad   : > { %p3051_p1 = scmp.ne.s32.totalorder %s3508_s4, %s3050_s11  ;;  %s3055_s29 = scalar_lea.hbm %s3990_s8, 2048 }
  0xae   : > { %p3056_p5 = scmp.lt.u32.totalorder %s3508_s4, %s3990_s8  ;;  %p3057_p11 = scmp.lt.u32.totalorder %s3055_s29, %s3050_s11 }
  0xaf   : > { %p3053_p4 = pnand %p3051_p1, %p4043_p8  ;;  %p3059_p13 = scmp.lt.u32.totalorder %s3050_s11, %s3508_s4 }
  0xb0   : > { %p3058_p10 = por %p3057_p11, %p3056_p5 }
  0xb1   : > { %p3054_p7 = pneg %p3053_p4 }
  0xb2   : > { %p3060_p2 = por %p3059_p13, %p3058_p10 }
  0xb4   : > { %p3061_p0 = pnand %p3060_p2, %p3054_p7 }
  0xb6   : > { %3064 = shalt.err (!%p3061_p0)
}
  0xb7   : > { %s3065_s26 = scalar_lea.vmem %s3511_s1, 1024  ;;  %s3183_s25 = smov [#allocation11]  }
  0xb8   : > { %p3066_p6 = scmp.ne.s32.totalorder %s3511_s1, %s3065_s26  ;;  %s3070_s15 = sshll.u32 %s3183_s25, 4  ;;  %s3071_s15 = int_to_ptr.vmem [resolvable:$false] %s3070_s15 }
  0xb9   : > { %s3072_s20 = scalar_lea.vmem %s3071_s15, 2048  ;;  %p3073_p1 = scmp.lt.s32.totalorder %s3511_s1, %s3071_s15 }
  0xba   : > { %p3068_p3 = pnand %p3066_p6, %p4043_p8  ;;  %p3074_p4 = scmp.lt.s32.totalorder %s3072_s20, %s3065_s26 }
  0xbc   : > { %p3069_p12 = pneg %p3068_p3  ;;  %p3075_p5 = por %p3074_p4, %p3073_p1 }
  0xbe   : > { %p3076_p11 = pnand %p3075_p5, %p3069_p12 }
  0xc0   : > { %3079 = shalt.err (!%p3076_p11)
}
  0xc1   : > { %2699 = dma.hbm_to_vmem [thread:$0]  (!%p4044_p9), %s3508_s4, 1024, %s3511_s1, %s479_s13, %s4039_s12, %s4039_s12, %s4038_s21  }
  0xc2   : > { %p4045_p8 = scmp.ne.s32.totalorder %s4035_s28, 0 }
  0xc3   : > { %p4046_p7 = scmp.eq.s32.totalorder (!%p4045_p8), %s3385_s22, 0 }
  0xc4   : > { %509 = sbr.rel (%p4045_p8) target bundleno = 2132 (0x854), region = 60 }
  0xcb   : > { %3131 = dma.done.wait (%p4046_p7), [#allocation3], 512   ;;  %p4047_p10 = pmov %p4046_p7 }
  0xcc   : > { %s515_s30 = sand.u32 1, %s3385_s22   ;;  %s517_s27 = sand.u32 1, %s3156_s14  }
  0xcd   : > { %3133 = vsyncadd (%p4047_p10), [#allocation3], 4294966784  ;;  %s2379_s6 = sshll.u32 %s517_s27, 6  ;;  %s516_s9 = scalar_lea.sflag [#allocation6], %s515_s30 }
  0xce   : > { %s3548_s23 = scalar_lea.vmem [#allocation5], %s2379_s6  ;;  %p4048_p13 = scmp.ne.s32.totalorder %s4034_s19, 0 }
  0xd0   : > { %3135 = dma.done.wait (%p4048_p13), %s516_s9, 2048  }
  0xd1   : > { %3137 = vsyncadd (%p4048_p13), %s516_s9, 4294965248  ;;  %s2381_s28 = sshll.u32 %s517_s27, 7  ;;  %s3554_s21 = scalar_lea.vmem [#allocation7], %s2379_s6 }
  0xd2   : > { %s534_s12 = scalar_lea.sflag [#allocation9], %s515_s30  ;;  %s3556_s17 = scalar_lea.vmem [#allocation8], %s2381_s28 }
  0xd3   : > { %3139 = dma.done.wait (%p4048_p13), %s534_s12, 3072  }
  0xd4   : > { %3141 = vsyncadd (%p4048_p13), %s534_s12, 4294964224  ;;  %s3562_s18 = scalar_lea.vmem [#allocation10], %s2379_s6  ;;  %s552_s4 = scalar_lea.sflag [#allocation12], %s517_s27 }
  0xd5   : > { %s3564_s10 = scalar_lea.vmem [#allocation11], %s2379_s6 }
  0xd6   : > { %3143 = dma.done.wait (%p4048_p13), %s552_s4, 1024  }
  0xd7   : > { %3145 = vsyncadd (%p4048_p13), %s552_s4, 4294966272  ;;  %p652_p9 = scmp.lt.s32.totalorder %s3164_s16, 1  ;;  %s4049_s5 = sld [smem:[#allocation30_spill]] }
  0xd8   : > { %p2386_p2 = scmp.ne.s32.totalorder %s3164_s16, 0 }
  0xd9   : > { %s653_s1 = scalar_select %p652_p9, %s3164_s16, 1 }
  0xda   : > { %662 = sbr.rel (%p2386_p2) target bundleno = 225 (0xe1), region = 88  ;;  %v663_v0 = vld [vmem:[#allocation2] sm:$0xff] (!%p2386_p2)  ;;  %v664_v1 = vld [vmem:[#allocation2 + $0x8] sm:$0xff] (!%p2386_p2)  ;;  %v665_v2 = vld [vmem:[#allocation2 + $0x10] sm:$0xff] (!%p2386_p2) }
  0xdb   : > { %s2455_s13 = sshll.u32 %s653_s1, 4  ;;  %667 = vst [vmem:[#allocation13] sm:$0xff] (!%p2386_p2), %v663_v0  ;;  %668 = vst [vmem:[#allocation13 + $0x8] sm:$0xff] (!%p2386_p2), %v664_v1  ;;  %v666_v3 = vld [vmem:[#allocation2 + $0x18] sm:$0xff] (!%p2386_p2) }
  0xdc   : > { %669 = vst [vmem:[#allocation13 + $0x10] sm:$0xff] (!%p2386_p2), %v665_v2  ;;  %670 = vst [vmem:[#allocation13 + $0x18] sm:$0xff] (!%p2386_p2), %v666_v3 }
  0xdd   : > { %s3575_s29 = scalar_lea.vmem %s4049_s5, %s2455_s13 }
  0xe1 PF: > { %v2766_v4 = vld [vmem:[%s3548_s23] sm:$0xff]   ;;  %v2767_v5 = vld [vmem:[%s3548_s23 + $0x8] sm:$0xff]   ;;  %v2768_v6 = vld [vmem:[%s3548_s23 + $0x10] sm:$0xff]   ;;  %s4050_s24 = sld [smem:[#allocation24_spill]]  ;;  %v3184_v50 = vmov 0   ;;  %s4051_s11 = sld [smem:[#allocation25_spill]] }
  0xe2   : > { %2522 = vmatprep.subr.bf16.mxu0 %v2766_v4  ;;  %v2769_v7 = vld [vmem:[%s3548_s23 + $0x18] sm:$0xff]   ;;  %v2770_v9 = vld [vmem:[%s3548_s23 + $0x20] sm:$0xff]   ;;  %v2771_v10 = vld [vmem:[%s3548_s23 + $0x28] sm:$0xff]   ;;  %2765 = vset.pattern.permute.xlu1 %v3184_v50  ;;  %s4052_s15 = sld [smem:[#allocation26_spill]]  ;;  %vm3186_vm0 = vmmov 0   ;;  %vm1604_vm1 = vcmask 523264  }
  0xe3   : > { %2523 = vmatpush3.bf16.msra.mxu0 %v2766_v4  ;;  %v2782_v11 = vld [vmem:[%s3554_s21] sm:$0xff]   ;;  %v2783_v12 = vld [vmem:[%s3554_s21 + $0x8] sm:$0xff]   ;;  %v2772_v13 = vld [vmem:[%s3548_s23 + $0x30] sm:$0xff]   ;;  %2764 = vset.pattern.permute.xlu0 %v3184_v50  ;;  %p2703_p0 = scmp.eq.s32.totalorder %s3385_s22, 1 }
  0xe4   : > { %2524 = vmatprep.subr.bf16.mxu0 %v2767_v5  ;;  %2554 = vmatprep.subr.bf16.mxu1 %v2782_v11  ;;  %v2784_v14 = vld [vmem:[%s3554_s21 + $0x10] sm:$0xff]   ;;  %v2773_v15 = vld [vmem:[%s3548_s23 + $0x38] sm:$0xff]   ;;  %v671_v17 = vld [vmem:[#allocation13] sm:$0xff] }
  0xe5   : > { %2555 = vmatpush3.bf16.msra.mxu1 %v2782_v11  ;;  %v2785_v16 = vld [vmem:[%s3554_s21 + $0x18] sm:$0xff]   ;;  %v672_v18 = vld [vmem:[#allocation13 + $0x8] sm:$0xff]  ;;  %v2786_v20 = vld [vmem:[%s3554_s21 + $0x20] sm:$0xff]  }
  0xe6   : > { %2556 = vmatprep.subr.bf16.mxu1 %v2783_v12  ;;  %v683_v19 = vpack.c.bf16 %v672_v18, %v671_v17  ;;  %v2787_v23 = vld [vmem:[%s3554_s21 + $0x28] sm:$0xff]   ;;  %v2788_v24 = vld [vmem:[%s3554_s21 + $0x30] sm:$0xff]   ;;  %v2789_v27 = vld [vmem:[%s3554_s21 + $0x38] sm:$0xff]  }
  0xe7   : > { %2525 = vmatpush3.bf16.msra.mxu0 %v2767_v5  ;;  %v2774_v8 = vld [vmem:[%s4050_s24] sm:$0xff]   ;;  %v2775_v21 = vld [vmem:[%s4050_s24 + $0x8] sm:$0xff]   ;;  %v2776_v22 = vld [vmem:[%s4050_s24 + $0x10] sm:$0xff]  }
  0xe8   : > { %2526 = vmatprep.subr.bf16.mxu0 %v2768_v6  ;;  %2538 = vmatprep.mubr.bf16.mxu0 %v2774_v8  ;;  %v2777_v25 = vld [vmem:[%s4050_s24 + $0x18] sm:$0xff]   ;;  %v2778_v26 = vld [vmem:[%s4050_s24 + $0x20] sm:$0xff]   ;;  %v673_v28 = vld [vmem:[#allocation13 + $0x10] sm:$0xff]  ;;  %s4053_s20 = smov %s4052_s15 }
  0xe9   : > { %2557 = vmatpush3.bf16.msra.mxu1 %v2783_v12  ;;  %2570 = vmatprep.mubr.bf16.mxu1 %v683_v19  ;;  %v674_v29 = vld [vmem:[#allocation13 + $0x18] sm:$0xff]  ;;  %v2779_v30 = vld [vmem:[%s4050_s24 + $0x28] sm:$0xff]   ;;  %v2780_v32 = vld [vmem:[%s4050_s24 + $0x30] sm:$0xff]  }
  0xea   : > { %2558 = vmatprep.subr.bf16.mxu1 %v2784_v14  ;;  %v684_v31 = vpack.c.bf16 %v674_v29, %v673_v28  ;;  %v2781_v33 = vld [vmem:[%s4050_s24 + $0x38] sm:$0xff]   ;;  %v2792_v34 = vld [vmem:[%s3556_s17 + $0x4] ss:$8 sps:$4 sm:$0xff]   ;;  %v2790_v35 = vld [vmem:[%s3556_s17] ss:$8 sps:$4 sm:$0xff]  }
  0xeb   : > { %2527 = vmatpush3.bf16.msra.mxu0 %v2768_v6  ;;  %v2795_v36 = vld [vmem:[%s3556_s17 + $0x14] ss:$8 sps:$4 sm:$0xff]   ;;  %v2793_v37 = vld [vmem:[%s3556_s17 + $0x10] ss:$8 sps:$4 sm:$0xff]   ;;  %v2798_v38 = vld [vmem:[%s3556_s17 + $0x24] ss:$8 sps:$4 sm:$0xff]  }
  0xec   : > { %2528 = vmatprep.subr.bf16.mxu0 %v2769_v7  ;;  %v2796_v39 = vld [vmem:[%s3556_s17 + $0x20] ss:$8 sps:$4 sm:$0xff]   ;;  %v2801_v40 = vld [vmem:[%s3556_s17 + $0x34] ss:$8 sps:$4 sm:$0xff]   ;;  %v2799_v41 = vld [vmem:[%s3556_s17 + $0x30] ss:$8 sps:$4 sm:$0xff]  }
  0xed   : > { %2559 = vmatpush3.bf16.msra.mxu1 %v2784_v14  ;;  %v2804_v42 = vld [vmem:[%s3556_s17 + $0x44] ss:$8 sps:$4 sm:$0xff]   ;;  %v2802_v43 = vld [vmem:[%s3556_s17 + $0x40] ss:$8 sps:$4 sm:$0xff]   ;;  %v2807_v44 = vld [vmem:[%s3556_s17 + $0x54] ss:$8 sps:$4 sm:$0xff]  }
  0xee   : > { %2560 = vmatprep.subr.bf16.mxu1 %v2785_v16  ;;  %v2805_v45 = vld [vmem:[%s3556_s17 + $0x50] ss:$8 sps:$4 sm:$0xff]   ;;  %v2810_v46 = vld [vmem:[%s3556_s17 + $0x64] ss:$8 sps:$4 sm:$0xff]   ;;  %v2808_v47 = vld [vmem:[%s3556_s17 + $0x60] ss:$8 sps:$4 sm:$0xff]  }
  0xef   : > { %2529 = vmatpush3.bf16.msra.mxu0 %v2769_v7  ;;  %v2813_v48 = vld [vmem:[%s3556_s17 + $0x74] ss:$8 sps:$4 sm:$0xff]   ;;  %v2811_v49 = vld [vmem:[%s3556_s17 + $0x70] ss:$8 sps:$4 sm:$0xff]   ;;  %v675_v52 = vld [vmem:[%s4051_s11] sm:$0xff] }
  0xf0   : > { %2530 = vmatprep.subr.bf16.mxu0 %v2770_v9  ;;  %v677_v51 = vld [vmem:[%s4051_s11 + $0x10] sm:$0xff]  ;;  %1234 = vperm.xlu0 %2764, %v675_v52   ;;  %v678_v53 = vld [vmem:[%s4051_s11 + $0x18] sm:$0xff]  ;;  %v676_v54 = vld [vmem:[%s4051_s11 + $0x8] sm:$0xff] }
  0xf1   : > { %2561 = vmatpush3.bf16.msra.mxu1 %v2785_v16  ;;  %1244 = vperm.xlu1 %2765, %v677_v51   ;;  %v679_v55 = vld [vmem:[%s4052_s15] sm:$0xff]  ;;  %v680_v56 = vld [vmem:[%s4053_s20 + $0x8] sm:$0xff]  ;;  %v681_v57 = vld [vmem:[%s4053_s20 + $0x10] sm:$0xff] }
  0xf2   : > { %2562 = vmatprep.subr.bf16.mxu1 %v2786_v20  ;;  %v682_v58 = vld [vmem:[%s4053_s20 + $0x18] sm:$0xff]  ;;  %v3662_v59 = vld [vmem:[%s3575_s29] ss:$0 sm:$0xff] }
  0xf3   : > { %2531 = vmatpush3.bf16.msra.mxu0 %v2770_v9 }
  0xf4   : > { %2532 = vmatprep.subr.bf16.mxu0 %v2771_v10  ;;  %1239 = vperm.xlu0 %2764, %v676_v54  }
  0xf5   : > { %2563 = vmatpush3.bf16.msra.mxu1 %v2786_v20  ;;  %1249 = vperm.xlu1 %2765, %v678_v53  }
  0xf6   : > { %2564 = vmatprep.subr.bf16.mxu1 %v2787_v23 }
  0xf7   : > { %2533 = vmatpush3.bf16.msra.mxu0 %v2771_v10 }
  0xf8   : > { %2534 = vmatprep.subr.bf16.mxu0 %v2772_v13  ;;  %1582 = vperm.xlu0 %2764, %v679_v55  }
  0xf9   : > { %2565 = vmatpush3.bf16.msra.mxu1 %v2787_v23  ;;  %1587 = vperm.xlu1 %2765, %v680_v56  }
  0xfa   : > { %2566 = vmatprep.subr.bf16.mxu1 %v2788_v24 }
  0xfb   : > { %2535 = vmatpush3.bf16.msra.mxu0 %v2772_v13 }
  0xfc   : > { %2536 = vmatprep.subr.bf16.mxu0 %v2773_v15  ;;  %1592 = vperm.xlu0 %2764, %v681_v57  }
  0xfd   : > { %2567 = vmatpush3.bf16.msra.mxu1 %v2788_v24  ;;  %1597 = vperm.xlu1 %2765, %v682_v58  }
  0xfe   : > { %2568 = vmatprep.subr.bf16.mxu1 %v2789_v27 }
  0xff   : > { %2537 = vmatpush3.bf16.msra.mxu0 %v2773_v15 }
 0x100   : > { %1363 = vmatprep.subr.bf16.mxu0 %v2792_v34 }
 0x101   : > { %2569 = vmatpush3.bf16.msra.mxu1 %v2789_v27 }
 0x102   : > { %2539 = vmatmul.mubr.bf16.vlgmr.msra.gmra.mrb[0].mxu0 %v2775_v21 }
 0x103   : > { %2542 = vmatprep.mubr.bf16.mxu0 %v2776_v22  ;;  %1364 = vmatpush1.bf16.msra.mxu0 %v2790_v35 }
 0x104   : > { %2571 = vmatmul.mubr.bf16.vlgmr.msra.gmra.mrb[0].mxu1 %v684_v31  ;;  %1365 = vmatprep.subr.bf16.mxu0 %v2795_v36 }
 0x107   : > { %1366 = vmatpush1.bf16.msra.mxu0 %v2793_v37 }
 0x108   : > { %1367 = vmatprep.subr.bf16.mxu0 %v2798_v38 }
 0x10a   : > { %2543 = vmatmul.mubr.bf16.gmra.mrb[4].mxu0 %v2777_v25 }
 0x10b   : > { %2546 = vmatprep.mubr.bf16.mxu0 %v2778_v26  ;;  %1368 = vmatpush1.bf16.msra.mxu0 %v2796_v39 }
 0x10c   : > { %1369 = vmatprep.subr.bf16.mxu0 %v2801_v40 }
 0x10f   : > { %1370 = vmatpush1.bf16.msra.mxu0 %v2799_v41 }
 0x110   : > { %1371 = vmatprep.subr.bf16.mxu0 %v2804_v42 }
 0x112   : > { %2547 = vmatmul.mubr.bf16.gmra.mrb[8].mxu0 %v2779_v30 }
 0x113   : > { %2550 = vmatprep.mubr.bf16.mxu0 %v2780_v32  ;;  %1372 = vmatpush1.bf16.msra.mxu0 %v2802_v43 }
 0x114   : > { %1373 = vmatprep.subr.bf16.mxu0 %v2807_v44 }
 0x117   : > { %1374 = vmatpush1.bf16.msra.mxu0 %v2805_v45 }
 0x118   : > { %1375 = vmatprep.subr.bf16.mxu0 %v2810_v46 }
 0x11a   : > { %2551 = vmatmul.mubr.bf16.gmra.mrb[12].mxu0 %v2781_v33 }
 0x11b   : > { %1376 = vmatpush1.bf16.msra.mxu0 %v2808_v47  ;;  %1395 = vmatprep.mubr.bf16.mxu0 %v3184_v50 }
 0x11c   : > { %1377 = vmatprep.subr.bf16.mxu0 %v2813_v48 }
 0x11f   : > { %1378 = vmatpush1.bf16.msra.mxu0 %v2811_v49 }
 0x1d5   : > { %v2540_v60 = vpop.f32.mrb[0].mxu0 }
 0x1d6   : > { %v864_v61 = vadd.f32 %v2540_v60, %v3662_v59  ;;  %v855_v62 = vpop.f32.mrb[1].mxu0 }
 0x1d7   : > { %v856_v63 = vadd.f32 %v855_v62, %v3662_v59  ;;  %v2541_v0 = vpop.f32.mrb[2].mxu0  ;;  %v3685_v47 = vpop.f32.mrb[0].mxu1 }
 0x1d8   : > { %v936_v1 = vmul.f32 %v864_v61, %v864_v61  ;;  %v867_v2 = vadd.f32 %v2541_v0, %v3662_v59  ;;  %v858_v3 = vpop.f32.mrb[3].mxu0  ;;  %v3671_v19 = vmul.f32 0.5, %v864_v61  ;;  %v3693_v54 = vpop.f32.mrb[1].mxu1 }
 0x1d9   : > { %v934_v4 = vmul.f32 %v856_v63, %v856_v63  ;;  %v859_v5 = vadd.f32 %v858_v3, %v3662_v59  ;;  %v3673_v20 = vmul.f32 0.5, %v856_v63 }
 0x1da   : > { %v952_v6 = vmul.f32 %v936_v1, %v864_v61  ;;  %v937_v7 = vmul.f32 %v867_v2, %v867_v2  ;;  %v3681_v42 = vmul.f32 0.5, %v867_v2 }
 0x1db   : > { %v950_v8 = vmul.f32 %v934_v4, %v856_v63  ;;  %v935_v9 = vmul.f32 %v859_v5, %v859_v5  ;;  %v3683_v43 = vmul.f32 0.5, %v859_v5 }
 0x1dc   : > { %v968_v10 = vmul.f32 0.044715, %v952_v6  ;;  %v953_v11 = vmul.f32 %v937_v7, %v867_v2 }
 0x1dd   : > { %v966_v12 = vmul.f32 0.044715, %v950_v8  ;;  %v951_v13 = vmul.f32 %v935_v9, %v859_v5  ;;  %v2544_v14 = vpop.f32.mrb[4].mxu0 }
 0x1de   : > { %v984_v15 = vadd.f32 %v968_v10, %v864_v61  ;;  %v969_v16 = vmul.f32 0.044715, %v953_v11  ;;  %v3669_v17 = vadd.f32 %v2544_v14, %v3662_v59  ;;  %v871_v18 = vpop.f32.mrb[5].mxu0  ;;  %v3700_v61 = vpop.f32.mrb[2].mxu1 }
 0x1df   : > { %v982_v21 = vadd.f32 %v966_v12, %v856_v63  ;;  %v967_v22 = vmul.f32 0.044715, %v951_v13  ;;  %v872_v23 = vadd.f32 %v871_v18, %v3662_v59  ;;  %v2545_v24 = vpop.f32.mrb[6].mxu0  ;;  %v3707_v3 = vpop.f32.mrb[3].mxu1 }
 0x1e0   : > { %v1000_v25 = vmul.f32 0.7978846, %v984_v15  ;;  %v985_v26 = vadd.f32 %v969_v16, %v867_v2  ;;  %v940_v27 = vmul.f32 %v3669_v17, %v3669_v17  ;;  %v883_v28 = vadd.f32 %v2545_v24, %v3662_v59  ;;  %v874_v29 = vpop.f32.mrb[7].mxu0 }
 0x1e1   : > { %v998_v30 = vmul.f32 0.7978846, %v982_v21  ;;  %v983_v31 = vadd.f32 %v967_v22, %v859_v5  ;;  %v938_v32 = vmul.f32 %v872_v23, %v872_v23  ;;  %v875_v33 = vadd.f32 %v874_v29, %v3662_v59 }
 0x1e2   : > { %2830 = vtanh.f32 %v1000_v25  ;;  %v1001_v34 = vmul.f32 0.7978846, %v985_v26  ;;  %v956_v35 = vmul.f32 %v940_v27, %v3669_v17  ;;  %v941_v36 = vmul.f32 %v883_v28, %v883_v28 }
 0x1e3   : > { %2832 = vtanh.f32 %v998_v30  ;;  %v999_v37 = vmul.f32 0.7978846, %v983_v31  ;;  %v954_v38 = vmul.f32 %v938_v32, %v872_v23  ;;  %v939_v39 = vmul.f32 %v875_v33, %v875_v33 }
 0x1e4   : > { %2834 = vtanh.f32 %v1001_v34  ;;  %v972_v40 = vmul.f32 0.044715, %v956_v35  ;;  %v957_v41 = vmul.f32 %v941_v36, %v883_v28  ;;  %v3691_v53 = vmul.f32 0.5, %v872_v23 }
 0x1e5   : > { %2836 = vtanh.f32 %v999_v37  ;;  %v970_v44 = vmul.f32 0.044715, %v954_v38  ;;  %v955_v45 = vmul.f32 %v939_v39, %v875_v33  ;;  %v2548_v46 = vpop.f32.mrb[8].mxu0  ;;  %v3698_v60 = vmul.f32 0.5, %v875_v33 }
 0x1e6   : > { %v988_v48 = vadd.f32 %v972_v40, %v3669_v17  ;;  %v973_v49 = vmul.f32 0.044715, %v957_v41  ;;  %v3689_v51 = vadd.f32 %v2548_v46, %v3662_v59  ;;  %v887_v52 = vpop.f32.mrb[9].mxu0  ;;  %v3721_v18 = vmul.f32 0.5, %v883_v28 }
 0x1e7   : > { %v986_v55 = vadd.f32 %v970_v44, %v872_v23  ;;  %v971_v56 = vmul.f32 0.044715, %v955_v45  ;;  %v3696_v57 = vadd.f32 %v887_v52, %v3662_v59  ;;  %v2549_v58 = vpop.f32.mrb[10].mxu0 }
 0x1e8   : > { %v1004_v62 = vmul.f32 0.7978846, %v988_v48  ;;  %v989_v63 = vadd.f32 %v973_v49, %v883_v28  ;;  %v944_v0 = vmul.f32 %v3689_v51, %v3689_v51  ;;  %v3705_v1 = vadd.f32 %v2549_v58, %v3662_v59  ;;  %v890_v2 = vpop.f32.mrb[11].mxu0 }
 0x1e9   : > { %v1002_v4 = vmul.f32 0.7978846, %v986_v55  ;;  %v987_v5 = vadd.f32 %v971_v56, %v875_v33  ;;  %v942_v6 = vmul.f32 %v3696_v57, %v3696_v57  ;;  %v3712_v7 = vadd.f32 %v890_v2, %v3662_v59 }
 0x1ea   : > { %2838 = vtanh.f32 %v1004_v62  ;;  %v1005_v8 = vmul.f32 0.7978846, %v989_v63  ;;  %v960_v9 = vmul.f32 %v944_v0, %v3689_v51  ;;  %v945_v10 = vmul.f32 %v3705_v1, %v3705_v1 }
 0x1eb   : > { %2840 = vtanh.f32 %v1002_v4  ;;  %v1003_v11 = vmul.f32 0.7978846, %v987_v5  ;;  %v958_v12 = vmul.f32 %v942_v6, %v3696_v57  ;;  %v943_v13 = vmul.f32 %v3712_v7, %v3712_v7 }
 0x1ec   : > { %v2831_v14 = vpop.eup %2830  ;;  %2842 = vtanh.f32 %v1005_v8  ;;  %v976_v15 = vmul.f32 0.044715, %v960_v9  ;;  %v961_v16 = vmul.f32 %v945_v10, %v3705_v1 }
 0x1ed   : > { %v2833_v21 = vpop.eup %2832  ;;  %2844 = vtanh.f32 %v1003_v11  ;;  %v974_v22 = vmul.f32 0.044715, %v958_v12  ;;  %v959_v23 = vmul.f32 %v943_v13, %v3712_v7  ;;  %v2552_v24 = vpop.f32.mrb[12].mxu0  ;;  %v1032_v25 = vadd.f32 1.0, %v2831_v14 }
 0x1ee   : > { %v2835_v26 = vpop.eup %2834  ;;  %v1030_v27 = vadd.f32 1.0, %v2833_v21  ;;  %v992_v29 = vadd.f32 %v976_v15, %v3689_v51  ;;  %v977_v30 = vmul.f32 0.044715, %v961_v16  ;;  %v3726_v31 = vadd.f32 %v2552_v24, %v3662_v59  ;;  %v903_v32 = vpop.f32.mrb[13].mxu0 }
 0x1ef   : > { %v2837_v33 = vpop.eup %2836  ;;  %v990_v28 = vadd.f32 %v974_v22, %v3696_v57  ;;  %v975_v34 = vmul.f32 0.044715, %v959_v23  ;;  %v3730_v35 = vadd.f32 %v903_v32, %v3662_v59  ;;  %v2553_v36 = vpop.f32.mrb[14].mxu0  ;;  %v1033_v37 = vadd.f32 1.0, %v2835_v26 }
 0x1f0   : > { %v1046_v38 = vmul.f32 %v1030_v27, %v3673_v20  ;;  %v1031_v39 = vadd.f32 1.0, %v2837_v33  ;;  %v1008_v40 = vmul.f32 0.7978846, %v992_v29  ;;  %v993_v41 = vadd.f32 %v977_v30, %v3705_v1  ;;  %v906_v44 = vpop.f32.mrb[15].mxu0 }
 0x1f1   : > { %v1006_v45 = vmul.f32 0.7978846, %v990_v28  ;;  %v991_v46 = vadd.f32 %v975_v34, %v3712_v7  ;;  %v948_v48 = vmul.f32 %v3726_v31, %v3726_v31  ;;  %v946_v49 = vmul.f32 %v3730_v35, %v3730_v35 }
 0x1f2   : > { %v1047_v52 = vmul.f32 %v1031_v39, %v3683_v43  ;;  %2846 = vtanh.f32 %v1008_v40  ;;  %v1009_v55 = vmul.f32 0.7978846, %v993_v41  ;;  %v3741_v20 = vadd.f32 %v2553_v36, %v3662_v59 }
 0x1f3   : > { %2848 = vtanh.f32 %v1006_v45  ;;  %v1007_v56 = vmul.f32 0.7978846, %v991_v46  ;;  %v964_v58 = vmul.f32 %v948_v48, %v3726_v31  ;;  %v962_v62 = vmul.f32 %v946_v49, %v3730_v35 }
 0x1f4   : > { %v2839_v63 = vpop.eup %2838  ;;  %2850 = vtanh.f32 %v1009_v55  ;;  %v949_v0 = vmul.f32 %v3741_v20, %v3741_v20  ;;  %v3748_v2 = vadd.f32 %v906_v44, %v3662_v59  ;;  %v1062_v43 = vpack.c.bf16 %v1047_v52, %v1046_v38 }
 0x1f5   : > { %v2841_v4 = vpop.eup %2840  ;;  %2852 = vtanh.f32 %v1007_v56  ;;  %v980_v5 = vmul.f32 0.044715, %v964_v58  ;;  %v978_v6 = vmul.f32 0.044715, %v962_v62  ;;  %v1048_v8 = vmul.f32 %v1032_v25, %v3671_v19 }
 0x1f6   : > { %v2843_v9 = vpop.eup %2842  ;;  %v965_v10 = vmul.f32 %v949_v0, %v3741_v20  ;;  %v947_v11 = vmul.f32 %v3748_v2, %v3748_v2  ;;  %1396 = vmatmul.mubr.bf16.vlgmr.msra.gmra.mrb[16].mxu0 %v1062_v43  ;;  %v1049_v12 = vmul.f32 %v1033_v37, %v3681_v42  ;;  %v1034_v13 = vadd.f32 1.0, %v2841_v4 }
 0x1f7   : > { %v2845_v14 = vpop.eup %2844  ;;  %v996_v59 = vadd.f32 %v980_v5, %v3726_v31  ;;  %v994_v15 = vadd.f32 %v978_v6, %v3730_v35  ;;  %1405 = vmatprep.mubr.bf16.mxu0 %v3184_v50  ;;  %v1036_v16 = vadd.f32 1.0, %v2839_v63  ;;  %v1037_v21 = vadd.f32 1.0, %v2843_v9 }
 0x1f8   : > { %v981_v19 = vmul.f32 0.044715, %v965_v10  ;;  %v963_v22 = vmul.f32 %v947_v11, %v3748_v2  ;;  %v1063_v23 = vpack.c.bf16 %v1049_v12, %v1048_v8  ;;  %v1035_v24 = vadd.f32 1.0, %v2845_v14 }
 0x1f9   : > { %v1012_v25 = vmul.f32 0.7978846, %v996_v59  ;;  %v1010_v26 = vmul.f32 0.7978846, %v994_v15  ;;  %v1050_v42 = vmul.f32 %v1034_v13, %v3691_v53  ;;  %v924_v27 = vmul.f32 0.5, %v3669_v17 }
 0x1fa   : > { %v997_v29 = vadd.f32 %v981_v19, %v3741_v20  ;;  %v979_v30 = vmul.f32 0.044715, %v963_v22  ;;  %v1051_v32 = vmul.f32 %v1035_v24, %v3698_v60  ;;  %v3764_v33 = vmul.f32 %v1037_v21, %v3721_v18  ;;  %v686_v53 = vld [vmem:[%s3575_s29 + $0x1] ss:$0 sm:$0xff] }
 0x1fb   : > { %2854 = vtanh.f32 %v1012_v25  ;;  %v3766_v28 = vmul.f32 %v1036_v16, %v924_v27  ;;  %v926_v18 = vmul.f32 0.5, %v3696_v57  ;;  %v928_v46 = vmul.f32 0.5, %v3689_v51 }
 0x1fc   : > { %v2847_v34 = vpop.eup %2846  ;;  %2856 = vtanh.f32 %v1010_v26  ;;  %v1013_v36 = vmul.f32 0.7978846, %v997_v29  ;;  %v995_v37 = vadd.f32 %v979_v30, %v3748_v2  ;;  %v1064_v38 = vpack.c.bf16 %v1051_v32, %v1050_v42 }
 0x1fd   : > { %v2849_v39 = vpop.eup %2848  ;;  %v1065_v17 = vpack.c.bf16 %v3764_v33, %v3766_v28  ;;  %v1040_v40 = vadd.f32 1.0, %v2847_v34  ;;  %v929_v48 = vmul.f32 0.5, %v3705_v1  ;;  %v1177_v52 = vadd.f32 %v3685_v47, %v686_v53 }
 0x1fe   : > { %v2851_v41 = vpop.eup %2850  ;;  %2858 = vtanh.f32 %v1013_v36  ;;  %v1011_v60 = vmul.f32 0.7978846, %v995_v37  ;;  %1406 = vmatmul.mubr.bf16.gmra.mrb[20].mxu0 %v1063_v23  ;;  %v1038_v44 = vadd.f32 1.0, %v2849_v39  ;;  %v927_v55 = vmul.f32 0.5, %v3712_v7 }
 0x1ff   : > { %v2853_v45 = vpop.eup %2852  ;;  %1415 = vmatprep.mubr.bf16.mxu0 %v3184_v50  ;;  %v1041_v49 = vadd.f32 1.0, %v2851_v41  ;;  %v1169_v58 = vadd.f32 %v3693_v54, %v686_v53  ;;  %v3779_v62 = vmul.f32 %v1040_v40, %v928_v46  ;;  %v1180_v63 = vadd.f32 %v3700_v61, %v686_v53 }
 0x200   : > { %2860 = vtanh.f32 %v1011_v60  ;;  %v1039_v56 = vadd.f32 1.0, %v2853_v45  ;;  %v1172_v0 = vadd.f32 %v3707_v3, %v686_v53  ;;  %v1054_v51 = vmul.f32 %v1038_v44, %v926_v18 }
 0x201   : > { %v3781_v57 = vmul.f32 %v1041_v49, %v929_v48  ;;  %v1190_v47 = vadd.f32 %v1180_v63, %v1177_v52  ;;  %v932_v6 = vmul.f32 0.5, %v3726_v31  ;;  %v930_v10 = vmul.f32 0.5, %v3730_v35 }
 0x202   : > { %v1055_v43 = vmul.f32 %v1039_v56, %v927_v55  ;;  %v1183_v4 = vadd.f32 %v1172_v0, %v1169_v58  ;;  %v933_v11 = vmul.f32 0.5, %v3741_v20  ;;  %v931_v59 = vmul.f32 0.5, %v3748_v2 }
 0x203   : > { %v1067_v1 = vpack.c.bf16 %v3781_v57, %v3779_v62  ;;  %v1191_v54 = vrot.slane %v1190_v47, 4 }
 0x204   : > { %v1066_v5 = vpack.c.bf16 %v1055_v43, %v1054_v51  ;;  %v1184_v8 = vrot.slane %v1183_v4, 4  ;;  %v1245_v43 = vpop.permute.xlu1 %1244 }
 0x205   : > { %v2855_v7 = vpop.eup %2854  ;;  %v1192_v12 = vadd.f32 %v1191_v54, %v1190_v47 }
 0x206   : > { %v2857_v9 = vpop.eup %2856  ;;  %1416 = vmatmul.mubr.bf16.gmra.mrb[24].mxu0 %v1064_v38  ;;  %v1044_v61 = vadd.f32 1.0, %v2855_v7  ;;  %v1185_v13 = vadd.f32 %v1184_v8, %v1183_v4 }
 0x207   : > { %1425 = vmatprep.mubr.bf16.mxu0 %v3184_v50  ;;  %v1042_v3 = vadd.f32 1.0, %v2857_v9  ;;  %v1193_v31 = vrot.slane %v1192_v12, 2 }
 0x208   : > { %v2859_v14 = vpop.eup %2858  ;;  %v1060_v16 = vmul.f32 %v1044_v61, %v932_v6  ;;  %v1186_v21 = vrot.slane %v1185_v13, 2  ;;  %v1250_v4 = vpop.permute.xlu1 %1249 }
 0x209   : > { %v1045_v15 = vadd.f32 1.0, %v2859_v14  ;;  %v1058_v22 = vmul.f32 %v1042_v3, %v930_v10  ;;  %v1194_v35 = vadd.f32 %v1193_v31, %v1192_v12  ;;  %v1273_v14 = vlaneseq }
 0x20a   : > { %v2861_v19 = vpop.eup %2860  ;;  %v1187_v25 = vadd.f32 %v1186_v21, %v1185_v13  ;;  %v3185_v13 = vmov 0.0  }
 0x20b   : > { %v1043_v23 = vadd.f32 1.0, %v2861_v19  ;;  %v1061_v24 = vmul.f32 %v1045_v15, %v933_v11  ;;  %v1195_v27 = vrot.slane %v1194_v35, 1  ;;  %2574 = vmatprep.subr.bf16.mxu1 %v3185_v13  ;;  %2610 = vmatprep.subr.bf16.mxu0 %v3185_v13 }
 0x20c   : > { %v1188_v29 = vrot.slane %v1187_v25, 1  ;;  %2582 = vmatprep.mubr.msk.bf16.mxu1 %vm3186_vm0, %v3185_v13 }
 0x20d   : > { %v1059_v26 = vmul.f32 %v1043_v23, %v931_v59  ;;  %v1069_v42 = vpack.c.bf16 %v1061_v24, %v1060_v16  ;;  %v1196_v30 = vadd.f32 %v1195_v27, %v1194_v35  ;;  %v1274_v59 = vshrl.u32 %v1273_v14, 7  ;;  %v2387_v16 = vld [vmem:[%s3575_s29 + $0x2] ss:$8 sm:$0x3] }
 0x20e   : > { %1426 = vmatmul.mubr.bf16.gmra.mrb[28].mxu0 %v1065_v17  ;;  %v1189_v2 = vadd.f32 %v1188_v29, %v1187_v25 }
 0x20f   : > { %1435 = vmatprep.mubr.bf16.mxu0 %v3184_v50  ;;  %v1068_v20 = vpack.c.bf16 %v1059_v26, %v1058_v22  ;;  %v1199_v32 = vmul.f32 0.0625, %v1196_v30  ;;  %v1275_v15 = vsub.s32 0, %v1274_v59  ;;  %v1279_v31 = vsub.s32 1, %v1274_v59 }
 0x210   : > { %v1198_v33 = vmul.f32 0.0625, %v1189_v2 }
 0x211   : > { %v1203_v28 = vsub.f32 %v1180_v63, %v1199_v32  ;;  %v1202_v36 = vsub.f32 %v1177_v52, %v1199_v32  ;;  %v3815_v21 = vrot.slane %v2387_v16, %v1275_v15  ;;  %v3817_v22 = vrot.slane %v2387_v16, %v1279_v31 }
 0x212   : > { %v1201_v34 = vsub.f32 %v1172_v0, %v1198_v33  ;;  %v1200_v37 = vsub.f32 %v1169_v58, %v1198_v33 }
 0x213   : > { %v1207_v38 = vmul.f32 %v1203_v28, %v1203_v28  ;;  %v1206_v39 = vmul.f32 %v1202_v36, %v1202_v36 }
 0x214   : > { %v1205_v53 = vmul.f32 %v1201_v34, %v1201_v34  ;;  %v1204_v40 = vmul.f32 %v1200_v37, %v1200_v37 }
 0x215   : > { %v1215_v41 = vadd.f32 %v1207_v38, %v1206_v39 }
 0x216   : > { %1436 = vmatmul.mubr.bf16.gmra.mrb[32].mxu0 %v1066_v5  ;;  %v1208_v17 = vadd.f32 %v1205_v53, %v1204_v40 }
 0x217   : > { %1445 = vmatprep.mubr.bf16.mxu0 %v3184_v50  ;;  %v1216_v60 = vrot.slane %v1215_v41, 4 }
 0x218   : > { %v1209_v18 = vrot.slane %v1208_v17, 4 }
 0x219   : > { %v1217_v44 = vadd.f32 %v1216_v60, %v1215_v41 }
 0x21a   : > { %v1210_v45 = vadd.f32 %v1209_v18, %v1208_v17 }
 0x21b   : > { %v1218_v46 = vrot.slane %v1217_v44, 2 }
 0x21c   : > { %v1211_v48 = vrot.slane %v1210_v45, 2 }
 0x21d   : > { %v1219_v49 = vadd.f32 %v1218_v46, %v1217_v44 }
 0x21e   : > { %1446 = vmatmul.mubr.bf16.gmra.mrb[36].mxu0 %v1067_v1  ;;  %v1212_v52 = vadd.f32 %v1211_v48, %v1210_v45  ;;  %v1235_v1 = vpop.permute.xlu0 %1234 }
 0x21f   : > { %1455 = vmatprep.mubr.bf16.mxu0 %v3184_v50  ;;  %v1220_v55 = vrot.slane %v1219_v49, 1 }
 0x220   : > { %v1213_v56 = vrot.slane %v1212_v52, 1 }
 0x221   : > { %v1221_v58 = vadd.f32 %v1220_v55, %v1219_v49 }
 0x222   : > { %v1214_v62 = vadd.f32 %v1213_v56, %v1212_v52  ;;  %v1240_v54 = vpop.permute.xlu0 %1239 }
 0x223   : > { %v1223_v57 = vmul.f32 0.0625, %v1221_v58 }
 0x224   : > { %v1222_v63 = vmul.f32 0.0625, %v1214_v62 }
 0x225   : > { %v1225_v0 = vadd.f32 1e-05, %v1223_v57 }
 0x226   : > { %1456 = vmatmul.mubr.bf16.gmra.mrb[40].mxu0 %v1068_v20  ;;  %v1224_v51 = vadd.f32 1e-05, %v1222_v63 }
 0x227   : > { %1465 = vmatprep.mubr.bf16.mxu0 %v3184_v50  ;;  %2862 = vrsqrt.f32 %v1225_v0 }
 0x228   : > { %2864 = vrsqrt.f32 %v1224_v51 }
 0x22e   : > { %1466 = vmatmul.mubr.bf16.gmra.mrb[44].mxu0 %v1069_v42 }
 0x22f   : > { %2618 = vmatprep.mubr.msk.bf16.mxu0 %vm3186_vm0, %v3185_v13 }
 0x231   : > { %v2863_v47 = vpop.eup %2862 }
 0x232   : > { %v2865_v5 = vpop.eup %2864  ;;  %v1230_v7 = vmul.f32 %v2863_v47, %v1202_v36  ;;  %v1231_v6 = vmul.f32 %v2863_v47, %v1203_v28 }
 0x233   : > { %v1228_v8 = vmul.f32 %v2865_v5, %v1200_v37  ;;  %v1229_v9 = vmul.f32 %v2865_v5, %v1201_v34 }
 0x234   : > { %v3796_v10 = vmul.f32 %v1245_v43, %v1230_v7  ;;  %v3798_v61 = vmul.f32 %v1250_v4, %v1231_v6 }
 0x235   : > { %v3800_v50 = vmul.f32 %v1235_v1, %v1228_v8  ;;  %v3802_v3 = vmul.f32 %v1240_v54, %v1229_v9 }
 0x236   : > { %v1493_v11 = vpack.c.bf16 %v3798_v61, %v3796_v10 }
 0x237   : > { %v1492_v12 = vpack.c.bf16 %v3802_v3, %v3800_v50 }
 0x2c9   : > { %v1397_v19 = vpop.f32.mrb[16].mxu0 }
 0x2ca   : > { %v1399_v23 = vpop.f32.mrb[17].mxu0  ;;  %v1398_v35 = vadd.f32 %v1397_v19, %v3815_v21 }
 0x2cb   : > { %v1401_v24 = vpop.f32.mrb[18].mxu0  ;;  %v3822_v42 = vadd.f32 %v1399_v23, %v3817_v22 }
 0x2cc   : > { %v1402_v25 = vadd.f32 %v1401_v24, %v3815_v21  ;;  %v1403_v26 = vpop.f32.mrb[19].mxu0 }
 0x2cd   : > { %v3825_v27 = vadd.f32 %v1403_v26, %v3817_v22 }
 0x2ce   : > { %v1476_v29 = vpack.c.bf16 %v1402_v25, %v1398_v35 }
 0x2cf   : > { %v1477_v20 = vpack.c.bf16 %v3825_v27, %v3822_v42 }
 0x2d0   : > { %2575 = vmatpush3.bf16.xpose.msra.mxu1 %v1476_v29 }
 0x2d1   : > { %v1407_v30 = vpop.f32.mrb[20].mxu0  ;;  %2576 = vmatprep.subr.bf16.mxu1 %v3185_v13 }
 0x2d2   : > { %v1409_v2 = vpop.f32.mrb[21].mxu0  ;;  %v1408_v33 = vadd.f32 %v1407_v30, %v3815_v21 }
 0x2d3   : > { %v1411_v32 = vpop.f32.mrb[22].mxu0  ;;  %v3833_v36 = vadd.f32 %v1409_v2, %v3817_v22 }
 0x2d4   : > { %v1412_v28 = vadd.f32 %v1411_v32, %v3815_v21  ;;  %v1413_v34 = vpop.f32.mrb[23].mxu0 }
 0x2d5   : > { %v3836_v37 = vadd.f32 %v1413_v34, %v3817_v22 }
 0x2d6   : > { %v1478_v38 = vpack.c.bf16 %v1412_v28, %v1408_v33 }
 0x2d7   : > { %v1479_v53 = vpack.c.bf16 %v3836_v37, %v3833_v36  ;;  %v1588_v36 = vpop.permute.xlu1 %1587 }
 0x2d8   : > { %2577 = vmatpush3.bf16.xpose.msra.mxu1 %v1478_v38 }
 0x2d9   : > { %v1417_v39 = vpop.f32.mrb[24].mxu0  ;;  %2578 = vmatprep.subr.bf16.mxu1 %v3185_v13 }
 0x2da   : > { %v1419_v40 = vpop.f32.mrb[25].mxu0  ;;  %v1418_v17 = vadd.f32 %v1417_v39, %v3815_v21 }
 0x2db   : > { %v1421_v41 = vpop.f32.mrb[26].mxu0  ;;  %v3844_v44 = vadd.f32 %v1419_v40, %v3817_v22 }
 0x2dc   : > { %v1422_v60 = vadd.f32 %v1421_v41, %v3815_v21  ;;  %v1423_v18 = vpop.f32.mrb[27].mxu0 }
 0x2dd   : > { %v3847_v45 = vadd.f32 %v1423_v18, %v3817_v22 }
 0x2de   : > { %v1480_v46 = vpack.c.bf16 %v1422_v60, %v1418_v17 }
 0x2df   : > { %v1481_v48 = vpack.c.bf16 %v3847_v45, %v3844_v44 }
 0x2e0   : > { %2579 = vmatpush3.bf16.xpose.msra.mxu1 %v1480_v46 }
 0x2e1   : > { %v1427_v49 = vpop.f32.mrb[28].mxu0  ;;  %2580 = vmatprep.subr.bf16.mxu1 %v3185_v13 }
 0x2e2   : > { %v1429_v52 = vpop.f32.mrb[29].mxu0  ;;  %v1428_v56 = vadd.f32 %v1427_v49, %v3815_v21 }
 0x2e3   : > { %v1431_v55 = vpop.f32.mrb[30].mxu0  ;;  %v3855_v57 = vadd.f32 %v1429_v52, %v3817_v22 }
 0x2e4   : > { %v1432_v58 = vadd.f32 %v1431_v55, %v3815_v21  ;;  %v1433_v62 = vpop.f32.mrb[31].mxu0 }
 0x2e5   : > { %v3858_v63 = vadd.f32 %v1433_v62, %v3817_v22 }
 0x2e6   : > { %v1482_v0 = vpack.c.bf16 %v1432_v58, %v1428_v56 }
 0x2e7   : > { %v1483_v51 = vpack.c.bf16 %v3858_v63, %v3855_v57 }
 0x2e8   : > { %2581 = vmatpush3.bf16.xpose.msra.mxu1 %v1482_v0 }
 0x2e9   : > { %v1437_v43 = vpop.f32.mrb[32].mxu0  ;;  %2586 = vmatprep.subr.bf16.mxu1 %v3185_v13 }
 0x2ea   : > { %v1439_v1 = vpop.f32.mrb[33].mxu0  ;;  %v1438_v4 = vadd.f32 %v1437_v43, %v3815_v21 }
 0x2eb   : > { %v1441_v47 = vpop.f32.mrb[34].mxu0  ;;  %v1440_v6 = vadd.f32 %v1439_v1, %v3817_v22 }
 0x2ec   : > { %v1442_v5 = vadd.f32 %v1441_v47, %v3815_v21  ;;  %v1443_v7 = vpop.f32.mrb[35].mxu0 }
 0x2ed   : > { %v1444_v54 = vadd.f32 %v1443_v7, %v3817_v22 }
 0x2ee   : > { %v1484_v8 = vpack.c.bf16 %v1442_v5, %v1438_v4 }
 0x2ef   : > { %v1485_v9 = vpack.c.bf16 %v1444_v54, %v1440_v6  ;;  %2583 = vmatmul.mubr.bf16.vlgmr.msra.gmra.mrb[4].mxu1 %v1492_v12 }
 0x2f0   : > { %2587 = vmatpush3.bf16.xpose.msra.mxu1 %v1484_v8  ;;  %2594 = vmatprep.mubr.msk.bf16.mxu1 %vm3186_vm0, %v3185_v13  ;;  %v1598_v8 = vpop.permute.xlu1 %1597 }
 0x2f1   : > { %v1447_v14 = vpop.f32.mrb[36].mxu0  ;;  %2611 = vmatpush3.bf16.msra.mxu0 %v1485_v9  ;;  %2588 = vmatprep.subr.bf16.mxu1 %v3185_v13 }
 0x2f2   : > { %v1449_v59 = vpop.f32.mrb[37].mxu0  ;;  %2612 = vmatprep.subr.bf16.mxu0 %v3185_v13  ;;  %v1448_v16 = vadd.f32 %v1447_v14, %v3815_v21 }
 0x2f3   : > { %v1451_v15 = vpop.f32.mrb[38].mxu0  ;;  %v1450_v50 = vadd.f32 %v1449_v59, %v3817_v22 }
 0x2f4   : > { %v1452_v31 = vadd.f32 %v1451_v15, %v3815_v21  ;;  %v1453_v19 = vpop.f32.mrb[39].mxu0 }
 0x2f5   : > { %v1454_v3 = vadd.f32 %v1453_v19, %v3817_v22 }
 0x2f6   : > { %v1486_v12 = vpack.c.bf16 %v1452_v31, %v1448_v16 }
 0x2f7   : > { %v1487_v23 = vpack.c.bf16 %v1454_v3, %v1450_v50 }
 0x2f8   : > { %2589 = vmatpush3.bf16.xpose.msra.mxu1 %v1486_v12 }
 0x2f9   : > { %v1457_v24 = vpop.f32.mrb[40].mxu0  ;;  %2613 = vmatpush3.bf16.msra.mxu0 %v1487_v23  ;;  %2590 = vmatprep.subr.bf16.mxu1 %v3185_v13 }
 0x2fa   : > { %v1459_v35 = vpop.f32.mrb[41].mxu0  ;;  %2614 = vmatprep.subr.bf16.mxu0 %v3185_v13  ;;  %v1458_v26 = vadd.f32 %v1457_v24, %v3815_v21 }
 0x2fb   : > { %v1461_v25 = vpop.f32.mrb[42].mxu0  ;;  %v1460_v2 = vadd.f32 %v1459_v35, %v3817_v22 }
 0x2fc   : > { %v1462_v29 = vadd.f32 %v1461_v25, %v3815_v21  ;;  %v1463_v30 = vpop.f32.mrb[43].mxu0 }
 0x2fd   : > { %v1464_v32 = vadd.f32 %v1463_v30, %v3817_v22 }
 0x2fe   : > { %v1488_v33 = vpack.c.bf16 %v1462_v29, %v1458_v26 }
 0x2ff   : > { %v1489_v28 = vpack.c.bf16 %v1464_v32, %v1460_v2 }
 0x300   : > { %2591 = vmatpush3.bf16.xpose.msra.mxu1 %v1488_v33 }
 0x301   : > { %v1467_v34 = vpop.f32.mrb[44].mxu0  ;;  %2615 = vmatpush3.bf16.msra.mxu0 %v1489_v28  ;;  %2592 = vmatprep.subr.bf16.mxu1 %v3185_v13 }
 0x302   : > { %v1469_v38 = vpop.f32.mrb[45].mxu0  ;;  %2616 = vmatprep.subr.bf16.mxu0 %v3185_v13  ;;  %v1468_v40 = vadd.f32 %v1467_v34, %v3815_v21 }
 0x303   : > { %v1471_v39 = vpop.f32.mrb[46].mxu0  ;;  %v1470_v60 = vadd.f32 %v1469_v38, %v3817_v22 }
 0x304   : > { %v1472_v41 = vadd.f32 %v1471_v39, %v3815_v21  ;;  %v1473_v17 = vpop.f32.mrb[47].mxu0  ;;  %v1583_v21 = vpop.permute.xlu0 %1582 }
 0x305   : > { %v1474_v18 = vadd.f32 %v1473_v17, %v3817_v22 }
 0x306   : > { %v1490_v46 = vpack.c.bf16 %v1472_v41, %v1468_v40 }
 0x307   : > { %v1491_v49 = vpack.c.bf16 %v1474_v18, %v1470_v60 }
 0x308   : > { %2593 = vmatpush3.bf16.xpose.msra.mxu1 %v1490_v46  ;;  %v1593_v47 = vpop.permute.xlu0 %1592 }
 0x309   : > { %2617 = vmatpush3.bf16.msra.mxu0 %v1491_v49  ;;  %2598 = vmatprep.subr.bf16.mxu1 %v3185_v13 }
 0x30f   : > { %2595 = vmatmul.mubr.bf16.vlgmr.msra.gmra.mrb[8].mxu1 %v1493_v11 }
 0x310   : > { %2599 = vmatpush3.bf16.msra.mxu1 %v1477_v20  ;;  %2606 = vmatprep.mubr.msk.bf16.mxu1 %vm3186_vm0, %v3185_v13 }
 0x311   : > { %2600 = vmatprep.subr.bf16.mxu1 %v3185_v13 }
 0x314   : > { %2601 = vmatpush3.bf16.msra.mxu1 %v1479_v53 }
 0x315   : > { %2602 = vmatprep.subr.bf16.mxu1 %v3185_v13 }
 0x318   : > { %2603 = vmatpush3.bf16.msra.mxu1 %v1481_v48 }
 0x319   : > { %2604 = vmatprep.subr.bf16.mxu1 %v3185_v13 }
 0x31c   : > { %2605 = vmatpush3.bf16.msra.mxu1 %v1483_v51 }
 0x3c2   : > { %v1528_v10 = vpop.f32.mrb[4].mxu1 }
 0x3c3   : > { %v1576_v61 = vmul.f32 0.088388346, %v1528_v10  ;;  %v2584_v11 = vpop.f32.mrb[5].mxu1 }
 0x3c4   : > { %v1531_v22 = vpop.f32.mrb[6].mxu1 }
 0x3c5   : > { %v1600_v42 = vadd.f32 %v1583_v21, %v1576_v61  ;;  %v1577_v27 = vmul.f32 0.088388346, %v1531_v22  ;;  %v2585_v20 = vpop.f32.mrb[7].mxu1 }
 0x3c7   : > { %v1601_v37 = vadd.f32 %v1588_v36, %v1577_v27  ;;  %v1605_v53 = vsel %vm1604_vm1, %v1600_v42, -inf }
 0x3c9   : > { %v1606_v44 = vsel %vm1604_vm1, %v1601_v37, -inf }
 0x3ca   : > { %v1607_v13 = vmax.f32 %v1605_v53, %v1606_v44 }
 0x3cc   : > { %v1608_v45 = vrot.slane %v1607_v13, 4 }
 0x3ce   : > { %v1609_v48 = vmax.f32 %v1607_v13, %v1608_v45  ;;  %v2814_v13 = vld [vmem:[%s3562_s18] sm:$0xff]   ;;  %v2815_v45 = vld [vmem:[%s3562_s18 + $0x8] sm:$0xff]  }
 0x3cf   : > { %2622 = vmatprep.subr.bf16.mxu1 %v2814_v13 }
 0x3d0   : > { %v1610_v52 = vrot.slane %v1609_v48, 2 }
 0x3d2   : > { %v1611_v55 = vmax.f32 %v1609_v48, %v1610_v52  ;;  %v2816_v48 = vld [vmem:[%s3562_s18 + $0x10] sm:$0xff]   ;;  %v2817_v52 = vld [vmem:[%s3562_s18 + $0x18] sm:$0xff]  }
 0x3d4   : > { %v1612_v56 = vrot.slane %v1611_v55, 1 }
 0x3d6   : > { %v1613_v58 = vmax.f32 %v1611_v55, %v1612_v56  ;;  %v2818_v55 = vld [vmem:[%s3562_s18 + $0x20] sm:$0xff]   ;;  %v2819_v56 = vld [vmem:[%s3562_s18 + $0x28] sm:$0xff]  }
 0x3d8   : > { %v1623_v62 = vsub.f32 %v1600_v42, %v1613_v58  ;;  %v1624_v57 = vsub.f32 %v1601_v37, %v1613_v58  ;;  %v2820_v58 = vld [vmem:[%s3562_s18 + $0x30] sm:$0xff]  }
 0x3da   : > { %v1627_v63 = vmul.f32 1.442695, %v1623_v62  ;;  %v1629_v0 = vmul.f32 1.442695, %v1624_v57  ;;  %v2821_v62 = vld [vmem:[%s3562_s18 + $0x38] sm:$0xff]   ;;  %s3187_s18 = smov [#allocation13]  }
 0x3dc   : > { %2866 = vpow2.f32 %v1627_v63 }
 0x3dd   : > { %2868 = vpow2.f32 %v1629_v0 }
 0x3e2   : > { %v1569_v51 = vpop.f32.mrb[8].mxu1 }
 0x3e3   : > { %v1578_v43 = vmul.f32 0.088388346, %v1569_v51  ;;  %v2596_v1 = vpop.f32.mrb[9].mxu1 }
 0x3e4   : > { %v1572_v4 = vpop.f32.mrb[10].mxu1 }
 0x3e5   : > { %v1602_v5 = vadd.f32 %v1593_v47, %v1578_v43  ;;  %v1579_v7 = vmul.f32 0.088388346, %v1572_v4  ;;  %v2597_v6 = vpop.f32.mrb[11].mxu1 }
 0x3e6   : > { %v2867_v54 = vpop.eup %2866  ;;  %v2822_v6 = vld [vmem:[%s3564_s10] sm:$0xff]  }
 0x3e7   : > { %v2869_v9 = vpop.eup %2868  ;;  %v1635_v14 = vsel %vm1604_vm1, %v2867_v54, 0.0  ;;  %v1603_v59 = vadd.f32 %v1598_v8, %v1579_v7  ;;  %v1614_v31 = vsel %vm1604_vm1, %v1602_v5, -inf  ;;  %2642 = vmatprep.subr.bf16.mxu0 %v2822_v6  ;;  %v2824_v8 = vld [vmem:[%s3564_s10 + $0x10] sm:$0xff]  }
 0x3e8   : > { %v1636_v15 = vsel %vm1604_vm1, %v2869_v9, 0.0 }
 0x3e9   : > { %v1637_v16 = vadd.f32 %v1636_v15, %v1635_v14  ;;  %v1615_v19 = vsel %vm1604_vm1, %v1603_v59, -inf  ;;  %v2826_v14 = vld [vmem:[%s3564_s10 + $0x20] sm:$0xff]   ;;  %v2828_v15 = vld [vmem:[%s3564_s10 + $0x30] sm:$0xff]  }
 0x3ea   : > { %v1616_v50 = vmax.f32 %v1614_v31, %v1615_v19  ;;  %v689_v19 = vld [vmem:[%s3575_s29 + $0x3] ss:$0 sm:$0xff] }
 0x3eb   : > { %v1638_v3 = vrot.slane %v1637_v16, 4 }
 0x3ec   : > { %v1617_v12 = vrot.slane %v1616_v50, 4 }
 0x3ed   : > { %v1639_v23 = vadd.f32 %v1638_v3, %v1637_v16  ;;  %v2829_v16 = vld [vmem:[%s3564_s10 + $0x38] sm:$0xff]  }
 0x3ee   : > { %v1618_v24 = vmax.f32 %v1616_v50, %v1617_v12 }
 0x3ef   : > { %v1640_v35 = vrot.slane %v1639_v23, 2 }
 0x3f0   : > { %v1619_v25 = vrot.slane %v1618_v24, 2 }
 0x3f1   : > { %v1641_v26 = vadd.f32 %v1640_v35, %v1639_v23 }
 0x3f2   : > { %v1620_v29 = vmax.f32 %v1618_v24, %v1619_v25 }
 0x3f3   : > { %v1642_v30 = vrot.slane %v1641_v26, 1 }
 0x3f4   : > { %v1621_v2 = vrot.slane %v1620_v29, 1 }
 0x3f5   : > { %v1643_v32 = vadd.f32 %v1642_v30, %v1641_v26 }
 0x3f6   : > { %v1622_v33 = vmax.f32 %v1620_v29, %v1621_v2 }
 0x3f7   : > { %2870 = vrcp.f32 %v1643_v32 }
 0x3f8   : > { %v1625_v28 = vsub.f32 %v1602_v5, %v1622_v33  ;;  %v1626_v34 = vsub.f32 %v1603_v59, %v1622_v33  ;;  %v2827_v59 = vld [vmem:[%s3564_s10 + $0x28] sm:$0xff]  }
 0x3fa   : > { %v1631_v38 = vmul.f32 1.442695, %v1625_v28  ;;  %v1633_v39 = vmul.f32 1.442695, %v1626_v34 }
 0x3fc   : > { %2872 = vpow2.f32 %v1631_v38 }
 0x3fd   : > { %2874 = vpow2.f32 %v1633_v39 }
 0x401   : > { %v2871_v40 = vpop.eup %2870 }
 0x402   : > { %v1655_v41 = vmul.f32 %v2871_v40, %v2867_v54  ;;  %v1656_v17 = vmul.f32 %v2871_v40, %v2869_v9  ;;  %v2823_v54 = vld [vmem:[%s3564_s10 + $0x8] sm:$0xff]   ;;  %v2825_v9 = vld [vmem:[%s3564_s10 + $0x18] sm:$0xff]   ;;  %s2134_s10 = sshll.u32 %s3187_s18, 4  ;;  %s2135_s10 = int_to_ptr.vmem [resolvable:$true] %s2134_s10 }
 0x403   : > { %p3087_p1 = scmp.lt.s32.totalorder %s2135_s10, %s2135_s10 }
 0x404   : > { %v1659_v60 = vpack.c.bf16 %v1656_v17, %v1655_v41 }
 0x406   : > { %v2873_v18 = vpop.eup %2872  ;;  %2607 = vmatmul.mubr.msk.bf16.vlgmr.msra.gmra.mrb[12].mxu1 %vm1604_vm1, %v1659_v60 }
 0x407   : > { %v2875_v46 = vpop.eup %2874  ;;  %v1644_v49 = vsel %vm1604_vm1, %v2873_v18, 0.0  ;;  %2623 = vmatpush3.bf16.msra.mxu1 %v2814_v13 }
 0x408   : > { %v1645_v10 = vsel %vm1604_vm1, %v2875_v46, 0.0  ;;  %2624 = vmatprep.subr.bf16.mxu1 %v2815_v45 }
 0x409   : > { %v1646_v61 = vadd.f32 %v1645_v10, %v1644_v49 }
 0x40b   : > { %v1647_v11 = vrot.slane %v1646_v61, 4  ;;  %2625 = vmatpush3.bf16.msra.mxu1 %v2815_v45 }
 0x40c   : > { %2626 = vmatprep.subr.bf16.mxu1 %v2816_v48 }
 0x40d   : > { %v1648_v21 = vadd.f32 %v1647_v11, %v1646_v61 }
 0x40f   : > { %v1649_v22 = vrot.slane %v1648_v21, 2  ;;  %2627 = vmatpush3.bf16.msra.mxu1 %v2816_v48 }
 0x410   : > { %2628 = vmatprep.subr.bf16.mxu1 %v2817_v52 }
 0x411   : > { %v1650_v42 = vadd.f32 %v1649_v22, %v1648_v21 }
 0x413   : > { %v1651_v27 = vrot.slane %v1650_v42, 1  ;;  %2629 = vmatpush3.bf16.msra.mxu1 %v2817_v52 }
 0x414   : > { %2630 = vmatprep.subr.bf16.mxu1 %v2818_v55 }
 0x415   : > { %v1652_v20 = vadd.f32 %v1651_v27, %v1650_v42 }
 0x417   : > { %2876 = vrcp.f32 %v1652_v20  ;;  %2631 = vmatpush3.bf16.msra.mxu1 %v2818_v55 }
 0x418   : > { %2632 = vmatprep.subr.bf16.mxu1 %v2819_v56 }
 0x41b   : > { %2633 = vmatpush3.bf16.msra.mxu1 %v2819_v56 }
 0x41c   : > { %2634 = vmatprep.subr.bf16.mxu1 %v2820_v58 }
 0x41f   : > { %2635 = vmatpush3.bf16.msra.mxu1 %v2820_v58 }
 0x420   : > { %2636 = vmatprep.subr.bf16.mxu1 %v2821_v62 }
 0x421   : > { %v2877_v36 = vpop.eup %2876 }
 0x422   : > { %v1658_v37 = vmul.f32 %v2877_v36, %v2875_v46  ;;  %v1657_v53 = vmul.f32 %v2877_v36, %v2873_v18 }
 0x423   : > { %2637 = vmatpush3.bf16.msra.mxu1 %v2821_v62 }
 0x424   : > { %v1660_v44 = vpack.c.bf16 %v1658_v37, %v1657_v53 }
 0x426   : > { %2619 = vmatmul.mubr.msk.bf16.vlgmr.msra.gmra.mrb[48].mxu0 %vm1604_vm1, %v1660_v44 }
 0x427   : > { %2643 = vmatpush3.bf16.msra.mxu0 %v2822_v6 }
 0x428   : > { %2644 = vmatprep.subr.bf16.mxu0 %v2823_v54 }
 0x42b   : > { %2645 = vmatpush3.bf16.msra.mxu0 %v2823_v54  ;;  %v2898_v54 = vld [vmem:[#allocation13 + $0x18] sm:$0xff] }
 0x42c   : > { %2646 = vmatprep.subr.bf16.mxu0 %v2824_v8 }
 0x42f   : > { %2647 = vmatpush3.bf16.msra.mxu0 %v2824_v8 }
 0x430   : > { %2648 = vmatprep.subr.bf16.mxu0 %v2825_v9 }
 0x433   : > { %2649 = vmatpush3.bf16.msra.mxu0 %v2825_v9  ;;  %v2899_v9 = vld [vmem:[#allocation13 + $0x10] sm:$0xff] }
 0x434   : > { %2650 = vmatprep.subr.bf16.mxu0 %v2826_v14 }
 0x437   : > { %2651 = vmatpush3.bf16.msra.mxu0 %v2826_v14 }
 0x438   : > { %2652 = vmatprep.subr.bf16.mxu0 %v2827_v59 }
 0x43b   : > { %2653 = vmatpush3.bf16.msra.mxu0 %v2827_v59  ;;  %v2900_v59 = vld [vmem:[#allocation13] sm:$0xff] }
 0x43c   : > { %2654 = vmatprep.subr.bf16.mxu0 %v2828_v15 }
 0x43f   : > { %2655 = vmatpush3.bf16.msra.mxu0 %v2828_v15 }
 0x440   : > { %2656 = vmatprep.subr.bf16.mxu0 %v2829_v16 }
 0x443   : > { %2657 = vmatpush3.bf16.msra.mxu0 %v2829_v16  ;;  %v2901_v16 = vld [vmem:[#allocation13 + $0x8] sm:$0xff] }
 0x4d9   : > { %v1698_v57 = vpop.f32.mrb[12].mxu1 }
 0x4da   : > { %v2608_v63 = vpop.f32.mrb[13].mxu1 }
 0x4db   : > { %v1701_v0 = vpop.f32.mrb[14].mxu1 }
 0x4dc   : > { %v1749_v51 = vpack.c.bf16 %v1701_v0, %v1698_v57  ;;  %v2609_v43 = vpop.f32.mrb[15].mxu1 }
 0x4de   : > { %2638 = vmatprep.mubr.bf16.mxu1 %v1749_v51 }
 0x4f9   : > { %v1742_v1 = vpop.f32.mrb[48].mxu0 }
 0x4fa   : > { %v2620_v47 = vpop.f32.mrb[49].mxu0 }
 0x4fb   : > { %v1745_v4 = vpop.f32.mrb[50].mxu0 }
 0x4fc   : > { %v1750_v5 = vpack.c.bf16 %v1745_v4, %v1742_v1  ;;  %v2621_v7 = vpop.f32.mrb[51].mxu0 }
 0x4fe   : > { %2639 = vmatmul.mubr.bf16.vlgmr.msra.gmra.mrb[16].mxu1 %v1750_v5 }
 0x5d1   : > { %v2640_v31 = vpop.f32.mrb[16].mxu1 }
 0x5d2   : > { %v1849_v50 = vpop.f32.mrb[17].mxu1  ;;  %v1858_v12 = vadd.f32 %v2640_v31, %v689_v19 }
 0x5d3   : > { %v2641_v3 = vpop.f32.mrb[18].mxu1  ;;  %v1850_v35 = vadd.f32 %v1849_v50, %v689_v19 }
 0x5d4   : > { %v1861_v23 = vadd.f32 %v2641_v3, %v689_v19  ;;  %v1852_v24 = vpop.f32.mrb[19].mxu1  ;;  %v690_v3 = vld [vmem:[%s3575_s29 + $0x4] ss:$0 sm:$0xff] }
 0x5d5   : > { %v1853_v25 = vadd.f32 %v1852_v24, %v689_v19 }
 0x5d6   : > { %v1871_v26 = vadd.f32 %v1861_v23, %v1858_v12 }
 0x5d7   : > { %v1864_v29 = vadd.f32 %v1853_v25, %v1850_v35 }
 0x5d8   : > { %v1872_v30 = vrot.slane %v1871_v26, 4 }
 0x5d9   : > { %v1865_v2 = vrot.slane %v1864_v29, 4 }
 0x5da   : > { %v1873_v32 = vadd.f32 %v1872_v30, %v1871_v26 }
 0x5db   : > { %v1866_v33 = vadd.f32 %v1865_v2, %v1864_v29 }
 0x5dc   : > { %v1874_v28 = vrot.slane %v1873_v32, 2 }
 0x5dd   : > { %v1867_v34 = vrot.slane %v1866_v33, 2 }
 0x5de   : > { %v1875_v38 = vadd.f32 %v1874_v28, %v1873_v32 }
 0x5df   : > { %v1868_v39 = vadd.f32 %v1867_v34, %v1866_v33 }
 0x5e0   : > { %v1876_v40 = vrot.slane %v1875_v38, 1 }
 0x5e1   : > { %v1869_v41 = vrot.slane %v1868_v39, 1 }
 0x5e2   : > { %v1877_v17 = vadd.f32 %v1876_v40, %v1875_v38 }
 0x5e3   : > { %v1870_v60 = vadd.f32 %v1869_v41, %v1868_v39 }
 0x5e4   : > { %v1879_v18 = vmul.f32 0.0625, %v1877_v17 }
 0x5e5   : > { %v1878_v46 = vmul.f32 0.0625, %v1870_v60 }
 0x5e6   : > { %v1882_v49 = vsub.f32 %v1858_v12, %v1879_v18  ;;  %v1883_v10 = vsub.f32 %v1861_v23, %v1879_v18 }
 0x5e7   : > { %v1880_v61 = vsub.f32 %v1850_v35, %v1878_v46  ;;  %v1881_v11 = vsub.f32 %v1853_v25, %v1878_v46 }
 0x5e8   : > { %v1886_v21 = vmul.f32 %v1882_v49, %v1882_v49  ;;  %v1887_v22 = vmul.f32 %v1883_v10, %v1883_v10 }
 0x5e9   : > { %v1884_v42 = vmul.f32 %v1880_v61, %v1880_v61  ;;  %v1885_v27 = vmul.f32 %v1881_v11, %v1881_v11 }
 0x5ea   : > { %v1895_v20 = vadd.f32 %v1887_v22, %v1886_v21 }
 0x5eb   : > { %v1888_v36 = vadd.f32 %v1885_v27, %v1884_v42 }
 0x5ec   : > { %v1896_v37 = vrot.slane %v1895_v20, 4 }
 0x5ed   : > { %v1889_v53 = vrot.slane %v1888_v36, 4 }
 0x5ee   : > { %v1897_v44 = vadd.f32 %v1896_v37, %v1895_v20 }
 0x5ef   : > { %v1890_v13 = vadd.f32 %v1889_v53, %v1888_v36 }
 0x5f0   : > { %v1898_v45 = vrot.slane %v1897_v44, 2 }
 0x5f1   : > { %v1891_v48 = vrot.slane %v1890_v13, 2 }
 0x5f2   : > { %v1899_v52 = vadd.f32 %v1898_v45, %v1897_v44 }
 0x5f3   : > { %v1892_v55 = vadd.f32 %v1891_v48, %v1890_v13 }
 0x5f4   : > { %v1900_v56 = vrot.slane %v1899_v52, 1 }
 0x5f5   : > { %v1893_v58 = vrot.slane %v1892_v55, 1 }
 0x5f6   : > { %v1901_v62 = vadd.f32 %v1900_v56, %v1899_v52 }
 0x5f7   : > { %v1894_v57 = vadd.f32 %v1893_v58, %v1892_v55 }
 0x5f8   : > { %v1903_v63 = vmul.f32 0.0625, %v1901_v62 }
 0x5f9   : > { %v1902_v0 = vmul.f32 0.0625, %v1894_v57 }
 0x5fa   : > { %v1905_v51 = vadd.f32 1e-05, %v1903_v63 }
 0x5fb   : > { %v1904_v43 = vadd.f32 1e-05, %v1902_v0 }
 0x5fc   : > { %2878 = vrsqrt.f32 %v1905_v51 }
 0x5fd   : > { %2880 = vrsqrt.f32 %v1904_v43 }
 0x606   : > { %v2879_v1 = vpop.eup %2878 }
 0x607   : > { %v2881_v47 = vpop.eup %2880  ;;  %v1910_v4 = vmul.f32 %v2879_v1, %v1882_v49  ;;  %v1911_v5 = vmul.f32 %v2879_v1, %v1883_v10 }
 0x608   : > { %v1909_v7 = vmul.f32 %v2881_v47, %v1881_v11  ;;  %v1908_v6 = vmul.f32 %v2881_v47, %v1880_v61 }
 0x609   : > { %v1915_v8 = vmul.f32 %v2898_v54, %v1911_v5  ;;  %v1914_v14 = vmul.f32 %v2899_v9, %v1910_v4 }
 0x60a   : > { %v1912_v15 = vmul.f32 %v2900_v59, %v1908_v6  ;;  %v1913_v31 = vmul.f32 %v2901_v16, %v1909_v7 }
 0x60b   : > { %v1917_v19 = vpack.c.bf16 %v1915_v8, %v1914_v14 }
 0x60c   : > { %v1916_v50 = vpack.c.bf16 %v1913_v31, %v1912_v15 }
 0x60e   : > { %2658 = vmatprep.mubr.bf16.mxu0 %v1916_v50 }
 0x60f   : > { %2659 = vmatmul.mubr.bf16.vlgmr.msra.gmra.mrb[52].mxu0 %v1917_v19 }
 0x6e2   : > { %v2660_v12 = vpop.f32.mrb[52].mxu0 }
 0x6e3   : > { %v2025_v23 = vadd.f32 %v2660_v12, %v690_v3  ;;  %v2016_v24 = vpop.f32.mrb[53].mxu0 }
 0x6e4   : > { %v2017_v35 = vadd.f32 %v2016_v24, %v690_v3  ;;  %v2661_v25 = vpop.f32.mrb[54].mxu0 }
 0x6e5   : > { %v2037_v26 = vmul.f32 %v2025_v23, %v2025_v23  ;;  %v2028_v29 = vadd.f32 %v2661_v25, %v690_v3  ;;  %v2019_v30 = vpop.f32.mrb[55].mxu0  ;;  %v2033_v56 = vmul.f32 0.5, %v2025_v23 }
 0x6e6   : > { %v2035_v2 = vmul.f32 %v2017_v35, %v2017_v35  ;;  %v2020_v32 = vadd.f32 %v2019_v30, %v690_v3  ;;  %v2031_v36 = vmul.f32 0.5, %v2017_v35 }
 0x6e7   : > { %v2041_v33 = vmul.f32 %v2037_v26, %v2025_v23  ;;  %v2038_v28 = vmul.f32 %v2028_v29, %v2028_v29  ;;  %v2034_v57 = vmul.f32 0.5, %v2028_v29 }
 0x6e8   : > { %v2039_v34 = vmul.f32 %v2035_v2, %v2017_v35  ;;  %v2036_v38 = vmul.f32 %v2020_v32, %v2020_v32  ;;  %v2032_v13 = vmul.f32 0.5, %v2020_v32 }
 0x6e9   : > { %v2045_v39 = vmul.f32 0.044715, %v2041_v33  ;;  %v2042_v40 = vmul.f32 %v2038_v28, %v2028_v29 }
 0x6ea   : > { %v2043_v41 = vmul.f32 0.044715, %v2039_v34  ;;  %v2040_v17 = vmul.f32 %v2036_v38, %v2020_v32  ;;  %v692_v34 = vld [vmem:[%s3575_s29 + $0x6] ss:$0 sm:$0xff] }
 0x6eb   : > { %v2046_v60 = vmul.f32 0.044715, %v2042_v40  ;;  %v2049_v18 = vadd.f32 %v2045_v39, %v2025_v23 }
 0x6ec   : > { %v2044_v46 = vmul.f32 0.044715, %v2040_v17  ;;  %v2047_v49 = vadd.f32 %v2043_v41, %v2017_v35 }
 0x6ed   : > { %v2053_v10 = vmul.f32 0.7978846, %v2049_v18  ;;  %v2050_v61 = vadd.f32 %v2046_v60, %v2028_v29 }
 0x6ee   : > { %v2051_v11 = vmul.f32 0.7978846, %v2047_v49  ;;  %v2048_v21 = vadd.f32 %v2044_v46, %v2020_v32  ;;  %v691_v32 = vld [vmem:[%s3575_s29 + $0x5] ss:$0 sm:$0xff]  ;;  %s3080_s29 = scalar_lea.vmem %s2135_s10, 512 }
 0x6ef   : > { %2882 = vtanh.f32 %v2053_v10  ;;  %v2054_v42 = vmul.f32 0.7978846, %v2050_v61  ;;  %p3081_p6 = scmp.ne.s32.totalorder %s2135_s10, %s3080_s29  ;;  %p3088_p4 = scmp.lt.s32.totalorder %s3080_s29, %s3080_s29 }
 0x6f0   : > { %2884 = vtanh.f32 %v2051_v11  ;;  %v2052_v22 = vmul.f32 0.7978846, %v2048_v21 }
 0x6f1   : > { %p3082_p3 = pnand %p3081_p6, %p2703_p0  ;;  %p3089_p5 = por %p3088_p4, %p3087_p1 }
 0x6f2   : > { %2886 = vtanh.f32 %v2052_v22 }
 0x6f3   : > { %2888 = vtanh.f32 %v2054_v42  ;;  %p3083_p12 = pneg %p3082_p3 }
 0x6f5   : > { %p3090_p11 = pnand %p3089_p5, %p3083_p12 }
 0x6f9   : > { %v2883_v27 = vpop.eup %2882 }
 0x6fa   : > { %v2885_v20 = vpop.eup %2884  ;;  %v2061_v48 = vadd.f32 1.0, %v2883_v27 }
 0x6fb   : > { %v2059_v37 = vadd.f32 1.0, %v2885_v20 }
 0x6fc   : > { %v2887_v53 = vpop.eup %2886  ;;  %v2065_v58 = vmul.f32 %v2061_v48, %v2033_v56 }
 0x6fd   : > { %v2063_v44 = vmul.f32 %v2059_v37, %v2031_v36  ;;  %v2060_v45 = vadd.f32 1.0, %v2887_v53  ;;  %v2889_v52 = vpop.eup %2888 }
 0x6fe   : > { %v2062_v62 = vadd.f32 1.0, %v2889_v52 }
 0x6ff   : > { %2067 = vadd.xlane.f32.xlu0 %v2063_v44  ;;  %v2064_v55 = vmul.f32 %v2060_v45, %v2032_v13 }
 0x700   : > { %v2066_v63 = vmul.f32 %v2062_v62, %v2034_v57 }
 0x701   : > { %2069 = vadd.xlane.f32.xlu1 %v2064_v55 }
 0x703   : > { %2071 = vadd.xlane.f32.xlu0 %v2065_v58 }
 0x707   : > { %2073 = vadd.xlane.f32.xlu0 %v2066_v63 }
 0x78c   : > { %v2068_v0 = vpop.xlane.xlu0 %2067 }
 0x78d   : > { %v2076_v51 = vmul.f32 0.0078125, %v2068_v0 }
 0x78e   : > { %v2070_v43 = vpop.xlane.xlu1 %2069 }
 0x78f   : > { %v2080_v1 = vsub.f32 %v2063_v44, %v2076_v51  ;;  %v2077_v47 = vmul.f32 0.0078125, %v2070_v43 }
 0x790   : > { %v2072_v4 = vpop.xlane.xlu0 %2071 }
 0x791   : > { %v2081_v5 = vsub.f32 %v2064_v55, %v2077_v47  ;;  %v2078_v7 = vmul.f32 0.0078125, %v2072_v4  ;;  %v2084_v6 = vmul.f32 %v2080_v1, %v2080_v1 }
 0x793   : > { %v2082_v54 = vsub.f32 %v2065_v58, %v2078_v7  ;;  %2088 = vadd.xlane.f32.xlu1 %v2084_v6  ;;  %v2085_v8 = vmul.f32 %v2081_v5, %v2081_v5 }
 0x794   : > { %v2074_v9 = vpop.xlane.xlu0 %2073 }
 0x795   : > { %v2079_v14 = vmul.f32 0.0078125, %v2074_v9  ;;  %2090 = vadd.xlane.f32.xlu0 %v2085_v8  ;;  %v2086_v59 = vmul.f32 %v2082_v54, %v2082_v54 }
 0x797   : > { %v2083_v15 = vsub.f32 %v2066_v63, %v2079_v14  ;;  %2092 = vadd.xlane.f32.xlu1 %v2086_v59 }
 0x799   : > { %v2087_v16 = vmul.f32 %v2083_v15, %v2083_v15 }
 0x79b   : > { %2094 = vadd.xlane.f32.xlu0 %v2087_v16 }
 0x820   : > { %v2089_v31 = vpop.xlane.xlu1 %2088 }
 0x821   : > { %v2096_v19 = vmul.f32 0.0078125, %v2089_v31 }
 0x822   : > { %v2091_v50 = vpop.xlane.xlu0 %2090 }
 0x823   : > { %v2100_v3 = vadd.f32 1e-05, %v2096_v19  ;;  %v2097_v12 = vmul.f32 0.0078125, %v2091_v50 }
 0x824   : > { %v2093_v23 = vpop.xlane.xlu1 %2092 }
 0x825   : > { %2890 = vrsqrt.f32 %v2100_v3  ;;  %v2101_v24 = vadd.f32 1e-05, %v2097_v12  ;;  %v2098_v35 = vmul.f32 0.0078125, %v2093_v23 }
 0x827   : > { %2892 = vrsqrt.f32 %v2101_v24  ;;  %v2102_v25 = vadd.f32 1e-05, %v2098_v35 }
 0x828   : > { %v2095_v26 = vpop.xlane.xlu0 %2094 }
 0x829   : > { %2894 = vrsqrt.f32 %v2102_v25  ;;  %v2099_v29 = vmul.f32 0.0078125, %v2095_v26 }
 0x82b   : > { %v2103_v30 = vadd.f32 1e-05, %v2099_v29 }
 0x82d   : > { %2896 = vrsqrt.f32 %v2103_v30 }
 0x82f   : > { %v2891_v2 = vpop.eup %2890 }
 0x830   : > { %v2108_v33 = vmul.f32 %v2891_v2, %v2080_v1 }
 0x831   : > { %v2893_v28 = vpop.eup %2892 }
 0x832   : > { %v2112_v38 = vmul.f32 %v2108_v33, %v691_v32  ;;  %v2109_v39 = vmul.f32 %v2893_v28, %v2081_v5 }
 0x833   : > { %v2895_v40 = vpop.eup %2894 }
 0x834   : > { %v2116_v41 = vadd.f32 %v2112_v38, %v692_v34  ;;  %v2113_v17 = vmul.f32 %v2109_v39, %v691_v32  ;;  %v2110_v60 = vmul.f32 %v2895_v40, %v2082_v54 }
 0x836   : > { %2120 = vst [vmem:[#allocation13] sm:$0xff] %v2116_v41  ;;  %v2117_v18 = vadd.f32 %v2113_v17, %v692_v34  ;;  %v2114_v46 = vmul.f32 %v2110_v60, %v691_v32 }
 0x837   : > { %v2897_v49 = vpop.eup %2896 }
 0x838   : > { %2121 = vst [vmem:[#allocation13 + $0x8] sm:$0xff] %v2117_v18  ;;  %v2118_v10 = vadd.f32 %v2114_v46, %v692_v34  ;;  %v2111_v61 = vmul.f32 %v2897_v49, %v2083_v15 }
 0x83a   : > { %2122 = vst [vmem:[#allocation13 + $0x10] sm:$0xff] %v2118_v10  ;;  %v2115_v11 = vmul.f32 %v2111_v61, %v691_v32 }
 0x83c   : > { %v2119_v21 = vadd.f32 %v2115_v11, %v692_v34 }
 0x83e   : > { %2123 = vst [vmem:[#allocation13 + $0x18] sm:$0xff] %v2119_v21 }
 0x83f   : > { %3093 = shalt.err (!%p3090_p11)
}
 0x840   : > { %s4054_s4 = sld [smem:[#allocation31_spill]] }
 0x846   : > { %s3094_s1 = scalar_lea.hbm %s4054_s4, 512 }
 0x847   : > { %p3095_p8 = scmp.ne.s32.totalorder %s4054_s4, %s3094_s1  ;;  %p3100_p13 = scmp.lt.u32.totalorder %s3094_s1, %s4054_s4 }
 0x849   : > { %p3096_p7 = pnand %p3095_p8, %p2703_p0 }
 0x84b   : > { %p3097_p10 = pneg %p3096_p7 }
 0x84d   : > { %p3102_p9 = pnand %p3100_p13, %p3097_p10 }
 0x84f   : > { %3105 = shalt.err (!%p3102_p9)
}
 0x850   : > { %s3188_s16 = smov 128   ;;  %s3189_s19 = smov 8  }
 0x851   : > { %2677 = dma.vmem_to_hbm [thread:$0]  (%p2703_p0), %s2135_s10, 512, %s4054_s4, [#allocation4], %s3188_s16, %s3188_s16, %s3189_s19  }
 0x852   : > { %3147 = dma.done.wait (%p2703_p0), [#allocation4], 512  }
 0x853   : > { %3149 = vsyncadd (%p2703_p0), [#allocation4], 4294966784 }
 0x854 PF: > { %s4055_s25 = sld [smem:[#allocation21_spill]]  ;;  %s4056_s15 = sld [smem:[#allocation19_spill]] }
 0x855   : > { %s4057_s30 = sld [smem:[#allocation23_spill]]  ;;  %s4058_s16 = sld [smem:[#allocation20_spill]] }
 0x856   : > { %s4059_s17 = sld [smem:[#allocation22_spill]]  ;;  %s4060_s13 = smov %s3156_s14 }
 0x85a   : > { %s31_s18 = sadd.s32 1, %s4055_s25   ;;  %s4061_s14 = smov %s4056_s15 }
 0x85b   : > { %p28_p2 = scmp.ge.s32.totalorder %s31_s18, 4   ;;  %s4062_s15 = smov %s4057_s30 }
 0x85d   :  { %30 = sbr.rel (!%p28_p2) target bundleno = 19 (0x13), region = 169 }
 0x864   :  { %2150 = vsyncpa [#allocation3], 1 }
 0x865   :  { %2152 = vsyncpa [#allocation3 + $0x1], 1 }
 0x866   :  { %2153 = vsyncpa [#allocation6], 1 }
 0x867   :  { %2155 = vsyncpa [#allocation6 + $0x1], 1 }
 0x868   :  { %2156 = vsyncpa [#allocation9], 1 }
 0x869   :  { %2158 = vsyncpa [#allocation9 + $0x1], 1 }
 0x86a   :  { %2159 = vsyncpa [#allocation12], 1 }
 0x86b   :  { %2161 = vsyncpa [#allocation12 + $0x1], 1 }
 0x86c   :  { %2162 = vsyncpa [#allocation4], 1 }
 0x86d   :  { %2164 = vsyncpa [#allocation4 + $0x1], 1 }

</bundles_post_ra>
